<compile_context>
chip_gen: v7x
topology: tpu7x:2x2x1
jax: 0.10.0
libtpu: 0.0.40
codegen_flags: <defaults>
</compile_context>

<pallas_src>
import math
import jax
import jax.numpy as jnp
from jax.experimental import pallas as pl
from jax.experimental.pallas import tpu as pltpu

# --- small GPT-2 style config (scaled down from hidden=2048/heads=16/vocab=128000) ---
VOCAB = 1000
HIDDEN = 64
N_HEAD = 4
HEAD_DIM = HIDDEN // N_HEAD
N_LAYER = 2
N_POS = 32
LN_EPS = 1e-5


# ---------------- fused Pallas kernel ----------------

def _make_gpt2_kernel(B, S):
    M = B * S

    def kernel(x_ref,
               ln1_g_ref, ln1_b_ref,
               wq_ref, wk_ref, wv_ref, bq_ref, bk_ref, bv_ref,
               wo_ref, bo_ref,
               ln2_g_ref, ln2_b_ref,
               fc_w_ref, fc_b_ref, mp_w_ref, mp_b_ref,
               lnf_g_ref, lnf_b_ref,
               o_ref):

        def layer_norm(h, g, b):
            mu = jnp.mean(h, axis=-1, keepdims=True)
            var = jnp.mean(jnp.square(h - mu), axis=-1, keepdims=True)
            return (h - mu) * jax.lax.rsqrt(var + LN_EPS) * g + b

        x = x_ref[...].astype(jnp.float32)                       # (M, HIDDEN)

        # Additive causal bias: built ONCE at full (B, S, S) shape and reused
        # by every layer/head as a single f32 vadd (no re-broadcast, no select).
        row = jax.lax.broadcasted_iota(jnp.int32, (B, S, S), 1)
        col = jax.lax.broadcasted_iota(jnp.int32, (B, S, S), 2)
        causal_bias = jnp.where(row >= col, jnp.float32(0.0), jnp.float32(-1e9))

        inv_sqrt_d = jnp.float32(1.0 / math.sqrt(HEAD_DIM))
        gelu_c = jnp.float32(math.sqrt(2.0 / math.pi))

        for l in range(N_LAYER):                                  # static unroll
            # ---- attention: LN1 -> per-head QKV / scores / PV / proj-accum -> residual
            ln1 = layer_norm(x, ln1_g_ref[l], ln1_b_ref[l])
            ln1_b16 = ln1.astype(jnp.bfloat16)                    # bf16 MXU operand

            attn = jnp.zeros((M, HIDDEN), jnp.float32)
            for h in range(N_HEAD):                               # static unroll
                i = l * N_HEAD + h
                q = jnp.dot(ln1_b16, wq_ref[i],
                            preferred_element_type=jnp.float32) + bq_ref[i]
                k = jnp.dot(ln1_b16, wk_ref[i],
                            preferred_element_type=jnp.float32) + bk_ref[i]
                v = jnp.dot(ln1_b16, wv_ref[i],
                            preferred_element_type=jnp.float32) + bv_ref[i]
                # leading-dim splits only (no lane reshuffle)
                q3 = q.reshape(B, S, HEAD_DIM).astype(jnp.bfloat16)
                k3 = k.reshape(B, S, HEAD_DIM).astype(jnp.bfloat16)
                v3 = v.reshape(B, S, HEAD_DIM).astype(jnp.bfloat16)

                s = jnp.einsum('bqd,bkd->bqk', q3, k3,
                               preferred_element_type=jnp.float32)
                s = s * inv_sqrt_d + causal_bias
                s = s - jnp.max(s, axis=-1, keepdims=True)
                p = jnp.exp(s)
                p = p / jnp.sum(p, axis=-1, keepdims=True)        # exact divide
                o = jnp.einsum('bqk,bkd->bqd', p.astype(jnp.bfloat16), v3,
                               preferred_element_type=jnp.float32)
                # Fold head straight into the (M, HIDDEN) accumulator through
                # its slab of the output projection: no concat, no live
                # per-head buffers held across heads.
                attn = attn + jnp.dot(
                    o.reshape(M, HEAD_DIM).astype(jnp.bfloat16), wo_ref[i],
                    preferred_element_type=jnp.float32)
            x = x + attn + bo_ref[l]

            # ---- MLP: LN2 -> FC -> gelu_new -> proj -> residual
            ln2 = layer_norm(x, ln2_g_ref[l], ln2_b_ref[l])
            hfc = jnp.dot(ln2.astype(jnp.bfloat16), fc_w_ref[l],
                          preferred_element_type=jnp.float32) + fc_b_ref[l]
            hfc = 0.5 * hfc * (1.0 + jnp.tanh(
                gelu_c * (hfc + 0.044715 * hfc * hfc * hfc)))
            mlp = jnp.dot(hfc.astype(jnp.bfloat16), mp_w_ref[l],
                          preferred_element_type=jnp.float32) + mp_b_ref[l]
            x = x + mlp

        o_ref[...] = layer_norm(x, lnf_g_ref[...], lnf_b_ref[...]
                                ).astype(o_ref.dtype)

    return kernel


# ---------------- parameter init (deterministic, GPT-2 style std=0.02) ----------------

def init_params(key):
    std = 0.02
    ks = jax.random.split(key, 6)

    def nrm(k, shape):
        return jax.random.normal(k, shape, jnp.float32) * std

    return {
        "wte": nrm(ks[0], (VOCAB, HIDDEN)),
        "wpe": nrm(ks[1], (N_POS, HIDDEN)),
        "ln_f_g": jnp.ones((1, HIDDEN), jnp.float32),
        "ln_f_b": jnp.zeros((1, HIDDEN), jnp.float32),
        "ln1_g": jnp.ones((N_LAYER, 1, HIDDEN), jnp.float32),
        "ln1_b": jnp.zeros((N_LAYER, 1, HIDDEN), jnp.float32),
        "ln2_g": jnp.ones((N_LAYER, 1, HIDDEN), jnp.float32),
        "ln2_b": jnp.zeros((N_LAYER, 1, HIDDEN), jnp.float32),
        "c_attn_w": nrm(ks[2], (N_LAYER, HIDDEN, 3 * HIDDEN)),
        "c_attn_b": jnp.zeros((N_LAYER, 1, 3 * HIDDEN), jnp.float32),
        "c_proj_w": nrm(ks[3], (N_LAYER, HIDDEN, HIDDEN)),
        "c_proj_b": jnp.zeros((N_LAYER, 1, HIDDEN), jnp.float32),
        "c_fc_w": nrm(ks[4], (N_LAYER, HIDDEN, 4 * HIDDEN)),
        "c_fc_b": jnp.zeros((N_LAYER, 1, 4 * HIDDEN), jnp.float32),
        "mlp_proj_w": nrm(ks[5], (N_LAYER, 4 * HIDDEN, HIDDEN)),
        "mlp_proj_b": jnp.zeros((N_LAYER, 1, HIDDEN), jnp.float32),
    }


def pack_params(p):
    """Wrapper-side layout plumbing: split attention weights head-major and
    pre-cast all matmul weights to bf16 so the kernel does no slicing/concat."""
    L, H, NH, D = N_LAYER, HIDDEN, N_HEAD, HEAD_DIM
    w = p["c_attn_w"].reshape(L, H, 3, NH, D)      # cols -> (qkv, head, dim)
    b = p["c_attn_b"].reshape(L, 3, NH, D)

    def heads_w(t):                                # (L, H, NH, D) -> (L*NH, H, D)
        return t.transpose(0, 2, 1, 3).reshape(L * NH, H, D)

    bf = lambda a: a.astype(jnp.bfloat16)
    return dict(
        ln1_g=p["ln1_g"], ln1_b=p["ln1_b"],
        wq=bf(heads_w(w[:, :, 0])), wk=bf(heads_w(w[:, :, 1])),
        wv=bf(heads_w(w[:, :, 2])),
        bq=b[:, 0].reshape(L * NH, 1, D), bk=b[:, 1].reshape(L * NH, 1, D),
        bv=b[:, 2].reshape(L * NH, 1, D),
        wo=bf(p["c_proj_w"].reshape(L * NH, D, H)), bo=p["c_proj_b"],
        ln2_g=p["ln2_g"], ln2_b=p["ln2_b"],
        fc_w=bf(p["c_fc_w"]), fc_b=p["c_fc_b"],
        mp_w=bf(p["mlp_proj_w"]), mp_b=p["mlp_proj_b"],
        lnf_g=p["ln_f_g"], lnf_b=p["ln_f_b"],
    )


# ---------------- forward pass (past_key_values=None path) ----------------

def gpt2_forward(params, input_ids):
    B, S = input_ids.shape
    assert S <= N_POS, "sequence length exceeds positional table"
    M = B * S

    # Embedding gathers are glue (plain JAX); dropout is identity in eval mode.
    pos = jnp.arange(S)
    h = params["wte"][input_ids] + params["wpe"][pos][None, :, :]
    x = h.reshape(M, HIDDEN).astype(jnp.float32)

    kp = pack_params(params)
    args = (x,
            kp["ln1_g"], kp["ln1_b"],
            kp["wq"], kp["wk"], kp["wv"], kp["bq"], kp["bk"], kp["bv"],
            kp["wo"], kp["bo"],
            kp["ln2_g"], kp["ln2_b"],
            kp["fc_w"], kp["fc_b"], kp["mp_w"], kp["mp_b"],
            kp["lnf_g"], kp["lnf_b"])

    flops = 2 * N_LAYER * (M * HIDDEN * 3 * HIDDEN          # qkv projection
                           + M * HIDDEN * HIDDEN            # attn output proj
                           + 2 * M * HIDDEN * 4 * HIDDEN    # mlp fc + proj
                           + 2 * B * N_HEAD * S * S * HEAD_DIM)  # scores + pv
    transcendentals = N_LAYER * (B * N_HEAD * S * S + M * 4 * HIDDEN)
    bytes_accessed = sum(a.size * a.dtype.itemsize for a in args) + M * HIDDEN * 4

    vmem = pl.BlockSpec(memory_space=pltpu.MemorySpace.VMEM)
    out = pl.pallas_call(
        _make_gpt2_kernel(B, S),
        out_shape=jax.ShapeDtypeStruct((M, HIDDEN), jnp.float32),
        in_specs=[vmem] * len(args),
        out_specs=vmem,
        cost_estimate=pl.CostEstimate(flops=flops,
                                      transcendentals=transcendentals,
                                      bytes_accessed=bytes_accessed),
    )(*args)
    return out.reshape(B, S, HIDDEN)  # last_hidden_state


# ---------------- pure-JAX f32 reference (matches the PyTorch GPT2Model math) ----------------

def gpt2_reference(p, input_ids):
    B, S = input_ids.shape
    pos = jnp.arange(S)
    x = p["wte"][input_ids] + p["wpe"][pos][None, :, :]

    def ln(h, g, b):
        mu = h.mean(-1, keepdims=True)
        var = ((h - mu) ** 2).mean(-1, keepdims=True)
        return (h - mu) / jnp.sqrt(var + LN_EPS) * g + b

    mask = jnp.tril(jnp.ones((S, S), dtype=bool))
    for l in range(N_LAYER):
        h1 = ln(x, p["ln1_g"][l], p["ln1_b"][l])
        qkv = h1 @ p["c_attn_w"][l] + p["c_attn_b"][l]
        q, k, v = jnp.split(qkv, 3, axis=-1)

        def split_heads(t):
            return t.reshape(B, S, N_HEAD, HEAD_DIM).transpose(0, 2, 1, 3)

        q, k, v = map(split_heads, (q, k, v))
        s = (q @ jnp.swapaxes(k, -1, -2)) / math.sqrt(HEAD_DIM)
        s = jnp.where(mask, s, jnp.finfo(jnp.float32).min)
        pw = jax.nn.softmax(s, axis=-1)
        o = (pw @ v).transpose(0, 2, 1, 3).reshape(B, S, HIDDEN)
        x = x + o @ p["c_proj_w"][l] + p["c_proj_b"][l]

        h2 = ln(x, p["ln2_g"][l], p["ln2_b"][l])
        f = h2 @ p["c_fc_w"][l] + p["c_fc_b"][l]
        f = 0.5 * f * (1.0 + jnp.tanh(math.sqrt(2.0 / math.pi)
                                      * (f + 0.044715 * f ** 3)))
        x = x + f @ p["mlp_proj_w"][l] + p["mlp_proj_b"][l]
    return ln(x, p["ln_f_g"], p["ln_f_b"])


if __name__ == "__main__":
    key = jax.random.PRNGKey(0)
    pkey, ikey = jax.random.split(key)
    params = init_params(pkey)

    B, S = 2, 8
    input_ids = jax.random.randint(ikey, (B, S), 0, VOCAB, dtype=jnp.int32)

    out = jax.block_until_ready(jax.jit(gpt2_forward)(params, input_ids))
    assert out.shape == (B, S, HIDDEN)
    assert bool(jnp.all(jnp.isfinite(out)))

    # Numerical check vs. the pure-f32 reference (bf16 MXU operands => loose tol).
    ref = gpt2_reference(params, input_ids)
    err = float(jnp.max(jnp.abs(out - ref)))
    assert err < 0.1, f"max abs error vs reference too large: {err}"

    print("KERNEL_OK")
</pallas_src>

<mosaic_0001>
module attributes {stable_mosaic.version = 11 : i64} {
  func.func @kernel(%arg0: memref<16x64xf32, #tpu.memory_space<vmem>>, %arg1: memref<2x1x64xf32, #tpu.memory_space<vmem>>, %arg2: memref<2x1x64xf32, #tpu.memory_space<vmem>>, %arg3: memref<8x64x16xbf16, #tpu.memory_space<vmem>>, %arg4: memref<8x64x16xbf16, #tpu.memory_space<vmem>>, %arg5: memref<8x64x16xbf16, #tpu.memory_space<vmem>>, %arg6: memref<8x1x16xf32, #tpu.memory_space<vmem>>, %arg7: memref<8x1x16xf32, #tpu.memory_space<vmem>>, %arg8: memref<8x1x16xf32, #tpu.memory_space<vmem>>, %arg9: memref<8x16x64xbf16, #tpu.memory_space<vmem>>, %arg10: memref<2x1x64xf32, #tpu.memory_space<vmem>>, %arg11: memref<2x1x64xf32, #tpu.memory_space<vmem>>, %arg12: memref<2x1x64xf32, #tpu.memory_space<vmem>>, %arg13: memref<2x64x256xbf16, #tpu.memory_space<vmem>>, %arg14: memref<2x1x256xf32, #tpu.memory_space<vmem>>, %arg15: memref<2x256x64xbf16, #tpu.memory_space<vmem>>, %arg16: memref<2x1x64xf32, #tpu.memory_space<vmem>>, %arg17: memref<1x64xf32, #tpu.memory_space<vmem>>, %arg18: memref<1x64xf32, #tpu.memory_space<vmem>>, %arg19: memref<16x64xf32, #tpu.memory_space<vmem>>) attributes {dimension_semantics = [], scalar_prefetch = 0 : i64, scratch_operands = 0 : i64, tpu.core_type = #tpu.core_type<tc>} {
    %c0 = arith.constant 0 : index
    %c0_0 = arith.constant 0 : index
    %0 = vector.load %arg0[%c0, %c0_0] : memref<16x64xf32, #tpu.memory_space<vmem>>, vector<16x64xf32>
    %1 = tpu.iota {dimensions = array<i32: 1>} : vector<2x8x8xi32>
    %2 = tpu.iota {dimensions = array<i32: 2>} : vector<2x8x8xi32>
    %3 = arith.cmpi sge, %1, %2 : vector<2x8x8xi32>
    %cst = arith.constant 0.000000e+00 : f32
    %cst_1 = arith.constant -1.000000e+09 : f32
    %4 = vector.broadcast %cst : f32 to vector<2x8x8xf32>
    %5 = vector.broadcast %cst_1 : f32 to vector<2x8x8xf32>
    %6 = arith.select %3, %4, %5 : vector<2x8x8xi1>, vector<2x8x8xf32>
    %c0_2 = arith.constant 0 : index
    %c0_3 = arith.constant 0 : index
    %c0_4 = arith.constant 0 : index
    %7 = vector.load %arg1[%c0_2, %c0_3, %c0_4] : memref<2x1x64xf32, #tpu.memory_space<vmem>>, vector<1x1x64xf32>
    %8 = vector.shape_cast %7 : vector<1x1x64xf32> to vector<1x64xf32>
    %c0_5 = arith.constant 0 : index
    %c0_6 = arith.constant 0 : index
    %c0_7 = arith.constant 0 : index
    %9 = vector.load %arg2[%c0_5, %c0_6, %c0_7] : memref<2x1x64xf32, #tpu.memory_space<vmem>>, vector<1x1x64xf32>
    %10 = vector.shape_cast %9 : vector<1x1x64xf32> to vector<1x64xf32>
    %cst_8 = arith.constant dense<0.000000e+00> : vector<16xf32>
    %11 = vector.multi_reduction <add>, %0, %cst_8 [1] : vector<16x64xf32> to vector<16xf32>
    %12 = vector.shape_cast %11 : vector<16xf32> to vector<16x1xf32>
    %cst_9 = arith.constant 6.400000e+01 : f32
    %13 = vector.broadcast %cst_9 : f32 to vector<16x1xf32>
    %14 = arith.divf %12, %13 : vector<16x1xf32>
    %15 = vector.broadcast %14 : vector<16x1xf32> to vector<16x64xf32>
    %16 = arith.subf %0, %15 : vector<16x64xf32>
    %17 = arith.mulf %16, %16 : vector<16x64xf32>
    %cst_10 = arith.constant dense<0.000000e+00> : vector<16xf32>
    %18 = vector.multi_reduction <add>, %17, %cst_10 [1] : vector<16x64xf32> to vector<16xf32>
    %19 = vector.shape_cast %18 : vector<16xf32> to vector<16x1xf32>
    %cst_11 = arith.constant 6.400000e+01 : f32
    %20 = vector.broadcast %cst_11 : f32 to vector<16x1xf32>
    %21 = arith.divf %19, %20 : vector<16x1xf32>
    %22 = vector.broadcast %14 : vector<16x1xf32> to vector<16x64xf32>
    %23 = arith.subf %0, %22 : vector<16x64xf32>
    %cst_12 = arith.constant 9.99999974E-6 : f32
    %24 = vector.broadcast %cst_12 : f32 to vector<16x1xf32>
    %25 = arith.addf %21, %24 : vector<16x1xf32>
    %26 = math.rsqrt %25 : vector<16x1xf32>
    %27 = vector.broadcast %26 : vector<16x1xf32> to vector<16x64xf32>
    %28 = arith.mulf %23, %27 : vector<16x64xf32>
    %29 = vector.broadcast %8 : vector<1x64xf32> to vector<16x64xf32>
    %30 = arith.mulf %28, %29 : vector<16x64xf32>
    %31 = vector.broadcast %10 : vector<1x64xf32> to vector<16x64xf32>
    %32 = arith.addf %30, %31 : vector<16x64xf32>
    %33 = arith.truncf %32 : vector<16x64xf32> to vector<16x64xbf16>
    %cst_13 = arith.constant 0.000000e+00 : f32
    %34 = vector.broadcast %cst_13 : f32 to vector<16x64xf32>
    %c0_14 = arith.constant 0 : index
    %c0_15 = arith.constant 0 : index
    %c0_16 = arith.constant 0 : index
    %35 = vector.load %arg3[%c0_14, %c0_15, %c0_16] : memref<8x64x16xbf16, #tpu.memory_space<vmem>>, vector<1x64x16xbf16>
    %36 = vector.shape_cast %35 : vector<1x64x16xbf16> to vector<64x16xbf16>
    %cst_17 = arith.constant dense<0.000000e+00> : vector<16x16xf32>
    %37 = tpu.matmul %33, %36, %cst_17 {dimension_numbers = #tpu.dot_dimension_numbers<[1], [0], [0], [1], [0, 0, 1, 1], [], []>} : vector<16x64xbf16>, vector<64x16xbf16>, vector<16x16xf32> -> vector<16x16xf32>
    %c0_18 = arith.constant 0 : index
    %c0_19 = arith.constant 0 : index
    %c0_20 = arith.constant 0 : index
    %38 = vector.load %arg6[%c0_18, %c0_19, %c0_20] : memref<8x1x16xf32, #tpu.memory_space<vmem>>, vector<1x1x16xf32>
    %39 = vector.shape_cast %38 : vector<1x1x16xf32> to vector<1x16xf32>
    %40 = vector.broadcast %39 : vector<1x16xf32> to vector<16x16xf32>
    %41 = arith.addf %37, %40 : vector<16x16xf32>
    %c0_21 = arith.constant 0 : index
    %c0_22 = arith.constant 0 : index
    %c0_23 = arith.constant 0 : index
    %42 = vector.load %arg4[%c0_21, %c0_22, %c0_23] : memref<8x64x16xbf16, #tpu.memory_space<vmem>>, vector<1x64x16xbf16>
    %43 = vector.shape_cast %42 : vector<1x64x16xbf16> to vector<64x16xbf16>
    %cst_24 = arith.constant dense<0.000000e+00> : vector<16x16xf32>
    %44 = tpu.matmul %33, %43, %cst_24 {dimension_numbers = #tpu.dot_dimension_numbers<[1], [0], [0], [1], [0, 0, 1, 1], [], []>} : vector<16x64xbf16>, vector<64x16xbf16>, vector<16x16xf32> -> vector<16x16xf32>
    %c0_25 = arith.constant 0 : index
    %c0_26 = arith.constant 0 : index
    %c0_27 = arith.constant 0 : index
    %45 = vector.load %arg7[%c0_25, %c0_26, %c0_27] : memref<8x1x16xf32, #tpu.memory_space<vmem>>, vector<1x1x16xf32>
    %46 = vector.shape_cast %45 : vector<1x1x16xf32> to vector<1x16xf32>
    %47 = vector.broadcast %46 : vector<1x16xf32> to vector<16x16xf32>
    %48 = arith.addf %44, %47 : vector<16x16xf32>
    %c0_28 = arith.constant 0 : index
    %c0_29 = arith.constant 0 : index
    %c0_30 = arith.constant 0 : index
    %49 = vector.load %arg5[%c0_28, %c0_29, %c0_30] : memref<8x64x16xbf16, #tpu.memory_space<vmem>>, vector<1x64x16xbf16>
    %50 = vector.shape_cast %49 : vector<1x64x16xbf16> to vector<64x16xbf16>
    %cst_31 = arith.constant dense<0.000000e+00> : vector<16x16xf32>
    %51 = tpu.matmul %33, %50, %cst_31 {dimension_numbers = #tpu.dot_dimension_numbers<[1], [0], [0], [1], [0, 0, 1, 1], [], []>} : vector<16x64xbf16>, vector<64x16xbf16>, vector<16x16xf32> -> vector<16x16xf32>
    %c0_32 = arith.constant 0 : index
    %c0_33 = arith.constant 0 : index
    %c0_34 = arith.constant 0 : index
    %52 = vector.load %arg8[%c0_32, %c0_33, %c0_34] : memref<8x1x16xf32, #tpu.memory_space<vmem>>, vector<1x1x16xf32>
    %53 = vector.shape_cast %52 : vector<1x1x16xf32> to vector<1x16xf32>
    %54 = vector.broadcast %53 : vector<1x16xf32> to vector<16x16xf32>
    %55 = arith.addf %51, %54 : vector<16x16xf32>
    %56 = vector.shape_cast %41 : vector<16x16xf32> to vector<2x8x16xf32>
    %57 = arith.truncf %56 : vector<2x8x16xf32> to vector<2x8x16xbf16>
    %58 = vector.shape_cast %48 : vector<16x16xf32> to vector<2x8x16xf32>
    %59 = arith.truncf %58 : vector<2x8x16xf32> to vector<2x8x16xbf16>
    %60 = vector.shape_cast %55 : vector<16x16xf32> to vector<2x8x16xf32>
    %61 = arith.truncf %60 : vector<2x8x16xf32> to vector<2x8x16xbf16>
    "tpu.trace_start"() <{level = 10 : i32, message = "bqd,bkd->bqk"}> : () -> ()
    %cst_35 = arith.constant dense<0.000000e+00> : vector<2x8x8xf32>
    %62 = tpu.matmul %57, %59, %cst_35 {dimension_numbers = #tpu.dot_dimension_numbers<[2], [2], [1], [1], [0, 0, 0, 1, 1, 1], [0], [0]>} : vector<2x8x16xbf16>, vector<2x8x16xbf16>, vector<2x8x8xf32> -> vector<2x8x8xf32>
    "tpu.trace_stop"() : () -> ()
    %cst_36 = arith.constant 2.500000e-01 : f32
    %63 = vector.broadcast %cst_36 : f32 to vector<2x8x8xf32>
    %64 = arith.mulf %62, %63 : vector<2x8x8xf32>
    %65 = arith.addf %64, %6 : vector<2x8x8xf32>
    %cst_37 = arith.constant dense<0xFF800000> : vector<2x8xf32>
    %66 = vector.multi_reduction <maximumf>, %65, %cst_37 [2] : vector<2x8x8xf32> to vector<2x8xf32>
    %67 = vector.shape_cast %66 : vector<2x8xf32> to vector<2x8x1xf32>
    %68 = vector.broadcast %67 : vector<2x8x1xf32> to vector<2x8x8xf32>
    %69 = arith.subf %65, %68 : vector<2x8x8xf32>
    %70 = math.exp %69 : vector<2x8x8xf32>
    %cst_38 = arith.constant dense<0.000000e+00> : vector<2x8xf32>
    %71 = vector.multi_reduction <add>, %70, %cst_38 [2] : vector<2x8x8xf32> to vector<2x8xf32>
    %72 = vector.shape_cast %71 : vector<2x8xf32> to vector<2x8x1xf32>
    %73 = vector.broadcast %72 : vector<2x8x1xf32> to vector<2x8x8xf32>
    %74 = arith.divf %70, %73 : vector<2x8x8xf32>
    %75 = arith.truncf %74 : vector<2x8x8xf32> to vector<2x8x8xbf16>
    "tpu.trace_start"() <{level = 10 : i32, message = "bqk,bkd->bqd"}> : () -> ()
    %cst_39 = arith.constant dense<0.000000e+00> : vector<2x8x16xf32>
    %76 = tpu.matmul %75, %61, %cst_39 {dimension_numbers = #tpu.dot_dimension_numbers<[2], [1], [1], [2], [0, 0, 0, 1, 1, 2], [0], [0]>} : vector<2x8x8xbf16>, vector<2x8x16xbf16>, vector<2x8x16xf32> -> vector<2x8x16xf32>
    "tpu.trace_stop"() : () -> ()
    %77 = vector.shape_cast %76 : vector<2x8x16xf32> to vector<16x16xf32>
    %78 = arith.truncf %77 : vector<16x16xf32> to vector<16x16xbf16>
    %c0_40 = arith.constant 0 : index
    %c0_41 = arith.constant 0 : index
    %c0_42 = arith.constant 0 : index
    %79 = vector.load %arg9[%c0_40, %c0_41, %c0_42] : memref<8x16x64xbf16, #tpu.memory_space<vmem>>, vector<1x16x64xbf16>
    %80 = vector.shape_cast %79 : vector<1x16x64xbf16> to vector<16x64xbf16>
    %cst_43 = arith.constant dense<0.000000e+00> : vector<16x64xf32>
    %81 = tpu.matmul %78, %80, %cst_43 {dimension_numbers = #tpu.dot_dimension_numbers<[1], [0], [0], [1], [0, 0, 1, 1], [], []>} : vector<16x16xbf16>, vector<16x64xbf16>, vector<16x64xf32> -> vector<16x64xf32>
    %82 = arith.addf %34, %81 : vector<16x64xf32>
    %c1 = arith.constant 1 : index
    %c0_44 = arith.constant 0 : index
    %c0_45 = arith.constant 0 : index
    %83 = vector.load %arg3[%c1, %c0_44, %c0_45] : memref<8x64x16xbf16, #tpu.memory_space<vmem>>, vector<1x64x16xbf16>
    %84 = vector.shape_cast %83 : vector<1x64x16xbf16> to vector<64x16xbf16>
    %cst_46 = arith.constant dense<0.000000e+00> : vector<16x16xf32>
    %85 = tpu.matmul %33, %84, %cst_46 {dimension_numbers = #tpu.dot_dimension_numbers<[1], [0], [0], [1], [0, 0, 1, 1], [], []>} : vector<16x64xbf16>, vector<64x16xbf16>, vector<16x16xf32> -> vector<16x16xf32>
    %c1_47 = arith.constant 1 : index
    %c0_48 = arith.constant 0 : index
    %c0_49 = arith.constant 0 : index
    %86 = vector.load %arg6[%c1_47, %c0_48, %c0_49] : memref<8x1x16xf32, #tpu.memory_space<vmem>>, vector<1x1x16xf32>
    %87 = vector.shape_cast %86 : vector<1x1x16xf32> to vector<1x16xf32>
    %88 = vector.broadcast %87 : vector<1x16xf32> to vector<16x16xf32>
    %89 = arith.addf %85, %88 : vector<16x16xf32>
    %c1_50 = arith.constant 1 : index
    %c0_51 = arith.constant 0 : index
    %c0_52 = arith.constant 0 : index
    %90 = vector.load %arg4[%c1_50, %c0_51, %c0_52] : memref<8x64x16xbf16, #tpu.memory_space<vmem>>, vector<1x64x16xbf16>
    %91 = vector.shape_cast %90 : vector<1x64x16xbf16> to vector<64x16xbf16>
    %cst_53 = arith.constant dense<0.000000e+00> : vector<16x16xf32>
    %92 = tpu.matmul %33, %91, %cst_53 {dimension_numbers = #tpu.dot_dimension_numbers<[1], [0], [0], [1], [0, 0, 1, 1], [], []>} : vector<16x64xbf16>, vector<64x16xbf16>, vector<16x16xf32> -> vector<16x16xf32>
    %c1_54 = arith.constant 1 : index
    %c0_55 = arith.constant 0 : index
    %c0_56 = arith.constant 0 : index
    %93 = vector.load %arg7[%c1_54, %c0_55, %c0_56] : memref<8x1x16xf32, #tpu.memory_space<vmem>>, vector<1x1x16xf32>
    %94 = vector.shape_cast %93 : vector<1x1x16xf32> to vector<1x16xf32>
    %95 = vector.broadcast %94 : vector<1x16xf32> to vector<16x16xf32>
    %96 = arith.addf %92, %95 : vector<16x16xf32>
    %c1_57 = arith.constant 1 : index
    %c0_58 = arith.constant 0 : index
    %c0_59 = arith.constant 0 : index
    %97 = vector.load %arg5[%c1_57, %c0_58, %c0_59] : memref<8x64x16xbf16, #tpu.memory_space<vmem>>, vector<1x64x16xbf16>
    %98 = vector.shape_cast %97 : vector<1x64x16xbf16> to vector<64x16xbf16>
    %cst_60 = arith.constant dense<0.000000e+00> : vector<16x16xf32>
    %99 = tpu.matmul %33, %98, %cst_60 {dimension_numbers = #tpu.dot_dimension_numbers<[1], [0], [0], [1], [0, 0, 1, 1], [], []>} : vector<16x64xbf16>, vector<64x16xbf16>, vector<16x16xf32> -> vector<16x16xf32>
    %c1_61 = arith.constant 1 : index
    %c0_62 = arith.constant 0 : index
    %c0_63 = arith.constant 0 : index
    %100 = vector.load %arg8[%c1_61, %c0_62, %c0_63] : memref<8x1x16xf32, #tpu.memory_space<vmem>>, vector<1x1x16xf32>
    %101 = vector.shape_cast %100 : vector<1x1x16xf32> to vector<1x16xf32>
    %102 = vector.broadcast %101 : vector<1x16xf32> to vector<16x16xf32>
    %103 = arith.addf %99, %102 : vector<16x16xf32>
    %104 = vector.shape_cast %89 : vector<16x16xf32> to vector<2x8x16xf32>
    %105 = arith.truncf %104 : vector<2x8x16xf32> to vector<2x8x16xbf16>
    %106 = vector.shape_cast %96 : vector<16x16xf32> to vector<2x8x16xf32>
    %107 = arith.truncf %106 : vector<2x8x16xf32> to vector<2x8x16xbf16>
    %108 = vector.shape_cast %103 : vector<16x16xf32> to vector<2x8x16xf32>
    %109 = arith.truncf %108 : vector<2x8x16xf32> to vector<2x8x16xbf16>
    "tpu.trace_start"() <{level = 10 : i32, message = "bqd,bkd->bqk"}> : () -> ()
    %cst_64 = arith.constant dense<0.000000e+00> : vector<2x8x8xf32>
    %110 = tpu.matmul %105, %107, %cst_64 {dimension_numbers = #tpu.dot_dimension_numbers<[2], [2], [1], [1], [0, 0, 0, 1, 1, 1], [0], [0]>} : vector<2x8x16xbf16>, vector<2x8x16xbf16>, vector<2x8x8xf32> -> vector<2x8x8xf32>
    "tpu.trace_stop"() : () -> ()
    %cst_65 = arith.constant 2.500000e-01 : f32
    %111 = vector.broadcast %cst_65 : f32 to vector<2x8x8xf32>
    %112 = arith.mulf %110, %111 : vector<2x8x8xf32>
    %113 = arith.addf %112, %6 : vector<2x8x8xf32>
    %cst_66 = arith.constant dense<0xFF800000> : vector<2x8xf32>
    %114 = vector.multi_reduction <maximumf>, %113, %cst_66 [2] : vector<2x8x8xf32> to vector<2x8xf32>
    %115 = vector.shape_cast %114 : vector<2x8xf32> to vector<2x8x1xf32>
    %116 = vector.broadcast %115 : vector<2x8x1xf32> to vector<2x8x8xf32>
    %117 = arith.subf %113, %116 : vector<2x8x8xf32>
    %118 = math.exp %117 : vector<2x8x8xf32>
    %cst_67 = arith.constant dense<0.000000e+00> : vector<2x8xf32>
    %119 = vector.multi_reduction <add>, %118, %cst_67 [2] : vector<2x8x8xf32> to vector<2x8xf32>
    %120 = vector.shape_cast %119 : vector<2x8xf32> to vector<2x8x1xf32>
    %121 = vector.broadcast %120 : vector<2x8x1xf32> to vector<2x8x8xf32>
    %122 = arith.divf %118, %121 : vector<2x8x8xf32>
    %123 = arith.truncf %122 : vector<2x8x8xf32> to vector<2x8x8xbf16>
    "tpu.trace_start"() <{level = 10 : i32, message = "bqk,bkd->bqd"}> : () -> ()
    %cst_68 = arith.constant dense<0.000000e+00> : vector<2x8x16xf32>
    %124 = tpu.matmul %123, %109, %cst_68 {dimension_numbers = #tpu.dot_dimension_numbers<[2], [1], [1], [2], [0, 0, 0, 1, 1, 2], [0], [0]>} : vector<2x8x8xbf16>, vector<2x8x16xbf16>, vector<2x8x16xf32> -> vector<2x8x16xf32>
    "tpu.trace_stop"() : () -> ()
    %125 = vector.shape_cast %124 : vector<2x8x16xf32> to vector<16x16xf32>
    %126 = arith.truncf %125 : vector<16x16xf32> to vector<16x16xbf16>
    %c1_69 = arith.constant 1 : index
    %c0_70 = arith.constant 0 : index
    %c0_71 = arith.constant 0 : index
    %127 = vector.load %arg9[%c1_69, %c0_70, %c0_71] : memref<8x16x64xbf16, #tpu.memory_space<vmem>>, vector<1x16x64xbf16>
    %128 = vector.shape_cast %127 : vector<1x16x64xbf16> to vector<16x64xbf16>
    %cst_72 = arith.constant dense<0.000000e+00> : vector<16x64xf32>
    %129 = tpu.matmul %126, %128, %cst_72 {dimension_numbers = #tpu.dot_dimension_numbers<[1], [0], [0], [1], [0, 0, 1, 1], [], []>} : vector<16x16xbf16>, vector<16x64xbf16>, vector<16x64xf32> -> vector<16x64xf32>
    %130 = arith.addf %82, %129 : vector<16x64xf32>
    %c2 = arith.constant 2 : index
    %c0_73 = arith.constant 0 : index
    %c0_74 = arith.constant 0 : index
    %131 = vector.load %arg3[%c2, %c0_73, %c0_74] : memref<8x64x16xbf16, #tpu.memory_space<vmem>>, vector<1x64x16xbf16>
    %132 = vector.shape_cast %131 : vector<1x64x16xbf16> to vector<64x16xbf16>
    %cst_75 = arith.constant dense<0.000000e+00> : vector<16x16xf32>
    %133 = tpu.matmul %33, %132, %cst_75 {dimension_numbers = #tpu.dot_dimension_numbers<[1], [0], [0], [1], [0, 0, 1, 1], [], []>} : vector<16x64xbf16>, vector<64x16xbf16>, vector<16x16xf32> -> vector<16x16xf32>
    %c2_76 = arith.constant 2 : index
    %c0_77 = arith.constant 0 : index
    %c0_78 = arith.constant 0 : index
    %134 = vector.load %arg6[%c2_76, %c0_77, %c0_78] : memref<8x1x16xf32, #tpu.memory_space<vmem>>, vector<1x1x16xf32>
    %135 = vector.shape_cast %134 : vector<1x1x16xf32> to vector<1x16xf32>
    %136 = vector.broadcast %135 : vector<1x16xf32> to vector<16x16xf32>
    %137 = arith.addf %133, %136 : vector<16x16xf32>
    %c2_79 = arith.constant 2 : index
    %c0_80 = arith.constant 0 : index
    %c0_81 = arith.constant 0 : index
    %138 = vector.load %arg4[%c2_79, %c0_80, %c0_81] : memref<8x64x16xbf16, #tpu.memory_space<vmem>>, vector<1x64x16xbf16>
    %139 = vector.shape_cast %138 : vector<1x64x16xbf16> to vector<64x16xbf16>
    %cst_82 = arith.constant dense<0.000000e+00> : vector<16x16xf32>
    %140 = tpu.matmul %33, %139, %cst_82 {dimension_numbers = #tpu.dot_dimension_numbers<[1], [0], [0], [1], [0, 0, 1, 1], [], []>} : vector<16x64xbf16>, vector<64x16xbf16>, vector<16x16xf32> -> vector<16x16xf32>
    %c2_83 = arith.constant 2 : index
    %c0_84 = arith.constant 0 : index
    %c0_85 = arith.constant 0 : index
    %141 = vector.load %arg7[%c2_83, %c0_84, %c0_85] : memref<8x1x16xf32, #tpu.memory_space<vmem>>, vector<1x1x16xf32>
    %142 = vector.shape_cast %141 : vector<1x1x16xf32> to vector<1x16xf32>
    %143 = vector.broadcast %142 : vector<1x16xf32> to vector<16x16xf32>
    %144 = arith.addf %140, %143 : vector<16x16xf32>
    %c2_86 = arith.constant 2 : index
    %c0_87 = arith.constant 0 : index
    %c0_88 = arith.constant 0 : index
    %145 = vector.load %arg5[%c2_86, %c0_87, %c0_88] : memref<8x64x16xbf16, #tpu.memory_space<vmem>>, vector<1x64x16xbf16>
    %146 = vector.shape_cast %145 : vector<1x64x16xbf16> to vector<64x16xbf16>
    %cst_89 = arith.constant dense<0.000000e+00> : vector<16x16xf32>
    %147 = tpu.matmul %33, %146, %cst_89 {dimension_numbers = #tpu.dot_dimension_numbers<[1], [0], [0], [1], [0, 0, 1, 1], [], []>} : vector<16x64xbf16>, vector<64x16xbf16>, vector<16x16xf32> -> vector<16x16xf32>
    %c2_90 = arith.constant 2 : index
    %c0_91 = arith.constant 0 : index
    %c0_92 = arith.constant 0 : index
    %148 = vector.load %arg8[%c2_90, %c0_91, %c0_92] : memref<8x1x16xf32, #tpu.memory_space<vmem>>, vector<1x1x16xf32>
    %149 = vector.shape_cast %148 : vector<1x1x16xf32> to vector<1x16xf32>
    %150 = vector.broadcast %149 : vector<1x16xf32> to vector<16x16xf32>
    %151 = arith.addf %147, %150 : vector<16x16xf32>
    %152 = vector.shape_cast %137 : vector<16x16xf32> to vector<2x8x16xf32>
    %153 = arith.truncf %152 : vector<2x8x16xf32> to vector<2x8x16xbf16>
    %154 = vector.shape_cast %144 : vector<16x16xf32> to vector<2x8x16xf32>
    %155 = arith.truncf %154 : vector<2x8x16xf32> to vector<2x8x16xbf16>
    %156 = vector.shape_cast %151 : vector<16x16xf32> to vector<2x8x16xf32>
    %157 = arith.truncf %156 : vector<2x8x16xf32> to vector<2x8x16xbf16>
    "tpu.trace_start"() <{level = 10 : i32, message = "bqd,bkd->bqk"}> : () -> ()
    %cst_93 = arith.constant dense<0.000000e+00> : vector<2x8x8xf32>
    %158 = tpu.matmul %153, %155, %cst_93 {dimension_numbers = #tpu.dot_dimension_numbers<[2], [2], [1], [1], [0, 0, 0, 1, 1, 1], [0], [0]>} : vector<2x8x16xbf16>, vector<2x8x16xbf16>, vector<2x8x8xf32> -> vector<2x8x8xf32>
    "tpu.trace_stop"() : () -> ()
    %cst_94 = arith.constant 2.500000e-01 : f32
    %159 = vector.broadcast %cst_94 : f32 to vector<2x8x8xf32>
    %160 = arith.mulf %158, %159 : vector<2x8x8xf32>
    %161 = arith.addf %160, %6 : vector<2x8x8xf32>
    %cst_95 = arith.constant dense<0xFF800000> : vector<2x8xf32>
    %162 = vector.multi_reduction <maximumf>, %161, %cst_95 [2] : vector<2x8x8xf32> to vector<2x8xf32>
    %163 = vector.shape_cast %162 : vector<2x8xf32> to vector<2x8x1xf32>
    %164 = vector.broadcast %163 : vector<2x8x1xf32> to vector<2x8x8xf32>
    %165 = arith.subf %161, %164 : vector<2x8x8xf32>
    %166 = math.exp %165 : vector<2x8x8xf32>
    %cst_96 = arith.constant dense<0.000000e+00> : vector<2x8xf32>
    %167 = vector.multi_reduction <add>, %166, %cst_96 [2] : vector<2x8x8xf32> to vector<2x8xf32>
    %168 = vector.shape_cast %167 : vector<2x8xf32> to vector<2x8x1xf32>
    %169 = vector.broadcast %168 : vector<2x8x1xf32> to vector<2x8x8xf32>
    %170 = arith.divf %166, %169 : vector<2x8x8xf32>
    %171 = arith.truncf %170 : vector<2x8x8xf32> to vector<2x8x8xbf16>
    "tpu.trace_start"() <{level = 10 : i32, message = "bqk,bkd->bqd"}> : () -> ()
    %cst_97 = arith.constant dense<0.000000e+00> : vector<2x8x16xf32>
    %172 = tpu.matmul %171, %157, %cst_97 {dimension_numbers = #tpu.dot_dimension_numbers<[2], [1], [1], [2], [0, 0, 0, 1, 1, 2], [0], [0]>} : vector<2x8x8xbf16>, vector<2x8x16xbf16>, vector<2x8x16xf32> -> vector<2x8x16xf32>
    "tpu.trace_stop"() : () -> ()
    %173 = vector.shape_cast %172 : vector<2x8x16xf32> to vector<16x16xf32>
    %174 = arith.truncf %173 : vector<16x16xf32> to vector<16x16xbf16>
    %c2_98 = arith.constant 2 : index
    %c0_99 = arith.constant 0 : index
    %c0_100 = arith.constant 0 : index
    %175 = vector.load %arg9[%c2_98, %c0_99, %c0_100] : memref<8x16x64xbf16, #tpu.memory_space<vmem>>, vector<1x16x64xbf16>
    %176 = vector.shape_cast %175 : vector<1x16x64xbf16> to vector<16x64xbf16>
    %cst_101 = arith.constant dense<0.000000e+00> : vector<16x64xf32>
    %177 = tpu.matmul %174, %176, %cst_101 {dimension_numbers = #tpu.dot_dimension_numbers<[1], [0], [0], [1], [0, 0, 1, 1], [], []>} : vector<16x16xbf16>, vector<16x64xbf16>, vector<16x64xf32> -> vector<16x64xf32>
    %178 = arith.addf %130, %177 : vector<16x64xf32>
    %c3 = arith.constant 3 : index
    %c0_102 = arith.constant 0 : index
    %c0_103 = arith.constant 0 : index
    %179 = vector.load %arg3[%c3, %c0_102, %c0_103] : memref<8x64x16xbf16, #tpu.memory_space<vmem>>, vector<1x64x16xbf16>
    %180 = vector.shape_cast %179 : vector<1x64x16xbf16> to vector<64x16xbf16>
    %cst_104 = arith.constant dense<0.000000e+00> : vector<16x16xf32>
    %181 = tpu.matmul %33, %180, %cst_104 {dimension_numbers = #tpu.dot_dimension_numbers<[1], [0], [0], [1], [0, 0, 1, 1], [], []>} : vector<16x64xbf16>, vector<64x16xbf16>, vector<16x16xf32> -> vector<16x16xf32>
    %c3_105 = arith.constant 3 : index
    %c0_106 = arith.constant 0 : index
    %c0_107 = arith.constant 0 : index
    %182 = vector.load %arg6[%c3_105, %c0_106, %c0_107] : memref<8x1x16xf32, #tpu.memory_space<vmem>>, vector<1x1x16xf32>
    %183 = vector.shape_cast %182 : vector<1x1x16xf32> to vector<1x16xf32>
    %184 = vector.broadcast %183 : vector<1x16xf32> to vector<16x16xf32>
    %185 = arith.addf %181, %184 : vector<16x16xf32>
    %c3_108 = arith.constant 3 : index
    %c0_109 = arith.constant 0 : index
    %c0_110 = arith.constant 0 : index
    %186 = vector.load %arg4[%c3_108, %c0_109, %c0_110] : memref<8x64x16xbf16, #tpu.memory_space<vmem>>, vector<1x64x16xbf16>
    %187 = vector.shape_cast %186 : vector<1x64x16xbf16> to vector<64x16xbf16>
    %cst_111 = arith.constant dense<0.000000e+00> : vector<16x16xf32>
    %188 = tpu.matmul %33, %187, %cst_111 {dimension_numbers = #tpu.dot_dimension_numbers<[1], [0], [0], [1], [0, 0, 1, 1], [], []>} : vector<16x64xbf16>, vector<64x16xbf16>, vector<16x16xf32> -> vector<16x16xf32>
    %c3_112 = arith.constant 3 : index
    %c0_113 = arith.constant 0 : index
    %c0_114 = arith.constant 0 : index
    %189 = vector.load %arg7[%c3_112, %c0_113, %c0_114] : memref<8x1x16xf32, #tpu.memory_space<vmem>>, vector<1x1x16xf32>
    %190 = vector.shape_cast %189 : vector<1x1x16xf32> to vector<1x16xf32>
    %191 = vector.broadcast %190 : vector<1x16xf32> to vector<16x16xf32>
    %192 = arith.addf %188, %191 : vector<16x16xf32>
    %c3_115 = arith.constant 3 : index
    %c0_116 = arith.constant 0 : index
    %c0_117 = arith.constant 0 : index
    %193 = vector.load %arg5[%c3_115, %c0_116, %c0_117] : memref<8x64x16xbf16, #tpu.memory_space<vmem>>, vector<1x64x16xbf16>
    %194 = vector.shape_cast %193 : vector<1x64x16xbf16> to vector<64x16xbf16>
    %cst_118 = arith.constant dense<0.000000e+00> : vector<16x16xf32>
    %195 = tpu.matmul %33, %194, %cst_118 {dimension_numbers = #tpu.dot_dimension_numbers<[1], [0], [0], [1], [0, 0, 1, 1], [], []>} : vector<16x64xbf16>, vector<64x16xbf16>, vector<16x16xf32> -> vector<16x16xf32>
    %c3_119 = arith.constant 3 : index
    %c0_120 = arith.constant 0 : index
    %c0_121 = arith.constant 0 : index
    %196 = vector.load %arg8[%c3_119, %c0_120, %c0_121] : memref<8x1x16xf32, #tpu.memory_space<vmem>>, vector<1x1x16xf32>
    %197 = vector.shape_cast %196 : vector<1x1x16xf32> to vector<1x16xf32>
    %198 = vector.broadcast %197 : vector<1x16xf32> to vector<16x16xf32>
    %199 = arith.addf %195, %198 : vector<16x16xf32>
    %200 = vector.shape_cast %185 : vector<16x16xf32> to vector<2x8x16xf32>
    %201 = arith.truncf %200 : vector<2x8x16xf32> to vector<2x8x16xbf16>
    %202 = vector.shape_cast %192 : vector<16x16xf32> to vector<2x8x16xf32>
    %203 = arith.truncf %202 : vector<2x8x16xf32> to vector<2x8x16xbf16>
    %204 = vector.shape_cast %199 : vector<16x16xf32> to vector<2x8x16xf32>
    %205 = arith.truncf %204 : vector<2x8x16xf32> to vector<2x8x16xbf16>
    "tpu.trace_start"() <{level = 10 : i32, message = "bqd,bkd->bqk"}> : () -> ()
    %cst_122 = arith.constant dense<0.000000e+00> : vector<2x8x8xf32>
    %206 = tpu.matmul %201, %203, %cst_122 {dimension_numbers = #tpu.dot_dimension_numbers<[2], [2], [1], [1], [0, 0, 0, 1, 1, 1], [0], [0]>} : vector<2x8x16xbf16>, vector<2x8x16xbf16>, vector<2x8x8xf32> -> vector<2x8x8xf32>
    "tpu.trace_stop"() : () -> ()
    %cst_123 = arith.constant 2.500000e-01 : f32
    %207 = vector.broadcast %cst_123 : f32 to vector<2x8x8xf32>
    %208 = arith.mulf %206, %207 : vector<2x8x8xf32>
    %209 = arith.addf %208, %6 : vector<2x8x8xf32>
    %cst_124 = arith.constant dense<0xFF800000> : vector<2x8xf32>
    %210 = vector.multi_reduction <maximumf>, %209, %cst_124 [2] : vector<2x8x8xf32> to vector<2x8xf32>
    %211 = vector.shape_cast %210 : vector<2x8xf32> to vector<2x8x1xf32>
    %212 = vector.broadcast %211 : vector<2x8x1xf32> to vector<2x8x8xf32>
    %213 = arith.subf %209, %212 : vector<2x8x8xf32>
    %214 = math.exp %213 : vector<2x8x8xf32>
    %cst_125 = arith.constant dense<0.000000e+00> : vector<2x8xf32>
    %215 = vector.multi_reduction <add>, %214, %cst_125 [2] : vector<2x8x8xf32> to vector<2x8xf32>
    %216 = vector.shape_cast %215 : vector<2x8xf32> to vector<2x8x1xf32>
    %217 = vector.broadcast %216 : vector<2x8x1xf32> to vector<2x8x8xf32>
    %218 = arith.divf %214, %217 : vector<2x8x8xf32>
    %219 = arith.truncf %218 : vector<2x8x8xf32> to vector<2x8x8xbf16>
    "tpu.trace_start"() <{level = 10 : i32, message = "bqk,bkd->bqd"}> : () -> ()
    %cst_126 = arith.constant dense<0.000000e+00> : vector<2x8x16xf32>
    %220 = tpu.matmul %219, %205, %cst_126 {dimension_numbers = #tpu.dot_dimension_numbers<[2], [1], [1], [2], [0, 0, 0, 1, 1, 2], [0], [0]>} : vector<2x8x8xbf16>, vector<2x8x16xbf16>, vector<2x8x16xf32> -> vector<2x8x16xf32>
    "tpu.trace_stop"() : () -> ()
    %221 = vector.shape_cast %220 : vector<2x8x16xf32> to vector<16x16xf32>
    %222 = arith.truncf %221 : vector<16x16xf32> to vector<16x16xbf16>
    %c3_127 = arith.constant 3 : index
    %c0_128 = arith.constant 0 : index
    %c0_129 = arith.constant 0 : index
    %223 = vector.load %arg9[%c3_127, %c0_128, %c0_129] : memref<8x16x64xbf16, #tpu.memory_space<vmem>>, vector<1x16x64xbf16>
    %224 = vector.shape_cast %223 : vector<1x16x64xbf16> to vector<16x64xbf16>
    %cst_130 = arith.constant dense<0.000000e+00> : vector<16x64xf32>
    %225 = tpu.matmul %222, %224, %cst_130 {dimension_numbers = #tpu.dot_dimension_numbers<[1], [0], [0], [1], [0, 0, 1, 1], [], []>} : vector<16x16xbf16>, vector<16x64xbf16>, vector<16x64xf32> -> vector<16x64xf32>
    %226 = arith.addf %178, %225 : vector<16x64xf32>
    %227 = arith.addf %0, %226 : vector<16x64xf32>
    %c0_131 = arith.constant 0 : index
    %c0_132 = arith.constant 0 : index
    %c0_133 = arith.constant 0 : index
    %228 = vector.load %arg10[%c0_131, %c0_132, %c0_133] : memref<2x1x64xf32, #tpu.memory_space<vmem>>, vector<1x1x64xf32>
    %229 = vector.shape_cast %228 : vector<1x1x64xf32> to vector<1x64xf32>
    %230 = vector.broadcast %229 : vector<1x64xf32> to vector<16x64xf32>
    %231 = arith.addf %227, %230 : vector<16x64xf32>
    %c0_134 = arith.constant 0 : index
    %c0_135 = arith.constant 0 : index
    %c0_136 = arith.constant 0 : index
    %232 = vector.load %arg11[%c0_134, %c0_135, %c0_136] : memref<2x1x64xf32, #tpu.memory_space<vmem>>, vector<1x1x64xf32>
    %233 = vector.shape_cast %232 : vector<1x1x64xf32> to vector<1x64xf32>
    %c0_137 = arith.constant 0 : index
    %c0_138 = arith.constant 0 : index
    %c0_139 = arith.constant 0 : index
    %234 = vector.load %arg12[%c0_137, %c0_138, %c0_139] : memref<2x1x64xf32, #tpu.memory_space<vmem>>, vector<1x1x64xf32>
    %235 = vector.shape_cast %234 : vector<1x1x64xf32> to vector<1x64xf32>
    %cst_140 = arith.constant dense<0.000000e+00> : vector<16xf32>
    %236 = vector.multi_reduction <add>, %231, %cst_140 [1] : vector<16x64xf32> to vector<16xf32>
    %237 = vector.shape_cast %236 : vector<16xf32> to vector<16x1xf32>
    %cst_141 = arith.constant 6.400000e+01 : f32
    %238 = vector.broadcast %cst_141 : f32 to vector<16x1xf32>
    %239 = arith.divf %237, %238 : vector<16x1xf32>
    %240 = vector.broadcast %239 : vector<16x1xf32> to vector<16x64xf32>
    %241 = arith.subf %231, %240 : vector<16x64xf32>
    %242 = arith.mulf %241, %241 : vector<16x64xf32>
    %cst_142 = arith.constant dense<0.000000e+00> : vector<16xf32>
    %243 = vector.multi_reduction <add>, %242, %cst_142 [1] : vector<16x64xf32> to vector<16xf32>
    %244 = vector.shape_cast %243 : vector<16xf32> to vector<16x1xf32>
    %cst_143 = arith.constant 6.400000e+01 : f32
    %245 = vector.broadcast %cst_143 : f32 to vector<16x1xf32>
    %246 = arith.divf %244, %245 : vector<16x1xf32>
    %247 = vector.broadcast %239 : vector<16x1xf32> to vector<16x64xf32>
    %248 = arith.subf %231, %247 : vector<16x64xf32>
    %cst_144 = arith.constant 9.99999974E-6 : f32
    %249 = vector.broadcast %cst_144 : f32 to vector<16x1xf32>
    %250 = arith.addf %246, %249 : vector<16x1xf32>
    %251 = math.rsqrt %250 : vector<16x1xf32>
    %252 = vector.broadcast %251 : vector<16x1xf32> to vector<16x64xf32>
    %253 = arith.mulf %248, %252 : vector<16x64xf32>
    %254 = vector.broadcast %233 : vector<1x64xf32> to vector<16x64xf32>
    %255 = arith.mulf %253, %254 : vector<16x64xf32>
    %256 = vector.broadcast %235 : vector<1x64xf32> to vector<16x64xf32>
    %257 = arith.addf %255, %256 : vector<16x64xf32>
    %258 = arith.truncf %257 : vector<16x64xf32> to vector<16x64xbf16>
    %c0_145 = arith.constant 0 : index
    %c0_146 = arith.constant 0 : index
    %c0_147 = arith.constant 0 : index
    %259 = vector.load %arg13[%c0_145, %c0_146, %c0_147] : memref<2x64x256xbf16, #tpu.memory_space<vmem>>, vector<1x64x256xbf16>
    %260 = vector.shape_cast %259 : vector<1x64x256xbf16> to vector<64x256xbf16>
    %cst_148 = arith.constant dense<0.000000e+00> : vector<16x256xf32>
    %261 = tpu.matmul %258, %260, %cst_148 {dimension_numbers = #tpu.dot_dimension_numbers<[1], [0], [0], [1], [0, 0, 1, 1], [], []>} : vector<16x64xbf16>, vector<64x256xbf16>, vector<16x256xf32> -> vector<16x256xf32>
    %c0_149 = arith.constant 0 : index
    %c0_150 = arith.constant 0 : index
    %c0_151 = arith.constant 0 : index
    %262 = vector.load %arg14[%c0_149, %c0_150, %c0_151] : memref<2x1x256xf32, #tpu.memory_space<vmem>>, vector<1x1x256xf32>
    %263 = vector.shape_cast %262 : vector<1x1x256xf32> to vector<1x256xf32>
    %264 = vector.broadcast %263 : vector<1x256xf32> to vector<16x256xf32>
    %265 = arith.addf %261, %264 : vector<16x256xf32>
    %cst_152 = arith.constant 5.000000e-01 : f32
    %266 = vector.broadcast %cst_152 : f32 to vector<16x256xf32>
    %267 = arith.mulf %266, %265 : vector<16x256xf32>
    %cst_153 = arith.constant 4.471500e-02 : f32
    %268 = vector.broadcast %cst_153 : f32 to vector<16x256xf32>
    %269 = arith.mulf %268, %265 : vector<16x256xf32>
    %270 = arith.mulf %269, %265 : vector<16x256xf32>
    %271 = arith.mulf %270, %265 : vector<16x256xf32>
    %272 = arith.addf %265, %271 : vector<16x256xf32>
    %cst_154 = arith.constant 0.797884583 : f32
    %273 = vector.broadcast %cst_154 : f32 to vector<16x256xf32>
    %274 = arith.mulf %273, %272 : vector<16x256xf32>
    %275 = math.tanh %274 : vector<16x256xf32>
    %cst_155 = arith.constant 1.000000e+00 : f32
    %276 = vector.broadcast %cst_155 : f32 to vector<16x256xf32>
    %277 = arith.addf %276, %275 : vector<16x256xf32>
    %278 = arith.mulf %267, %277 : vector<16x256xf32>
    %279 = arith.truncf %278 : vector<16x256xf32> to vector<16x256xbf16>
    %c0_156 = arith.constant 0 : index
    %c0_157 = arith.constant 0 : index
    %c0_158 = arith.constant 0 : index
    %280 = vector.load %arg15[%c0_156, %c0_157, %c0_158] : memref<2x256x64xbf16, #tpu.memory_space<vmem>>, vector<1x256x64xbf16>
    %281 = vector.shape_cast %280 : vector<1x256x64xbf16> to vector<256x64xbf16>
    %cst_159 = arith.constant dense<0.000000e+00> : vector<16x64xf32>
    %282 = tpu.matmul %279, %281, %cst_159 {dimension_numbers = #tpu.dot_dimension_numbers<[1], [0], [0], [1], [0, 0, 1, 1], [], []>} : vector<16x256xbf16>, vector<256x64xbf16>, vector<16x64xf32> -> vector<16x64xf32>
    %c0_160 = arith.constant 0 : index
    %c0_161 = arith.constant 0 : index
    %c0_162 = arith.constant 0 : index
    %283 = vector.load %arg16[%c0_160, %c0_161, %c0_162] : memref<2x1x64xf32, #tpu.memory_space<vmem>>, vector<1x1x64xf32>
    %284 = vector.shape_cast %283 : vector<1x1x64xf32> to vector<1x64xf32>
    %285 = vector.broadcast %284 : vector<1x64xf32> to vector<16x64xf32>
    %286 = arith.addf %282, %285 : vector<16x64xf32>
    %287 = arith.addf %231, %286 : vector<16x64xf32>
    %c1_163 = arith.constant 1 : index
    %c0_164 = arith.constant 0 : index
    %c0_165 = arith.constant 0 : index
    %288 = vector.load %arg1[%c1_163, %c0_164, %c0_165] : memref<2x1x64xf32, #tpu.memory_space<vmem>>, vector<1x1x64xf32>
    %289 = vector.shape_cast %288 : vector<1x1x64xf32> to vector<1x64xf32>
    %c1_166 = arith.constant 1 : index
    %c0_167 = arith.constant 0 : index
    %c0_168 = arith.constant 0 : index
    %290 = vector.load %arg2[%c1_166, %c0_167, %c0_168] : memref<2x1x64xf32, #tpu.memory_space<vmem>>, vector<1x1x64xf32>
    %291 = vector.shape_cast %290 : vector<1x1x64xf32> to vector<1x64xf32>
    %cst_169 = arith.constant dense<0.000000e+00> : vector<16xf32>
    %292 = vector.multi_reduction <add>, %287, %cst_169 [1] : vector<16x64xf32> to vector<16xf32>
    %293 = vector.shape_cast %292 : vector<16xf32> to vector<16x1xf32>
    %cst_170 = arith.constant 6.400000e+01 : f32
    %294 = vector.broadcast %cst_170 : f32 to vector<16x1xf32>
    %295 = arith.divf %293, %294 : vector<16x1xf32>
    %296 = vector.broadcast %295 : vector<16x1xf32> to vector<16x64xf32>
    %297 = arith.subf %287, %296 : vector<16x64xf32>
    %298 = arith.mulf %297, %297 : vector<16x64xf32>
    %cst_171 = arith.constant dense<0.000000e+00> : vector<16xf32>
    %299 = vector.multi_reduction <add>, %298, %cst_171 [1] : vector<16x64xf32> to vector<16xf32>
    %300 = vector.shape_cast %299 : vector<16xf32> to vector<16x1xf32>
    %cst_172 = arith.constant 6.400000e+01 : f32
    %301 = vector.broadcast %cst_172 : f32 to vector<16x1xf32>
    %302 = arith.divf %300, %301 : vector<16x1xf32>
    %303 = vector.broadcast %295 : vector<16x1xf32> to vector<16x64xf32>
    %304 = arith.subf %287, %303 : vector<16x64xf32>
    %cst_173 = arith.constant 9.99999974E-6 : f32
    %305 = vector.broadcast %cst_173 : f32 to vector<16x1xf32>
    %306 = arith.addf %302, %305 : vector<16x1xf32>
    %307 = math.rsqrt %306 : vector<16x1xf32>
    %308 = vector.broadcast %307 : vector<16x1xf32> to vector<16x64xf32>
    %309 = arith.mulf %304, %308 : vector<16x64xf32>
    %310 = vector.broadcast %289 : vector<1x64xf32> to vector<16x64xf32>
    %311 = arith.mulf %309, %310 : vector<16x64xf32>
    %312 = vector.broadcast %291 : vector<1x64xf32> to vector<16x64xf32>
    %313 = arith.addf %311, %312 : vector<16x64xf32>
    %314 = arith.truncf %313 : vector<16x64xf32> to vector<16x64xbf16>
    %cst_174 = arith.constant 0.000000e+00 : f32
    %315 = vector.broadcast %cst_174 : f32 to vector<16x64xf32>
    %c4 = arith.constant 4 : index
    %c0_175 = arith.constant 0 : index
    %c0_176 = arith.constant 0 : index
    %316 = vector.load %arg3[%c4, %c0_175, %c0_176] : memref<8x64x16xbf16, #tpu.memory_space<vmem>>, vector<1x64x16xbf16>
    %317 = vector.shape_cast %316 : vector<1x64x16xbf16> to vector<64x16xbf16>
    %cst_177 = arith.constant dense<0.000000e+00> : vector<16x16xf32>
    %318 = tpu.matmul %314, %317, %cst_177 {dimension_numbers = #tpu.dot_dimension_numbers<[1], [0], [0], [1], [0, 0, 1, 1], [], []>} : vector<16x64xbf16>, vector<64x16xbf16>, vector<16x16xf32> -> vector<16x16xf32>
    %c4_178 = arith.constant 4 : index
    %c0_179 = arith.constant 0 : index
    %c0_180 = arith.constant 0 : index
    %319 = vector.load %arg6[%c4_178, %c0_179, %c0_180] : memref<8x1x16xf32, #tpu.memory_space<vmem>>, vector<1x1x16xf32>
    %320 = vector.shape_cast %319 : vector<1x1x16xf32> to vector<1x16xf32>
    %321 = vector.broadcast %320 : vector<1x16xf32> to vector<16x16xf32>
    %322 = arith.addf %318, %321 : vector<16x16xf32>
    %c4_181 = arith.constant 4 : index
    %c0_182 = arith.constant 0 : index
    %c0_183 = arith.constant 0 : index
    %323 = vector.load %arg4[%c4_181, %c0_182, %c0_183] : memref<8x64x16xbf16, #tpu.memory_space<vmem>>, vector<1x64x16xbf16>
    %324 = vector.shape_cast %323 : vector<1x64x16xbf16> to vector<64x16xbf16>
    %cst_184 = arith.constant dense<0.000000e+00> : vector<16x16xf32>
    %325 = tpu.matmul %314, %324, %cst_184 {dimension_numbers = #tpu.dot_dimension_numbers<[1], [0], [0], [1], [0, 0, 1, 1], [], []>} : vector<16x64xbf16>, vector<64x16xbf16>, vector<16x16xf32> -> vector<16x16xf32>
    %c4_185 = arith.constant 4 : index
    %c0_186 = arith.constant 0 : index
    %c0_187 = arith.constant 0 : index
    %326 = vector.load %arg7[%c4_185, %c0_186, %c0_187] : memref<8x1x16xf32, #tpu.memory_space<vmem>>, vector<1x1x16xf32>
    %327 = vector.shape_cast %326 : vector<1x1x16xf32> to vector<1x16xf32>
    %328 = vector.broadcast %327 : vector<1x16xf32> to vector<16x16xf32>
    %329 = arith.addf %325, %328 : vector<16x16xf32>
    %c4_188 = arith.constant 4 : index
    %c0_189 = arith.constant 0 : index
    %c0_190 = arith.constant 0 : index
    %330 = vector.load %arg5[%c4_188, %c0_189, %c0_190] : memref<8x64x16xbf16, #tpu.memory_space<vmem>>, vector<1x64x16xbf16>
    %331 = vector.shape_cast %330 : vector<1x64x16xbf16> to vector<64x16xbf16>
    %cst_191 = arith.constant dense<0.000000e+00> : vector<16x16xf32>
    %332 = tpu.matmul %314, %331, %cst_191 {dimension_numbers = #tpu.dot_dimension_numbers<[1], [0], [0], [1], [0, 0, 1, 1], [], []>} : vector<16x64xbf16>, vector<64x16xbf16>, vector<16x16xf32> -> vector<16x16xf32>
    %c4_192 = arith.constant 4 : index
    %c0_193 = arith.constant 0 : index
    %c0_194 = arith.constant 0 : index
    %333 = vector.load %arg8[%c4_192, %c0_193, %c0_194] : memref<8x1x16xf32, #tpu.memory_space<vmem>>, vector<1x1x16xf32>
    %334 = vector.shape_cast %333 : vector<1x1x16xf32> to vector<1x16xf32>
    %335 = vector.broadcast %334 : vector<1x16xf32> to vector<16x16xf32>
    %336 = arith.addf %332, %335 : vector<16x16xf32>
    %337 = vector.shape_cast %322 : vector<16x16xf32> to vector<2x8x16xf32>
    %338 = arith.truncf %337 : vector<2x8x16xf32> to vector<2x8x16xbf16>
    %339 = vector.shape_cast %329 : vector<16x16xf32> to vector<2x8x16xf32>
    %340 = arith.truncf %339 : vector<2x8x16xf32> to vector<2x8x16xbf16>
    %341 = vector.shape_cast %336 : vector<16x16xf32> to vector<2x8x16xf32>
    %342 = arith.truncf %341 : vector<2x8x16xf32> to vector<2x8x16xbf16>
    "tpu.trace_start"() <{level = 10 : i32, message = "bqd,bkd->bqk"}> : () -> ()
    %cst_195 = arith.constant dense<0.000000e+00> : vector<2x8x8xf32>
    %343 = tpu.matmul %338, %340, %cst_195 {dimension_numbers = #tpu.dot_dimension_numbers<[2], [2], [1], [1], [0, 0, 0, 1, 1, 1], [0], [0]>} : vector<2x8x16xbf16>, vector<2x8x16xbf16>, vector<2x8x8xf32> -> vector<2x8x8xf32>
    "tpu.trace_stop"() : () -> ()
    %cst_196 = arith.constant 2.500000e-01 : f32
    %344 = vector.broadcast %cst_196 : f32 to vector<2x8x8xf32>
    %345 = arith.mulf %343, %344 : vector<2x8x8xf32>
    %346 = arith.addf %345, %6 : vector<2x8x8xf32>
    %cst_197 = arith.constant dense<0xFF800000> : vector<2x8xf32>
    %347 = vector.multi_reduction <maximumf>, %346, %cst_197 [2] : vector<2x8x8xf32> to vector<2x8xf32>
    %348 = vector.shape_cast %347 : vector<2x8xf32> to vector<2x8x1xf32>
    %349 = vector.broadcast %348 : vector<2x8x1xf32> to vector<2x8x8xf32>
    %350 = arith.subf %346, %349 : vector<2x8x8xf32>
    %351 = math.exp %350 : vector<2x8x8xf32>
    %cst_198 = arith.constant dense<0.000000e+00> : vector<2x8xf32>
    %352 = vector.multi_reduction <add>, %351, %cst_198 [2] : vector<2x8x8xf32> to vector<2x8xf32>
    %353 = vector.shape_cast %352 : vector<2x8xf32> to vector<2x8x1xf32>
    %354 = vector.broadcast %353 : vector<2x8x1xf32> to vector<2x8x8xf32>
    %355 = arith.divf %351, %354 : vector<2x8x8xf32>
    %356 = arith.truncf %355 : vector<2x8x8xf32> to vector<2x8x8xbf16>
    "tpu.trace_start"() <{level = 10 : i32, message = "bqk,bkd->bqd"}> : () -> ()
    %cst_199 = arith.constant dense<0.000000e+00> : vector<2x8x16xf32>
    %357 = tpu.matmul %356, %342, %cst_199 {dimension_numbers = #tpu.dot_dimension_numbers<[2], [1], [1], [2], [0, 0, 0, 1, 1, 2], [0], [0]>} : vector<2x8x8xbf16>, vector<2x8x16xbf16>, vector<2x8x16xf32> -> vector<2x8x16xf32>
    "tpu.trace_stop"() : () -> ()
    %358 = vector.shape_cast %357 : vector<2x8x16xf32> to vector<16x16xf32>
    %359 = arith.truncf %358 : vector<16x16xf32> to vector<16x16xbf16>
    %c4_200 = arith.constant 4 : index
    %c0_201 = arith.constant 0 : index
    %c0_202 = arith.constant 0 : index
    %360 = vector.load %arg9[%c4_200, %c0_201, %c0_202] : memref<8x16x64xbf16, #tpu.memory_space<vmem>>, vector<1x16x64xbf16>
    %361 = vector.shape_cast %360 : vector<1x16x64xbf16> to vector<16x64xbf16>
    %cst_203 = arith.constant dense<0.000000e+00> : vector<16x64xf32>
    %362 = tpu.matmul %359, %361, %cst_203 {dimension_numbers = #tpu.dot_dimension_numbers<[1], [0], [0], [1], [0, 0, 1, 1], [], []>} : vector<16x16xbf16>, vector<16x64xbf16>, vector<16x64xf32> -> vector<16x64xf32>
    %363 = arith.addf %315, %362 : vector<16x64xf32>
    %c5 = arith.constant 5 : index
    %c0_204 = arith.constant 0 : index
    %c0_205 = arith.constant 0 : index
    %364 = vector.load %arg3[%c5, %c0_204, %c0_205] : memref<8x64x16xbf16, #tpu.memory_space<vmem>>, vector<1x64x16xbf16>
    %365 = vector.shape_cast %364 : vector<1x64x16xbf16> to vector<64x16xbf16>
    %cst_206 = arith.constant dense<0.000000e+00> : vector<16x16xf32>
    %366 = tpu.matmul %314, %365, %cst_206 {dimension_numbers = #tpu.dot_dimension_numbers<[1], [0], [0], [1], [0, 0, 1, 1], [], []>} : vector<16x64xbf16>, vector<64x16xbf16>, vector<16x16xf32> -> vector<16x16xf32>
    %c5_207 = arith.constant 5 : index
    %c0_208 = arith.constant 0 : index
    %c0_209 = arith.constant 0 : index
    %367 = vector.load %arg6[%c5_207, %c0_208, %c0_209] : memref<8x1x16xf32, #tpu.memory_space<vmem>>, vector<1x1x16xf32>
    %368 = vector.shape_cast %367 : vector<1x1x16xf32> to vector<1x16xf32>
    %369 = vector.broadcast %368 : vector<1x16xf32> to vector<16x16xf32>
    %370 = arith.addf %366, %369 : vector<16x16xf32>
    %c5_210 = arith.constant 5 : index
    %c0_211 = arith.constant 0 : index
    %c0_212 = arith.constant 0 : index
    %371 = vector.load %arg4[%c5_210, %c0_211, %c0_212] : memref<8x64x16xbf16, #tpu.memory_space<vmem>>, vector<1x64x16xbf16>
    %372 = vector.shape_cast %371 : vector<1x64x16xbf16> to vector<64x16xbf16>
    %cst_213 = arith.constant dense<0.000000e+00> : vector<16x16xf32>
    %373 = tpu.matmul %314, %372, %cst_213 {dimension_numbers = #tpu.dot_dimension_numbers<[1], [0], [0], [1], [0, 0, 1, 1], [], []>} : vector<16x64xbf16>, vector<64x16xbf16>, vector<16x16xf32> -> vector<16x16xf32>
    %c5_214 = arith.constant 5 : index
    %c0_215 = arith.constant 0 : index
    %c0_216 = arith.constant 0 : index
    %374 = vector.load %arg7[%c5_214, %c0_215, %c0_216] : memref<8x1x16xf32, #tpu.memory_space<vmem>>, vector<1x1x16xf32>
    %375 = vector.shape_cast %374 : vector<1x1x16xf32> to vector<1x16xf32>
    %376 = vector.broadcast %375 : vector<1x16xf32> to vector<16x16xf32>
    %377 = arith.addf %373, %376 : vector<16x16xf32>
    %c5_217 = arith.constant 5 : index
    %c0_218 = arith.constant 0 : index
    %c0_219 = arith.constant 0 : index
    %378 = vector.load %arg5[%c5_217, %c0_218, %c0_219] : memref<8x64x16xbf16, #tpu.memory_space<vmem>>, vector<1x64x16xbf16>
    %379 = vector.shape_cast %378 : vector<1x64x16xbf16> to vector<64x16xbf16>
    %cst_220 = arith.constant dense<0.000000e+00> : vector<16x16xf32>
    %380 = tpu.matmul %314, %379, %cst_220 {dimension_numbers = #tpu.dot_dimension_numbers<[1], [0], [0], [1], [0, 0, 1, 1], [], []>} : vector<16x64xbf16>, vector<64x16xbf16>, vector<16x16xf32> -> vector<16x16xf32>
    %c5_221 = arith.constant 5 : index
    %c0_222 = arith.constant 0 : index
    %c0_223 = arith.constant 0 : index
    %381 = vector.load %arg8[%c5_221, %c0_222, %c0_223] : memref<8x1x16xf32, #tpu.memory_space<vmem>>, vector<1x1x16xf32>
    %382 = vector.shape_cast %381 : vector<1x1x16xf32> to vector<1x16xf32>
    %383 = vector.broadcast %382 : vector<1x16xf32> to vector<16x16xf32>
    %384 = arith.addf %380, %383 : vector<16x16xf32>
    %385 = vector.shape_cast %370 : vector<16x16xf32> to vector<2x8x16xf32>
    %386 = arith.truncf %385 : vector<2x8x16xf32> to vector<2x8x16xbf16>
    %387 = vector.shape_cast %377 : vector<16x16xf32> to vector<2x8x16xf32>
    %388 = arith.truncf %387 : vector<2x8x16xf32> to vector<2x8x16xbf16>
    %389 = vector.shape_cast %384 : vector<16x16xf32> to vector<2x8x16xf32>
    %390 = arith.truncf %389 : vector<2x8x16xf32> to vector<2x8x16xbf16>
    "tpu.trace_start"() <{level = 10 : i32, message = "bqd,bkd->bqk"}> : () -> ()
    %cst_224 = arith.constant dense<0.000000e+00> : vector<2x8x8xf32>
    %391 = tpu.matmul %386, %388, %cst_224 {dimension_numbers = #tpu.dot_dimension_numbers<[2], [2], [1], [1], [0, 0, 0, 1, 1, 1], [0], [0]>} : vector<2x8x16xbf16>, vector<2x8x16xbf16>, vector<2x8x8xf32> -> vector<2x8x8xf32>
    "tpu.trace_stop"() : () -> ()
    %cst_225 = arith.constant 2.500000e-01 : f32
    %392 = vector.broadcast %cst_225 : f32 to vector<2x8x8xf32>
    %393 = arith.mulf %391, %392 : vector<2x8x8xf32>
    %394 = arith.addf %393, %6 : vector<2x8x8xf32>
    %cst_226 = arith.constant dense<0xFF800000> : vector<2x8xf32>
    %395 = vector.multi_reduction <maximumf>, %394, %cst_226 [2] : vector<2x8x8xf32> to vector<2x8xf32>
    %396 = vector.shape_cast %395 : vector<2x8xf32> to vector<2x8x1xf32>
    %397 = vector.broadcast %396 : vector<2x8x1xf32> to vector<2x8x8xf32>
    %398 = arith.subf %394, %397 : vector<2x8x8xf32>
    %399 = math.exp %398 : vector<2x8x8xf32>
    %cst_227 = arith.constant dense<0.000000e+00> : vector<2x8xf32>
    %400 = vector.multi_reduction <add>, %399, %cst_227 [2] : vector<2x8x8xf32> to vector<2x8xf32>
    %401 = vector.shape_cast %400 : vector<2x8xf32> to vector<2x8x1xf32>
    %402 = vector.broadcast %401 : vector<2x8x1xf32> to vector<2x8x8xf32>
    %403 = arith.divf %399, %402 : vector<2x8x8xf32>
    %404 = arith.truncf %403 : vector<2x8x8xf32> to vector<2x8x8xbf16>
    "tpu.trace_start"() <{level = 10 : i32, message = "bqk,bkd->bqd"}> : () -> ()
    %cst_228 = arith.constant dense<0.000000e+00> : vector<2x8x16xf32>
    %405 = tpu.matmul %404, %390, %cst_228 {dimension_numbers = #tpu.dot_dimension_numbers<[2], [1], [1], [2], [0, 0, 0, 1, 1, 2], [0], [0]>} : vector<2x8x8xbf16>, vector<2x8x16xbf16>, vector<2x8x16xf32> -> vector<2x8x16xf32>
    "tpu.trace_stop"() : () -> ()
    %406 = vector.shape_cast %405 : vector<2x8x16xf32> to vector<16x16xf32>
    %407 = arith.truncf %406 : vector<16x16xf32> to vector<16x16xbf16>
    %c5_229 = arith.constant 5 : index
    %c0_230 = arith.constant 0 : index
    %c0_231 = arith.constant 0 : index
    %408 = vector.load %arg9[%c5_229, %c0_230, %c0_231] : memref<8x16x64xbf16, #tpu.memory_space<vmem>>, vector<1x16x64xbf16>
    %409 = vector.shape_cast %408 : vector<1x16x64xbf16> to vector<16x64xbf16>
    %cst_232 = arith.constant dense<0.000000e+00> : vector<16x64xf32>
    %410 = tpu.matmul %407, %409, %cst_232 {dimension_numbers = #tpu.dot_dimension_numbers<[1], [0], [0], [1], [0, 0, 1, 1], [], []>} : vector<16x16xbf16>, vector<16x64xbf16>, vector<16x64xf32> -> vector<16x64xf32>
    %411 = arith.addf %363, %410 : vector<16x64xf32>
    %c6 = arith.constant 6 : index
    %c0_233 = arith.constant 0 : index
    %c0_234 = arith.constant 0 : index
    %412 = vector.load %arg3[%c6, %c0_233, %c0_234] : memref<8x64x16xbf16, #tpu.memory_space<vmem>>, vector<1x64x16xbf16>
    %413 = vector.shape_cast %412 : vector<1x64x16xbf16> to vector<64x16xbf16>
    %cst_235 = arith.constant dense<0.000000e+00> : vector<16x16xf32>
    %414 = tpu.matmul %314, %413, %cst_235 {dimension_numbers = #tpu.dot_dimension_numbers<[1], [0], [0], [1], [0, 0, 1, 1], [], []>} : vector<16x64xbf16>, vector<64x16xbf16>, vector<16x16xf32> -> vector<16x16xf32>
    %c6_236 = arith.constant 6 : index
    %c0_237 = arith.constant 0 : index
    %c0_238 = arith.constant 0 : index
    %415 = vector.load %arg6[%c6_236, %c0_237, %c0_238] : memref<8x1x16xf32, #tpu.memory_space<vmem>>, vector<1x1x16xf32>
    %416 = vector.shape_cast %415 : vector<1x1x16xf32> to vector<1x16xf32>
    %417 = vector.broadcast %416 : vector<1x16xf32> to vector<16x16xf32>
    %418 = arith.addf %414, %417 : vector<16x16xf32>
    %c6_239 = arith.constant 6 : index
    %c0_240 = arith.constant 0 : index
    %c0_241 = arith.constant 0 : index
    %419 = vector.load %arg4[%c6_239, %c0_240, %c0_241] : memref<8x64x16xbf16, #tpu.memory_space<vmem>>, vector<1x64x16xbf16>
    %420 = vector.shape_cast %419 : vector<1x64x16xbf16> to vector<64x16xbf16>
    %cst_242 = arith.constant dense<0.000000e+00> : vector<16x16xf32>
    %421 = tpu.matmul %314, %420, %cst_242 {dimension_numbers = #tpu.dot_dimension_numbers<[1], [0], [0], [1], [0, 0, 1, 1], [], []>} : vector<16x64xbf16>, vector<64x16xbf16>, vector<16x16xf32> -> vector<16x16xf32>
    %c6_243 = arith.constant 6 : index
    %c0_244 = arith.constant 0 : index
    %c0_245 = arith.constant 0 : index
    %422 = vector.load %arg7[%c6_243, %c0_244, %c0_245] : memref<8x1x16xf32, #tpu.memory_space<vmem>>, vector<1x1x16xf32>
    %423 = vector.shape_cast %422 : vector<1x1x16xf32> to vector<1x16xf32>
    %424 = vector.broadcast %423 : vector<1x16xf32> to vector<16x16xf32>
    %425 = arith.addf %421, %424 : vector<16x16xf32>
    %c6_246 = arith.constant 6 : index
    %c0_247 = arith.constant 0 : index
    %c0_248 = arith.constant 0 : index
    %426 = vector.load %arg5[%c6_246, %c0_247, %c0_248] : memref<8x64x16xbf16, #tpu.memory_space<vmem>>, vector<1x64x16xbf16>
    %427 = vector.shape_cast %426 : vector<1x64x16xbf16> to vector<64x16xbf16>
    %cst_249 = arith.constant dense<0.000000e+00> : vector<16x16xf32>
    %428 = tpu.matmul %314, %427, %cst_249 {dimension_numbers = #tpu.dot_dimension_numbers<[1], [0], [0], [1], [0, 0, 1, 1], [], []>} : vector<16x64xbf16>, vector<64x16xbf16>, vector<16x16xf32> -> vector<16x16xf32>
    %c6_250 = arith.constant 6 : index
    %c0_251 = arith.constant 0 : index
    %c0_252 = arith.constant 0 : index
    %429 = vector.load %arg8[%c6_250, %c0_251, %c0_252] : memref<8x1x16xf32, #tpu.memory_space<vmem>>, vector<1x1x16xf32>
    %430 = vector.shape_cast %429 : vector<1x1x16xf32> to vector<1x16xf32>
    %431 = vector.broadcast %430 : vector<1x16xf32> to vector<16x16xf32>
    %432 = arith.addf %428, %431 : vector<16x16xf32>
    %433 = vector.shape_cast %418 : vector<16x16xf32> to vector<2x8x16xf32>
    %434 = arith.truncf %433 : vector<2x8x16xf32> to vector<2x8x16xbf16>
    %435 = vector.shape_cast %425 : vector<16x16xf32> to vector<2x8x16xf32>
    %436 = arith.truncf %435 : vector<2x8x16xf32> to vector<2x8x16xbf16>
    %437 = vector.shape_cast %432 : vector<16x16xf32> to vector<2x8x16xf32>
    %438 = arith.truncf %437 : vector<2x8x16xf32> to vector<2x8x16xbf16>
    "tpu.trace_start"() <{level = 10 : i32, message = "bqd,bkd->bqk"}> : () -> ()
    %cst_253 = arith.constant dense<0.000000e+00> : vector<2x8x8xf32>
    %439 = tpu.matmul %434, %436, %cst_253 {dimension_numbers = #tpu.dot_dimension_numbers<[2], [2], [1], [1], [0, 0, 0, 1, 1, 1], [0], [0]>} : vector<2x8x16xbf16>, vector<2x8x16xbf16>, vector<2x8x8xf32> -> vector<2x8x8xf32>
    "tpu.trace_stop"() : () -> ()
    %cst_254 = arith.constant 2.500000e-01 : f32
    %440 = vector.broadcast %cst_254 : f32 to vector<2x8x8xf32>
    %441 = arith.mulf %439, %440 : vector<2x8x8xf32>
    %442 = arith.addf %441, %6 : vector<2x8x8xf32>
    %cst_255 = arith.constant dense<0xFF800000> : vector<2x8xf32>
    %443 = vector.multi_reduction <maximumf>, %442, %cst_255 [2] : vector<2x8x8xf32> to vector<2x8xf32>
    %444 = vector.shape_cast %443 : vector<2x8xf32> to vector<2x8x1xf32>
    %445 = vector.broadcast %444 : vector<2x8x1xf32> to vector<2x8x8xf32>
    %446 = arith.subf %442, %445 : vector<2x8x8xf32>
    %447 = math.exp %446 : vector<2x8x8xf32>
    %cst_256 = arith.constant dense<0.000000e+00> : vector<2x8xf32>
    %448 = vector.multi_reduction <add>, %447, %cst_256 [2] : vector<2x8x8xf32> to vector<2x8xf32>
    %449 = vector.shape_cast %448 : vector<2x8xf32> to vector<2x8x1xf32>
    %450 = vector.broadcast %449 : vector<2x8x1xf32> to vector<2x8x8xf32>
    %451 = arith.divf %447, %450 : vector<2x8x8xf32>
    %452 = arith.truncf %451 : vector<2x8x8xf32> to vector<2x8x8xbf16>
    "tpu.trace_start"() <{level = 10 : i32, message = "bqk,bkd->bqd"}> : () -> ()
    %cst_257 = arith.constant dense<0.000000e+00> : vector<2x8x16xf32>
    %453 = tpu.matmul %452, %438, %cst_257 {dimension_numbers = #tpu.dot_dimension_numbers<[2], [1], [1], [2], [0, 0, 0, 1, 1, 2], [0], [0]>} : vector<2x8x8xbf16>, vector<2x8x16xbf16>, vector<2x8x16xf32> -> vector<2x8x16xf32>
    "tpu.trace_stop"() : () -> ()
    %454 = vector.shape_cast %453 : vector<2x8x16xf32> to vector<16x16xf32>
    %455 = arith.truncf %454 : vector<16x16xf32> to vector<16x16xbf16>
    %c6_258 = arith.constant 6 : index
    %c0_259 = arith.constant 0 : index
    %c0_260 = arith.constant 0 : index
    %456 = vector.load %arg9[%c6_258, %c0_259, %c0_260] : memref<8x16x64xbf16, #tpu.memory_space<vmem>>, vector<1x16x64xbf16>
    %457 = vector.shape_cast %456 : vector<1x16x64xbf16> to vector<16x64xbf16>
    %cst_261 = arith.constant dense<0.000000e+00> : vector<16x64xf32>
    %458 = tpu.matmul %455, %457, %cst_261 {dimension_numbers = #tpu.dot_dimension_numbers<[1], [0], [0], [1], [0, 0, 1, 1], [], []>} : vector<16x16xbf16>, vector<16x64xbf16>, vector<16x64xf32> -> vector<16x64xf32>
    %459 = arith.addf %411, %458 : vector<16x64xf32>
    %c7 = arith.constant 7 : index
    %c0_262 = arith.constant 0 : index
    %c0_263 = arith.constant 0 : index
    %460 = vector.load %arg3[%c7, %c0_262, %c0_263] : memref<8x64x16xbf16, #tpu.memory_space<vmem>>, vector<1x64x16xbf16>
    %461 = vector.shape_cast %460 : vector<1x64x16xbf16> to vector<64x16xbf16>
    %cst_264 = arith.constant dense<0.000000e+00> : vector<16x16xf32>
    %462 = tpu.matmul %314, %461, %cst_264 {dimension_numbers = #tpu.dot_dimension_numbers<[1], [0], [0], [1], [0, 0, 1, 1], [], []>} : vector<16x64xbf16>, vector<64x16xbf16>, vector<16x16xf32> -> vector<16x16xf32>
    %c7_265 = arith.constant 7 : index
    %c0_266 = arith.constant 0 : index
    %c0_267 = arith.constant 0 : index
    %463 = vector.load %arg6[%c7_265, %c0_266, %c0_267] : memref<8x1x16xf32, #tpu.memory_space<vmem>>, vector<1x1x16xf32>
    %464 = vector.shape_cast %463 : vector<1x1x16xf32> to vector<1x16xf32>
    %465 = vector.broadcast %464 : vector<1x16xf32> to vector<16x16xf32>
    %466 = arith.addf %462, %465 : vector<16x16xf32>
    %c7_268 = arith.constant 7 : index
    %c0_269 = arith.constant 0 : index
    %c0_270 = arith.constant 0 : index
    %467 = vector.load %arg4[%c7_268, %c0_269, %c0_270] : memref<8x64x16xbf16, #tpu.memory_space<vmem>>, vector<1x64x16xbf16>
    %468 = vector.shape_cast %467 : vector<1x64x16xbf16> to vector<64x16xbf16>
    %cst_271 = arith.constant dense<0.000000e+00> : vector<16x16xf32>
    %469 = tpu.matmul %314, %468, %cst_271 {dimension_numbers = #tpu.dot_dimension_numbers<[1], [0], [0], [1], [0, 0, 1, 1], [], []>} : vector<16x64xbf16>, vector<64x16xbf16>, vector<16x16xf32> -> vector<16x16xf32>
    %c7_272 = arith.constant 7 : index
    %c0_273 = arith.constant 0 : index
    %c0_274 = arith.constant 0 : index
    %470 = vector.load %arg7[%c7_272, %c0_273, %c0_274] : memref<8x1x16xf32, #tpu.memory_space<vmem>>, vector<1x1x16xf32>
    %471 = vector.shape_cast %470 : vector<1x1x16xf32> to vector<1x16xf32>
    %472 = vector.broadcast %471 : vector<1x16xf32> to vector<16x16xf32>
    %473 = arith.addf %469, %472 : vector<16x16xf32>
    %c7_275 = arith.constant 7 : index
    %c0_276 = arith.constant 0 : index
    %c0_277 = arith.constant 0 : index
    %474 = vector.load %arg5[%c7_275, %c0_276, %c0_277] : memref<8x64x16xbf16, #tpu.memory_space<vmem>>, vector<1x64x16xbf16>
    %475 = vector.shape_cast %474 : vector<1x64x16xbf16> to vector<64x16xbf16>
    %cst_278 = arith.constant dense<0.000000e+00> : vector<16x16xf32>
    %476 = tpu.matmul %314, %475, %cst_278 {dimension_numbers = #tpu.dot_dimension_numbers<[1], [0], [0], [1], [0, 0, 1, 1], [], []>} : vector<16x64xbf16>, vector<64x16xbf16>, vector<16x16xf32> -> vector<16x16xf32>
    %c7_279 = arith.constant 7 : index
    %c0_280 = arith.constant 0 : index
    %c0_281 = arith.constant 0 : index
    %477 = vector.load %arg8[%c7_279, %c0_280, %c0_281] : memref<8x1x16xf32, #tpu.memory_space<vmem>>, vector<1x1x16xf32>
    %478 = vector.shape_cast %477 : vector<1x1x16xf32> to vector<1x16xf32>
    %479 = vector.broadcast %478 : vector<1x16xf32> to vector<16x16xf32>
    %480 = arith.addf %476, %479 : vector<16x16xf32>
    %481 = vector.shape_cast %466 : vector<16x16xf32> to vector<2x8x16xf32>
    %482 = arith.truncf %481 : vector<2x8x16xf32> to vector<2x8x16xbf16>
    %483 = vector.shape_cast %473 : vector<16x16xf32> to vector<2x8x16xf32>
    %484 = arith.truncf %483 : vector<2x8x16xf32> to vector<2x8x16xbf16>
    %485 = vector.shape_cast %480 : vector<16x16xf32> to vector<2x8x16xf32>
    %486 = arith.truncf %485 : vector<2x8x16xf32> to vector<2x8x16xbf16>
    "tpu.trace_start"() <{level = 10 : i32, message = "bqd,bkd->bqk"}> : () -> ()
    %cst_282 = arith.constant dense<0.000000e+00> : vector<2x8x8xf32>
    %487 = tpu.matmul %482, %484, %cst_282 {dimension_numbers = #tpu.dot_dimension_numbers<[2], [2], [1], [1], [0, 0, 0, 1, 1, 1], [0], [0]>} : vector<2x8x16xbf16>, vector<2x8x16xbf16>, vector<2x8x8xf32> -> vector<2x8x8xf32>
    "tpu.trace_stop"() : () -> ()
    %cst_283 = arith.constant 2.500000e-01 : f32
    %488 = vector.broadcast %cst_283 : f32 to vector<2x8x8xf32>
    %489 = arith.mulf %487, %488 : vector<2x8x8xf32>
    %490 = arith.addf %489, %6 : vector<2x8x8xf32>
    %cst_284 = arith.constant dense<0xFF800000> : vector<2x8xf32>
    %491 = vector.multi_reduction <maximumf>, %490, %cst_284 [2] : vector<2x8x8xf32> to vector<2x8xf32>
    %492 = vector.shape_cast %491 : vector<2x8xf32> to vector<2x8x1xf32>
    %493 = vector.broadcast %492 : vector<2x8x1xf32> to vector<2x8x8xf32>
    %494 = arith.subf %490, %493 : vector<2x8x8xf32>
    %495 = math.exp %494 : vector<2x8x8xf32>
    %cst_285 = arith.constant dense<0.000000e+00> : vector<2x8xf32>
    %496 = vector.multi_reduction <add>, %495, %cst_285 [2] : vector<2x8x8xf32> to vector<2x8xf32>
    %497 = vector.shape_cast %496 : vector<2x8xf32> to vector<2x8x1xf32>
    %498 = vector.broadcast %497 : vector<2x8x1xf32> to vector<2x8x8xf32>
    %499 = arith.divf %495, %498 : vector<2x8x8xf32>
    %500 = arith.truncf %499 : vector<2x8x8xf32> to vector<2x8x8xbf16>
    "tpu.trace_start"() <{level = 10 : i32, message = "bqk,bkd->bqd"}> : () -> ()
    %cst_286 = arith.constant dense<0.000000e+00> : vector<2x8x16xf32>
    %501 = tpu.matmul %500, %486, %cst_286 {dimension_numbers = #tpu.dot_dimension_numbers<[2], [1], [1], [2], [0, 0, 0, 1, 1, 2], [0], [0]>} : vector<2x8x8xbf16>, vector<2x8x16xbf16>, vector<2x8x16xf32> -> vector<2x8x16xf32>
    "tpu.trace_stop"() : () -> ()
    %502 = vector.shape_cast %501 : vector<2x8x16xf32> to vector<16x16xf32>
    %503 = arith.truncf %502 : vector<16x16xf32> to vector<16x16xbf16>
    %c7_287 = arith.constant 7 : index
    %c0_288 = arith.constant 0 : index
    %c0_289 = arith.constant 0 : index
    %504 = vector.load %arg9[%c7_287, %c0_288, %c0_289] : memref<8x16x64xbf16, #tpu.memory_space<vmem>>, vector<1x16x64xbf16>
    %505 = vector.shape_cast %504 : vector<1x16x64xbf16> to vector<16x64xbf16>
    %cst_290 = arith.constant dense<0.000000e+00> : vector<16x64xf32>
    %506 = tpu.matmul %503, %505, %cst_290 {dimension_numbers = #tpu.dot_dimension_numbers<[1], [0], [0], [1], [0, 0, 1, 1], [], []>} : vector<16x16xbf16>, vector<16x64xbf16>, vector<16x64xf32> -> vector<16x64xf32>
    %507 = arith.addf %459, %506 : vector<16x64xf32>
    %508 = arith.addf %287, %507 : vector<16x64xf32>
    %c1_291 = arith.constant 1 : index
    %c0_292 = arith.constant 0 : index
    %c0_293 = arith.constant 0 : index
    %509 = vector.load %arg10[%c1_291, %c0_292, %c0_293] : memref<2x1x64xf32, #tpu.memory_space<vmem>>, vector<1x1x64xf32>
    %510 = vector.shape_cast %509 : vector<1x1x64xf32> to vector<1x64xf32>
    %511 = vector.broadcast %510 : vector<1x64xf32> to vector<16x64xf32>
    %512 = arith.addf %508, %511 : vector<16x64xf32>
    %c1_294 = arith.constant 1 : index
    %c0_295 = arith.constant 0 : index
    %c0_296 = arith.constant 0 : index
    %513 = vector.load %arg11[%c1_294, %c0_295, %c0_296] : memref<2x1x64xf32, #tpu.memory_space<vmem>>, vector<1x1x64xf32>
    %514 = vector.shape_cast %513 : vector<1x1x64xf32> to vector<1x64xf32>
    %c1_297 = arith.constant 1 : index
    %c0_298 = arith.constant 0 : index
    %c0_299 = arith.constant 0 : index
    %515 = vector.load %arg12[%c1_297, %c0_298, %c0_299] : memref<2x1x64xf32, #tpu.memory_space<vmem>>, vector<1x1x64xf32>
    %516 = vector.shape_cast %515 : vector<1x1x64xf32> to vector<1x64xf32>
    %cst_300 = arith.constant dense<0.000000e+00> : vector<16xf32>
    %517 = vector.multi_reduction <add>, %512, %cst_300 [1] : vector<16x64xf32> to vector<16xf32>
    %518 = vector.shape_cast %517 : vector<16xf32> to vector<16x1xf32>
    %cst_301 = arith.constant 6.400000e+01 : f32
    %519 = vector.broadcast %cst_301 : f32 to vector<16x1xf32>
    %520 = arith.divf %518, %519 : vector<16x1xf32>
    %521 = vector.broadcast %520 : vector<16x1xf32> to vector<16x64xf32>
    %522 = arith.subf %512, %521 : vector<16x64xf32>
    %523 = arith.mulf %522, %522 : vector<16x64xf32>
    %cst_302 = arith.constant dense<0.000000e+00> : vector<16xf32>
    %524 = vector.multi_reduction <add>, %523, %cst_302 [1] : vector<16x64xf32> to vector<16xf32>
    %525 = vector.shape_cast %524 : vector<16xf32> to vector<16x1xf32>
    %cst_303 = arith.constant 6.400000e+01 : f32
    %526 = vector.broadcast %cst_303 : f32 to vector<16x1xf32>
    %527 = arith.divf %525, %526 : vector<16x1xf32>
    %528 = vector.broadcast %520 : vector<16x1xf32> to vector<16x64xf32>
    %529 = arith.subf %512, %528 : vector<16x64xf32>
    %cst_304 = arith.constant 9.99999974E-6 : f32
    %530 = vector.broadcast %cst_304 : f32 to vector<16x1xf32>
    %531 = arith.addf %527, %530 : vector<16x1xf32>
    %532 = math.rsqrt %531 : vector<16x1xf32>
    %533 = vector.broadcast %532 : vector<16x1xf32> to vector<16x64xf32>
    %534 = arith.mulf %529, %533 : vector<16x64xf32>
    %535 = vector.broadcast %514 : vector<1x64xf32> to vector<16x64xf32>
    %536 = arith.mulf %534, %535 : vector<16x64xf32>
    %537 = vector.broadcast %516 : vector<1x64xf32> to vector<16x64xf32>
    %538 = arith.addf %536, %537 : vector<16x64xf32>
    %539 = arith.truncf %538 : vector<16x64xf32> to vector<16x64xbf16>
    %c1_305 = arith.constant 1 : index
    %c0_306 = arith.constant 0 : index
    %c0_307 = arith.constant 0 : index
    %540 = vector.load %arg13[%c1_305, %c0_306, %c0_307] : memref<2x64x256xbf16, #tpu.memory_space<vmem>>, vector<1x64x256xbf16>
    %541 = vector.shape_cast %540 : vector<1x64x256xbf16> to vector<64x256xbf16>
    %cst_308 = arith.constant dense<0.000000e+00> : vector<16x256xf32>
    %542 = tpu.matmul %539, %541, %cst_308 {dimension_numbers = #tpu.dot_dimension_numbers<[1], [0], [0], [1], [0, 0, 1, 1], [], []>} : vector<16x64xbf16>, vector<64x256xbf16>, vector<16x256xf32> -> vector<16x256xf32>
    %c1_309 = arith.constant 1 : index
    %c0_310 = arith.constant 0 : index
    %c0_311 = arith.constant 0 : index
    %543 = vector.load %arg14[%c1_309, %c0_310, %c0_311] : memref<2x1x256xf32, #tpu.memory_space<vmem>>, vector<1x1x256xf32>
    %544 = vector.shape_cast %543 : vector<1x1x256xf32> to vector<1x256xf32>
    %545 = vector.broadcast %544 : vector<1x256xf32> to vector<16x256xf32>
    %546 = arith.addf %542, %545 : vector<16x256xf32>
    %cst_312 = arith.constant 5.000000e-01 : f32
    %547 = vector.broadcast %cst_312 : f32 to vector<16x256xf32>
    %548 = arith.mulf %547, %546 : vector<16x256xf32>
    %cst_313 = arith.constant 4.471500e-02 : f32
    %549 = vector.broadcast %cst_313 : f32 to vector<16x256xf32>
    %550 = arith.mulf %549, %546 : vector<16x256xf32>
    %551 = arith.mulf %550, %546 : vector<16x256xf32>
    %552 = arith.mulf %551, %546 : vector<16x256xf32>
    %553 = arith.addf %546, %552 : vector<16x256xf32>
    %cst_314 = arith.constant 0.797884583 : f32
    %554 = vector.broadcast %cst_314 : f32 to vector<16x256xf32>
    %555 = arith.mulf %554, %553 : vector<16x256xf32>
    %556 = math.tanh %555 : vector<16x256xf32>
    %cst_315 = arith.constant 1.000000e+00 : f32
    %557 = vector.broadcast %cst_315 : f32 to vector<16x256xf32>
    %558 = arith.addf %557, %556 : vector<16x256xf32>
    %559 = arith.mulf %548, %558 : vector<16x256xf32>
    %560 = arith.truncf %559 : vector<16x256xf32> to vector<16x256xbf16>
    %c1_316 = arith.constant 1 : index
    %c0_317 = arith.constant 0 : index
    %c0_318 = arith.constant 0 : index
    %561 = vector.load %arg15[%c1_316, %c0_317, %c0_318] : memref<2x256x64xbf16, #tpu.memory_space<vmem>>, vector<1x256x64xbf16>
    %562 = vector.shape_cast %561 : vector<1x256x64xbf16> to vector<256x64xbf16>
    %cst_319 = arith.constant dense<0.000000e+00> : vector<16x64xf32>
    %563 = tpu.matmul %560, %562, %cst_319 {dimension_numbers = #tpu.dot_dimension_numbers<[1], [0], [0], [1], [0, 0, 1, 1], [], []>} : vector<16x256xbf16>, vector<256x64xbf16>, vector<16x64xf32> -> vector<16x64xf32>
    %c1_320 = arith.constant 1 : index
    %c0_321 = arith.constant 0 : index
    %c0_322 = arith.constant 0 : index
    %564 = vector.load %arg16[%c1_320, %c0_321, %c0_322] : memref<2x1x64xf32, #tpu.memory_space<vmem>>, vector<1x1x64xf32>
    %565 = vector.shape_cast %564 : vector<1x1x64xf32> to vector<1x64xf32>
    %566 = vector.broadcast %565 : vector<1x64xf32> to vector<16x64xf32>
    %567 = arith.addf %563, %566 : vector<16x64xf32>
    %568 = arith.addf %512, %567 : vector<16x64xf32>
    %c0_323 = arith.constant 0 : index
    %c0_324 = arith.constant 0 : index
    %569 = vector.load %arg17[%c0_323, %c0_324] : memref<1x64xf32, #tpu.memory_space<vmem>>, vector<1x64xf32>
    %c0_325 = arith.constant 0 : index
    %c0_326 = arith.constant 0 : index
    %570 = vector.load %arg18[%c0_325, %c0_326] : memref<1x64xf32, #tpu.memory_space<vmem>>, vector<1x64xf32>
    %cst_327 = arith.constant dense<0.000000e+00> : vector<16xf32>
    %571 = vector.multi_reduction <add>, %568, %cst_327 [1] : vector<16x64xf32> to vector<16xf32>
    %572 = vector.shape_cast %571 : vector<16xf32> to vector<16x1xf32>
    %cst_328 = arith.constant 6.400000e+01 : f32
    %573 = vector.broadcast %cst_328 : f32 to vector<16x1xf32>
    %574 = arith.divf %572, %573 : vector<16x1xf32>
    %575 = vector.broadcast %574 : vector<16x1xf32> to vector<16x64xf32>
    %576 = arith.subf %568, %575 : vector<16x64xf32>
    %577 = arith.mulf %576, %576 : vector<16x64xf32>
    %cst_329 = arith.constant dense<0.000000e+00> : vector<16xf32>
    %578 = vector.multi_reduction <add>, %577, %cst_329 [1] : vector<16x64xf32> to vector<16xf32>
    %579 = vector.shape_cast %578 : vector<16xf32> to vector<16x1xf32>
    %cst_330 = arith.constant 6.400000e+01 : f32
    %580 = vector.broadcast %cst_330 : f32 to vector<16x1xf32>
    %581 = arith.divf %579, %580 : vector<16x1xf32>
    %582 = vector.broadcast %574 : vector<16x1xf32> to vector<16x64xf32>
    %583 = arith.subf %568, %582 : vector<16x64xf32>
    %cst_331 = arith.constant 9.99999974E-6 : f32
    %584 = vector.broadcast %cst_331 : f32 to vector<16x1xf32>
    %585 = arith.addf %581, %584 : vector<16x1xf32>
    %586 = math.rsqrt %585 : vector<16x1xf32>
    %587 = vector.broadcast %586 : vector<16x1xf32> to vector<16x64xf32>
    %588 = arith.mulf %583, %587 : vector<16x64xf32>
    %589 = vector.broadcast %569 : vector<1x64xf32> to vector<16x64xf32>
    %590 = arith.mulf %588, %589 : vector<16x64xf32>
    %591 = vector.broadcast %570 : vector<1x64xf32> to vector<16x64xf32>
    %592 = arith.addf %590, %591 : vector<16x64xf32>
    %c0_332 = arith.constant 0 : index
    %c0_333 = arith.constant 0 : index
    %593 = vector.load %arg19[%c0_332, %c0_333] : memref<16x64xf32, #tpu.memory_space<vmem>>, vector<16x64xf32>
    tpu.vector_store %arg19[%c0_332, %c0_333], %592 {strides = array<i32>} : memref<16x64xf32, #tpu.memory_space<vmem>>, vector<16x64xf32>,
    return
  }
}

</mosaic_0001>

<bundles_post_ra>
// kernel: gpt2_forward.1
= control target key start
LH: loop header
LB: loop body
LE: loop exit
PB: predicated region body
PF: predicated region fallthrough
CT: control target
= control target key end

     0   :  { %s7972_s0 = inlined_call_operand.vmem [shape: f32[16,64], index: 0, kind: input, shape index: {}]   ;;  %s7973_s1 = inlined_call_operand.vmem [shape: f32[2,1,64], index: 1, kind: input, shape index: {}]   ;;  %s7974_s2 = inlined_call_operand.vmem [shape: f32[2,1,64], index: 2, kind: input, shape index: {}]   ;;  %s7975_s3 = inlined_call_operand.vmem [shape: bf16[8,64,16], index: 3, kind: input, shape index: {}]   ;;  %s7976_s4 = inlined_call_operand.vmem [shape: bf16[8,64,16], index: 4, kind: input, shape index: {}]   ;;  %s7977_s5 = inlined_call_operand.vmem [shape: bf16[8,64,16], index: 5, kind: input, shape index: {}]   ;;  %s7978_s6 = inlined_call_operand.vmem [shape: f32[8,1,16], index: 6, kind: input, shape index: {}]   ;;  %s7979_s7 = inlined_call_operand.vmem [shape: f32[8,1,16], index: 7, kind: input, shape index: {}]   ;;  %s7980_s8 = inlined_call_operand.vmem [shape: f32[8,1,16], index: 8, kind: input, shape index: {}]   ;;  %s7981_s9 = inlined_call_operand.vmem [shape: bf16[8,16,64], index: 9, kind: input, shape index: {}]   ;;  %s7982_s10 = inlined_call_operand.vmem [shape: f32[2,1,64], index: 10, kind: input, shape index: {}]   ;;  %s7983_s11 = inlined_call_operand.vmem [shape: f32[2,1,64], index: 11, kind: input, shape index: {}]   ;;  %s7984_s12 = inlined_call_operand.vmem [shape: f32[2,1,64], index: 12, kind: input, shape index: {}]   ;;  %s7985_s13 = inlined_call_operand.vmem [shape: bf16[2,64,256], index: 13, kind: input, shape index: {}]   ;;  %s7986_s14 = inlined_call_operand.vmem [shape: f32[2,1,256], index: 14, kind: input, shape index: {}]   ;;  %s7987_s15 = inlined_call_operand.vmem [shape: bf16[2,256,64], index: 15, kind: input, shape index: {}]   ;;  %s7988_s16 = inlined_call_operand.vmem [shape: f32[2,1,64], index: 16, kind: input, shape index: {}]   ;;  %s7989_s17 = inlined_call_operand.vmem [shape: f32[1,64], index: 17, kind: input, shape index: {}]   ;;  %s7990_s18 = inlined_call_operand.vmem [shape: f32[1,64], index: 18, kind: input, shape index: {}]   ;;  %s7991_s19 = inlined_call_operand.hbm [shape: f32[16,64], index: 19, kind: output, shape index: {}]  }
   0x1   :  { %7996 = sst [smem:[#allocation5_spill]] %s7972_s0 }
   0x2   :  { %7997 = sst [smem:[#allocation6_spill]] %s7973_s1 }
   0x3   :  { %7998 = sst [smem:[#allocation7_spill]] %s7974_s2 }
   0x4   :  { %7999 = sst [smem:[#allocation8_spill]] %s7975_s3 }
   0x5   :  { %s8000_s20 = sld [smem:[#allocation5_spill]]  ;;  %vm74_vm0 = vcmask 523264  }
   0xb   :  { %v64_v0 = vld [vmem:[%s8000_s20] sm:$0xff]  ;;  %v65_v1 = vld [vmem:[%s8000_s20 + $0x8] sm:$0xff] }
   0xc   :  { %v75_v2 = vsel %vm74_vm0, %v64_v0, 0.0  ;;  %v78_v3 = vsel %vm74_vm0, %v65_v1, 0.0 }
   0xd   :  { %76 = vadd.xlane.f32.xlu0 %v75_v2 }
  0x11   :  { %79 = vadd.xlane.f32.xlu0 %v78_v3 }
  0x12   :  { %24 = vsyncpa [#allocation3], 0  ;;  %s8001_s23 = sld [smem:[#allocation8_spill]]  ;;  %v6716_v15 = vmov 0.0   ;;  %v6431_v16 = vld [vmem:[%s7976_s4] sm:$0xff]   ;;  %v6433_v18 = vld [vmem:[%s7976_s4 + $0x8] sm:$0xff]  }
  0x13   :  { %5895 = vmatprep.subr.bf16.mxu0 %v6716_v15  ;;  %5907 = vmatprep.subr.bf16.mxu1 %v6716_v15  ;;  %v6435_v20 = vld [vmem:[%s7976_s4 + $0x10] sm:$0xff]   ;;  %v6437_v22 = vld [vmem:[%s7976_s4 + $0x18] sm:$0xff]   ;;  %vm6717_vm1 = vmmov 0   ;;  %s8002_s26 = sld [smem:[#allocation6_spill]]  ;;  %s8003_s29 = sld [smem:[#allocation7_spill]]  ;;  %v6438_v39 = vld [vmem:[%s7977_s5] sm:$0xff]  }
  0x14   :  { %5908 = vmatpush3.bf16.msra.mxu1 %v6431_v16  ;;  %5903 = vmatprep.mubr.msk.bf16.mxu0 %vm6717_vm1, %v6716_v15  ;;  %v6439_v41 = vld [vmem:[%s7977_s5 + $0x8] sm:$0xff]   ;;  %v6440_v42 = vld [vmem:[%s7977_s5 + $0x10] sm:$0xff]   ;;  %v6441_v43 = vld [vmem:[%s7977_s5 + $0x18] sm:$0xff]   ;;  %vm368_vm2 = vcmask 130048   ;;  %vm493_vm3 = vcmask 1043456   ;;  %vm465_vm5 = vcmask 64512  }
  0x15   :  { %5909 = vmatprep.subr.bf16.mxu1 %v6716_v15  ;;  %5915 = vmatprep.mubr.msk.bf16.mxu1 %vm6717_vm1, %v6716_v15  ;;  %v5153_v44 = vld [vmem:[%s7979_s7] ss:$0 sm:$0xff]  ;;  %v6718_v16 = vmov -1e+09   ;;  %s6720_s28 = smov [#allocation2]  }
  0x16   :  { %v5147_v56 = vld [vmem:[%s7978_s6] ss:$0 sm:$0xff]  ;;  %s5134_s0 = sshll.u32 %s6720_s28, 4  ;;  %s5135_s0 = int_to_ptr.vmem [resolvable:$true] %s5134_s0 }
  0x17   :  { %s6692_s30 = scalar_lea.vmem %s5135_s0, 256  ;;  %p6697_p1 = scmp.lt.s32.totalorder %s5135_s0, %s5135_s0 }
  0x18   :  { %v6430_v14 = vld [vmem:[%s8001_s23] sm:$0xff]   ;;  %v6432_v17 = vld [vmem:[%s8001_s23 + $0x8] sm:$0xff]   ;;  %5910 = vmatpush3.bf16.msra.mxu1 %v6433_v18  ;;  %v6434_v19 = vld [vmem:[%s8001_s23 + $0x10] sm:$0xff]   ;;  %p6693_p0 = scmp.ne.s32.totalorder %s5135_s0, %s6692_s30  ;;  %p6698_p2 = scmp.lt.s32.totalorder %s6692_s30, %s6692_s30 }
  0x19   :  { %5896 = vmatpush3.bf16.msra.mxu0 %v6430_v14  ;;  %5911 = vmatprep.subr.bf16.mxu1 %v6716_v15  ;;  %v6436_v21 = vld [vmem:[%s8001_s23 + $0x18] sm:$0xff]   ;;  %v5145_v31 = vld [vmem:[%s8002_s26] ss:$0 sm:$0xff] }
  0x1a   :  { %5897 = vmatprep.subr.bf16.mxu0 %v6716_v15  ;;  %v5146_v35 = vld [vmem:[%s8003_s29] ss:$0 sm:$0xff]  ;;  %p6699_p3 = por %p6698_p2, %p6697_p1 }
  0x1c   :  { %5912 = vmatpush3.bf16.msra.mxu1 %v6435_v20  ;;  %p6700_p4 = pnand %p6699_p3, %p6693_p0 }
  0x1d   :  { %5898 = vmatpush3.bf16.msra.mxu0 %v6432_v17  ;;  %5913 = vmatprep.subr.bf16.mxu1 %v6716_v15 }
  0x1e   :  { %5899 = vmatprep.subr.bf16.mxu0 %v6716_v15 }
  0x20   :  { %5914 = vmatpush3.bf16.msra.mxu1 %v6437_v22 }
  0x21   :  { %5900 = vmatpush3.bf16.msra.mxu0 %v6434_v19  ;;  %5937 = vmatprep.subr.bf16.mxu1 %v6716_v15 }
  0x22   :  { %5901 = vmatprep.subr.bf16.mxu0 %v6716_v15 }
  0x25   :  { %5902 = vmatpush3.bf16.msra.mxu0 %v6436_v21 }
  0x26   :  { %5919 = vmatprep.subr.bf16.mxu0 %v6716_v15 }
  0x9a   :  { %v77_v4 = vpop.xlane.xlu0 %76 }
  0x9b   :  { %v82_v5 = vmul.f32 0.015625, %v77_v4 }
  0x9d   :  { %v84_v6 = vsub.f32 %v64_v0, %v82_v5  ;;  %v5159_v0 = vld [vmem:[%s7980_s8] ss:$0 sm:$0xff] }
  0x9e   :  { %v80_v7 = vpop.xlane.xlu0 %79 }
  0x9f   :  { %v83_v8 = vmul.f32 0.015625, %v80_v7  ;;  %v86_v9 = vmul.f32 %v84_v6, %v84_v6 }
  0xa1   :  { %v85_v10 = vsub.f32 %v65_v1, %v83_v8  ;;  %v88_v11 = vsel %vm74_vm0, %v86_v9, 0.0 }
  0xa2   :  { %89 = vadd.xlane.f32.xlu1 %v88_v11  ;;  %v66_v11 = vlaneseq }
  0xa3   :  { %v87_v12 = vmul.f32 %v85_v10, %v85_v10 }
  0xa5   :  { %v91_v13 = vsel %vm74_vm0, %v87_v12, 0.0  ;;  %v6930_v12 = vshrl.u32 %v66_v11, 7 }
  0xa6   :  { %92 = vadd.xlane.f32.xlu1 %v91_v13  ;;  %v69_v13 = vand.u32 127, %v66_v11 }
  0xa8   :  { %vm70_vm4 = vcmp.ge.s32.totalorder %v6930_v12, %v69_v13 }
  0xa9   :  { %v6933_v17 = vsel %vm70_vm4, 0.0, %v6718_v16 }
 0x12f   :  { %v90_v23 = vpop.xlane.xlu1 %89 }
 0x130   :  { %v94_v24 = vmul.f32 0.015625, %v90_v23 }
 0x132   :  { %v96_v25 = vadd.f32 1e-05, %v94_v24 }
 0x133   :  { %v93_v26 = vpop.xlane.xlu1 %92 }
 0x134   :  { %6590 = vrsqrt.f32 %v96_v25  ;;  %v95_v27 = vmul.f32 0.015625, %v93_v26 }
 0x136   :  { %v97_v28 = vadd.f32 1e-05, %v95_v27 }
 0x138   :  { %6592 = vrsqrt.f32 %v97_v28 }
 0x13e   :  { %v6591_v29 = vpop.eup %6590 }
 0x13f   :  { %v100_v30 = vmul.f32 %v6591_v29, %v84_v6 }
 0x141   :  { %v108_v33 = vmul.f32 %v5145_v31, %v100_v30 }
 0x142   :  { %v6593_v32 = vpop.eup %6592 }
 0x143   :  { %v101_v34 = vmul.f32 %v6593_v32, %v85_v10  ;;  %v116_v37 = vadd.f32 %v5146_v35, %v108_v33 }
 0x145   :  { %v109_v36 = vmul.f32 %v5145_v31, %v101_v34 }
 0x147   :  { %v117_v38 = vadd.f32 %v5146_v35, %v109_v36 }
 0x149   :  { %v6880_v40 = vpack.c.bf16 %v117_v38, %v116_v37 }
 0x14b   :  { %5904 = vmatmul.mubr.msk.bf16.vlgmr.msra.gmra.mrb[0].mxu0 %vm74_vm0, %v6880_v40  ;;  %5916 = vmatmul.mubr.msk.bf16.vlgmr.msra.gmra.mrb[0].mxu1 %vm74_vm0, %v6880_v40 }
 0x14c   :  { %5920 = vmatpush3.bf16.msra.mxu0 %v6438_v39  ;;  %5927 = vmatprep.mubr.msk.bf16.mxu0 %vm6717_vm1, %v6716_v15 }
 0x14d   :  { %5921 = vmatprep.subr.bf16.mxu0 %v6716_v15  ;;  %5939 = vmatprep.mubr.msk.bf16.mxu1 %vm6717_vm1, %v6716_v15 }
 0x150   :  { %5922 = vmatpush3.bf16.msra.mxu0 %v6439_v41 }
 0x151   :  { %5923 = vmatprep.subr.bf16.mxu0 %v6716_v15 }
 0x154   :  { %5924 = vmatpush3.bf16.msra.mxu0 %v6440_v42 }
 0x155   :  { %5925 = vmatprep.subr.bf16.mxu0 %v6716_v15 }
 0x158   :  { %5926 = vmatpush3.bf16.msra.mxu0 %v6441_v43 }
 0x159   :  { %5931 = vmatprep.subr.bf16.mxu0 %v6716_v15 }
 0x15b   :  { %5928 = vmatmul.mubr.msk.bf16.vlgmr.msra.gmra.mrb[4].mxu0 %vm74_vm0, %v6880_v40 }
 0x15c   :  { %5933 = vmatprep.mubr.msk.bf16.mxu0 %vm6717_vm1, %v6716_v15 }
 0x21e   :  { %v195_v45 = vpop.f32.mrb[0].mxu0  ;;  %v275_v46 = vpop.f32.mrb[0].mxu1 }
 0x21f   :  { %v276_v47 = vadd.f32 %v5153_v44, %v275_v46  ;;  %v5905_v48 = vpop.f32.mrb[1].mxu0  ;;  %v5917_v49 = vpop.f32.mrb[1].mxu1  ;;  %v196_v59 = vadd.f32 %v5147_v56, %v195_v45 }
 0x220   :  { %v198_v50 = vpop.f32.mrb[2].mxu0  ;;  %v278_v51 = vpop.f32.mrb[2].mxu1 }
 0x221   :  { %v364_v52 = vpack.c.bf16 %v276_v47, %v276_v47  ;;  %v279_v53 = vadd.f32 %v5153_v44, %v278_v51  ;;  %v5906_v54 = vpop.f32.mrb[3].mxu0  ;;  %v5918_v55 = vpop.f32.mrb[3].mxu1  ;;  %v199_v61 = vadd.f32 %v5147_v56, %v198_v50  ;;  %v362_v62 = vpack.c.bf16 %v196_v59, %v196_v59  ;;  %v6442_v47 = vld [vmem:[%s8001_s23 + $0x20] sm:$0xff]   ;;  %v6448_v56 = vld [vmem:[%s8001_s23 + $0x38] sm:$0xff]   ;;  %v6451_v59 = vld [vmem:[%s7977_s5 + $0x28] sm:$0xff]  }
 0x222   :  { %v6443_v50 = vld [vmem:[%s7976_s4 + $0x20] sm:$0xff]   ;;  %v6446_v54 = vld [vmem:[%s8001_s23 + $0x30] sm:$0xff]  }
 0x223   :  { %v373_v57 = vsel %vm368_vm2, %v364_v52, 0  ;;  %v365_v58 = vpack.c.bf16 %v279_v53, %v279_v53  ;;  %v363_v63 = vpack.c.bf16 %v199_v61, %v199_v61  ;;  %v6444_v52 = vld [vmem:[%s8001_s23 + $0x28] sm:$0xff]   ;;  %v6447_v55 = vld [vmem:[%s7976_s4 + $0x30] sm:$0xff]   ;;  %v6453_v61 = vld [vmem:[%s7977_s5 + $0x38] sm:$0xff]  }
 0x224   :  { %5932 = vmatpush3.bf16.xpose.msra.mxu0 %v373_v57  ;;  %v6445_v53 = vld [vmem:[%s7976_s4 + $0x28] sm:$0xff]   ;;  %v6449_v57 = vld [vmem:[%s7976_s4 + $0x38] sm:$0xff]  }
 0x225   :  { %v419_v60 = vsel %vm368_vm2, %v365_v58, 0  ;;  %5943 = vmatprep.subr.bf16.mxu0 %v6716_v15  ;;  %v6450_v58 = vld [vmem:[%s7977_s5 + $0x20] sm:$0xff]  }
 0x226   :  { %5938 = vmatpush3.bf16.xpose.msra.mxu1 %v419_v60  ;;  %v6452_v60 = vld [vmem:[%s7977_s5 + $0x30] sm:$0xff]  }
 0x227   :  { %5949 = vmatprep.subr.bf16.mxu1 %v6716_v15 }
 0x22b   :  { %5934 = vmatmul.mubr.msk.bf16.vlgmr.msra.gmra.mrb[8].mxu0 %vm368_vm2, %v362_v62 }
 0x22c   :  { %5945 = vmatprep.mubr.msk.bf16.mxu0 %vm6717_vm1, %v6716_v15 }
 0x22d   :  { %5940 = vmatmul.mubr.msk.bf16.vlgmr.msra.gmra.mrb[4].mxu1 %vm368_vm2, %v363_v63 }
 0x22e   :  { %v355_v1 = vpop.f32.mrb[4].mxu0  ;;  %5951 = vmatprep.mubr.msk.bf16.mxu1 %vm6717_vm1, %v6716_v15 }
 0x22f   :  { %v356_v2 = vadd.f32 %v5159_v0, %v355_v1  ;;  %v5929_v3 = vpop.f32.mrb[5].mxu0 }
 0x230   :  { %v358_v4 = vpop.f32.mrb[6].mxu0 }
 0x231   :  { %v366_v5 = vpack.c.bf16 %v356_v2, %v356_v2  ;;  %v359_v6 = vadd.f32 %v5159_v0, %v358_v4  ;;  %v5930_v7 = vpop.f32.mrb[7].mxu0 }
 0x233   :  { %v495_v8 = vsel %vm493_vm3, %v366_v5, 0  ;;  %v367_v9 = vpack.c.bf16 %v359_v6, %v359_v6 }
 0x234   :  { %5944 = vmatpush3.bf16.msra.mxu0 %v495_v8  ;;  %v5193_v8 = vld [vmem:[%s7979_s7 + $0x1] ss:$0 sm:$0xff] }
 0x235   :  { %v541_v10 = vsel %vm493_vm3, %v367_v9, 0  ;;  %5955 = vmatprep.subr.bf16.mxu0 %v6716_v15 }
 0x236   :  { %5950 = vmatpush3.bf16.msra.mxu1 %v541_v10 }
 0x237   :  { %5967 = vmatprep.subr.bf16.mxu1 %v6716_v15 }
 0x2fe   :  { %v409_v14 = vpop.f32.mrb[8].mxu0 }
 0x2ff   :  { %v461_v18 = vmul.f32 0.25, %v409_v14  ;;  %v5935_v19 = vpop.f32.mrb[9].mxu0 }
 0x300   :  { %v412_v20 = vpop.f32.mrb[10].mxu0  ;;  %v455_v21 = vpop.f32.mrb[4].mxu1 }
 0x301   :  { %v462_v22 = vmul.f32 0.25, %v455_v21  ;;  %v5936_v23 = vpop.f32.mrb[11].mxu0  ;;  %v5941_v24 = vpop.f32.mrb[5].mxu1  ;;  %v463_v25 = vadd.f32 %v461_v18, %v6933_v17  ;;  %v5178_v21 = vld [vmem:[%s7978_s6 + $0x1] ss:$0 sm:$0xff] }
 0x302   :  { %v458_v26 = vpop.f32.mrb[6].mxu1 }
 0x303   :  { %v5942_v27 = vpop.f32.mrb[7].mxu1  ;;  %v466_v28 = vsel %vm465_vm5, %v463_v25, -inf  ;;  %v464_v29 = vadd.f32 %v462_v22, %v6933_v17 }
 0x304   :  { %467 = vmax.xlane.f32.xlu1 %v466_v28  ;;  %v5208_v27 = vld [vmem:[%s7980_s8 + $0x1] ss:$0 sm:$0xff] }
 0x305   :  { %v469_v30 = vsel %vm465_vm5, %v464_v29, -inf }
 0x306   :  { %470 = vmax.xlane.f32.xlu0 %v469_v30 }
 0x391   :  { %v468_v31 = vpop.xlane.xlu1 %467 }
 0x392   :  { %v472_v32 = vsub.f32 %v463_v25, %v468_v31 }
 0x393   :  { %v471_v33 = vpop.xlane.xlu0 %470 }
 0x394   :  { %v474_v34 = vmul.f32 1.442695, %v472_v32  ;;  %v473_v35 = vsub.f32 %v464_v29, %v471_v33 }
 0x396   :  { %6594 = vpow2.f32 %v474_v34  ;;  %v476_v36 = vmul.f32 1.442695, %v473_v35 }
 0x398   :  { %6596 = vpow2.f32 %v476_v36 }
 0x3a0   :  { %v6595_v37 = vpop.eup %6594 }
 0x3a1   :  { %v478_v38 = vsel %vm465_vm5, %v6595_v37, 0.0 }
 0x3a2   :  { %v6597_v39 = vpop.eup %6596  ;;  %479 = vadd.xlane.f32.xlu1 %v478_v38 }
 0x3a3   :  { %v481_v41 = vsel %vm465_vm5, %v6597_v39, 0.0 }
 0x3a4   :  { %482 = vadd.xlane.f32.xlu0 %v481_v41 }
 0x42f   :  { %v480_v42 = vpop.xlane.xlu1 %479 }
 0x430   :  { %6598 = vrcp.f32 %v480_v42 }
 0x431   :  { %v483_v43 = vpop.xlane.xlu0 %482 }
 0x432   :  { %6600 = vrcp.f32 %v483_v43 }
 0x43a   :  { %v6599_v44 = vpop.eup %6598 }
 0x43b   :  { %v485_v45 = vmul.f32 %v6599_v44, %v6595_v37 }
 0x43c   :  { %v6601_v46 = vpop.eup %6600 }
 0x43d   :  { %v487_v48 = vmul.f32 %v6601_v46, %v6597_v39  ;;  %v488_v49 = vpack.c.bf16 %v485_v45, %v485_v45 }
 0x43f   :  { %5946 = vmatmul.mubr.msk.bf16.vlgmr.msra.gmra.mrb[12].mxu0 %vm465_vm5, %v488_v49  ;;  %v489_v51 = vpack.c.bf16 %v487_v48, %v487_v48 }
 0x440   :  { %5956 = vmatpush3.bf16.msra.mxu0 %v6442_v47  ;;  %5963 = vmatprep.mubr.msk.bf16.mxu0 %vm6717_vm1, %v6716_v15 }
 0x441   :  { %5952 = vmatmul.mubr.msk.bf16.vlgmr.msra.gmra.mrb[8].mxu1 %vm465_vm5, %v489_v51  ;;  %5957 = vmatprep.subr.bf16.mxu0 %v6716_v15 }
 0x442   :  { %5968 = vmatpush3.bf16.msra.mxu1 %v6443_v50  ;;  %5975 = vmatprep.mubr.msk.bf16.mxu1 %vm6717_vm1, %v6716_v15 }
 0x443   :  { %5969 = vmatprep.subr.bf16.mxu1 %v6716_v15 }
 0x444   :  { %5958 = vmatpush3.bf16.msra.mxu0 %v6444_v52 }
 0x445   :  { %5959 = vmatprep.subr.bf16.mxu0 %v6716_v15 }
 0x446   :  { %5970 = vmatpush3.bf16.msra.mxu1 %v6445_v53 }
 0x447   :  { %5971 = vmatprep.subr.bf16.mxu1 %v6716_v15 }
 0x448   :  { %5960 = vmatpush3.bf16.msra.mxu0 %v6446_v54 }
 0x449   :  { %5961 = vmatprep.subr.bf16.mxu0 %v6716_v15 }
 0x44a   :  { %5972 = vmatpush3.bf16.msra.mxu1 %v6447_v55 }
 0x44b   :  { %5973 = vmatprep.subr.bf16.mxu1 %v6716_v15 }
 0x44c   :  { %5962 = vmatpush3.bf16.msra.mxu0 %v6448_v56 }
 0x44d   :  { %5979 = vmatprep.subr.bf16.mxu0 %v6716_v15 }
 0x44e   :  { %5974 = vmatpush3.bf16.msra.mxu1 %v6449_v57 }
 0x44f   :  { %5964 = vmatmul.mubr.msk.bf16.vlgmr.msra.gmra.mrb[16].mxu0 %vm74_vm0, %v6880_v40  ;;  %5991 = vmatprep.subr.bf16.mxu1 %v6716_v15 }
 0x450   :  { %5980 = vmatpush3.bf16.msra.mxu0 %v6450_v58  ;;  %5987 = vmatprep.mubr.msk.bf16.mxu0 %vm6717_vm1, %v6716_v15 }
 0x451   :  { %5976 = vmatmul.mubr.msk.bf16.vlgmr.msra.gmra.mrb[12].mxu1 %vm74_vm0, %v6880_v40  ;;  %5981 = vmatprep.subr.bf16.mxu0 %v6716_v15 }
 0x452   :  { %5993 = vmatprep.mubr.msk.bf16.mxu1 %vm6717_vm1, %v6716_v15 }
 0x454   :  { %5982 = vmatpush3.bf16.msra.mxu0 %v6451_v59 }
 0x455   :  { %5983 = vmatprep.subr.bf16.mxu0 %v6716_v15 }
 0x458   :  { %5984 = vmatpush3.bf16.msra.mxu0 %v6452_v60 }
 0x459   :  { %5985 = vmatprep.subr.bf16.mxu0 %v6716_v15 }
 0x45c   :  { %5986 = vmatpush3.bf16.msra.mxu0 %v6453_v61 }
 0x45d   :  { %6003 = vmatprep.subr.bf16.mxu0 %v6716_v15 }
 0x45f   :  { %5988 = vmatmul.mubr.msk.bf16.vlgmr.msra.gmra.mrb[20].mxu0 %vm74_vm0, %v6880_v40 }
 0x460   :  { %6005 = vmatprep.mubr.msk.bf16.mxu0 %vm6717_vm1, %v6716_v15 }
 0x512   :  { %v7007_v62 = vpop.f32.mrb[12].mxu0 }
 0x513   :  { %v5947_v63 = vpop.f32.mrb[13].mxu0 }
 0x514   :  { %v534_v0 = vpop.f32.mrb[14].mxu0  ;;  %v7009_v1 = vpop.f32.mrb[8].mxu1 }
 0x515   :  { %v583_v2 = vpack.c.bf16 %v7009_v1, %v7007_v62  ;;  %v5948_v3 = vpop.f32.mrb[15].mxu0  ;;  %v5953_v4 = vpop.f32.mrb[9].mxu1  ;;  %v6458_v62 = vld [vmem:[%s7976_s4 + $0x58] sm:$0xff]   ;;  %v6459_v1 = vld [vmem:[%s7981_s9 + $0x8] sm:$0xff]  }
 0x516   :  { %v580_v5 = vpop.f32.mrb[10].mxu1 }
 0x517   :  { %v5954_v6 = vpop.f32.mrb[11].mxu1 }
 0x522   :  { %v661_v7 = vpop.f32.mrb[16].mxu0 }
 0x523   :  { %v5965_v9 = vpop.f32.mrb[17].mxu0  ;;  %v662_v24 = vadd.f32 %v5178_v21, %v661_v7 }
 0x524   :  { %v664_v10 = vpop.f32.mrb[18].mxu0  ;;  %v743_v11 = vpop.f32.mrb[12].mxu1 }
 0x525   :  { %v744_v13 = vadd.f32 %v5193_v8, %v743_v11  ;;  %v5966_v14 = vpop.f32.mrb[19].mxu0  ;;  %v5977_v16 = vpop.f32.mrb[13].mxu1  ;;  %v832_v26 = vpack.c.bf16 %v662_v24, %v662_v24  ;;  %v665_v30 = vadd.f32 %v5178_v21, %v664_v10  ;;  %v6460_v24 = vld [vmem:[%s8001_s23 + $0x40] sm:$0xff]  }
 0x526   :  { %v746_v18 = vpop.f32.mrb[14].mxu1  ;;  %v6455_v16 = vld [vmem:[%s7976_s4 + $0x40] sm:$0xff]  }
 0x527   :  { %v834_v19 = vpack.c.bf16 %v744_v13, %v744_v13  ;;  %v5978_v20 = vpop.f32.mrb[15].mxu1  ;;  %v747_v23 = vadd.f32 %v5193_v8, %v746_v18  ;;  %v833_v37 = vpack.c.bf16 %v665_v30, %v665_v30  ;;  %v6454_v13 = vld [vmem:[%s7981_s9] sm:$0xff]   ;;  %v6456_v18 = vld [vmem:[%s7976_s4 + $0x48] sm:$0xff]  }
 0x529   :  { %v842_v22 = vsel %vm368_vm2, %v834_v19, 0  ;;  %v835_v25 = vpack.c.bf16 %v747_v23, %v747_v23  ;;  %v6457_v19 = vld [vmem:[%s7976_s4 + $0x50] sm:$0xff]  }
 0x52a   :  { %5992 = vmatpush3.bf16.xpose.msra.mxu1 %v842_v22 }
 0x52b   :  { %5997 = vmatprep.subr.bf16.mxu1 %v6716_v15  ;;  %v888_v28 = vsel %vm368_vm2, %v835_v25, 0 }
 0x531   :  { %5994 = vmatmul.mubr.msk.bf16.vlgmr.msra.gmra.mrb[16].mxu1 %vm368_vm2, %v832_v26 }
 0x532   :  { %v825_v29 = vpop.f32.mrb[20].mxu0  ;;  %5998 = vmatpush3.bf16.xpose.msra.mxu1 %v888_v28  ;;  %5999 = vmatprep.mubr.msk.bf16.mxu1 %vm6717_vm1, %v6716_v15 }
 0x533   :  { %v826_v31 = vadd.f32 %v5208_v27, %v825_v29  ;;  %v5989_v32 = vpop.f32.mrb[21].mxu0  ;;  %6009 = vmatprep.subr.bf16.mxu1 %v6716_v15  ;;  %v6461_v29 = vld [vmem:[%s8001_s23 + $0x48] sm:$0xff]  }
 0x534   :  { %v828_v33 = vpop.f32.mrb[22].mxu0 }
 0x535   :  { %v836_v34 = vpack.c.bf16 %v826_v31, %v826_v31  ;;  %v829_v35 = vadd.f32 %v5208_v27, %v828_v33  ;;  %v5990_v36 = vpop.f32.mrb[23].mxu0  ;;  %v6462_v31 = vld [vmem:[%s8001_s23 + $0x50] sm:$0xff]  }
 0x536   :  { %v6464_v36 = vld [vmem:[%s7977_s5 + $0x40] sm:$0xff]  }
 0x537   :  { %v962_v38 = vsel %vm493_vm3, %v836_v34, 0  ;;  %v837_v39 = vpack.c.bf16 %v829_v35, %v829_v35  ;;  %v6463_v35 = vld [vmem:[%s8001_s23 + $0x58] sm:$0xff]  }
 0x538   :  { %6004 = vmatpush3.bf16.msra.mxu0 %v962_v38  ;;  %v5248_v38 = vld [vmem:[%s7979_s7 + $0x2] ss:$0 sm:$0xff] }
 0x539   :  { %v1008_v41 = vsel %vm493_vm3, %v837_v39, 0  ;;  %6000 = vmatmul.mubr.msk.bf16.vlgmr.msra.gmra.mrb[20].mxu1 %vm368_vm2, %v833_v37  ;;  %6015 = vmatprep.subr.bf16.mxu0 %v6716_v15  ;;  %v6465_v37 = vld [vmem:[%s7977_s5 + $0x48] sm:$0xff]  }
 0x53a   :  { %6010 = vmatpush3.bf16.msra.mxu1 %v1008_v41  ;;  %6011 = vmatprep.mubr.msk.bf16.mxu1 %vm6717_vm1, %v6716_v15  ;;  %v6466_v41 = vld [vmem:[%s7977_s5 + $0x50] sm:$0xff]  }
 0x53b   :  { %6021 = vmatprep.subr.bf16.mxu1 %v6716_v15 }
 0x604   :  { %v878_v42 = vpop.f32.mrb[16].mxu1 }
 0x605   :  { %v930_v43 = vmul.f32 0.25, %v878_v42  ;;  %v5995_v44 = vpop.f32.mrb[17].mxu1 }
 0x606   :  { %v881_v45 = vpop.f32.mrb[18].mxu1 }
 0x607   :  { %v5996_v46 = vpop.f32.mrb[19].mxu1  ;;  %v932_v47 = vadd.f32 %v930_v43, %v6933_v17 }
 0x609   :  { %v934_v48 = vsel %vm465_vm5, %v932_v47, -inf }
 0x60a   :  { %935 = vmax.xlane.f32.xlu0 %v934_v48  ;;  %v6467_v48 = vld [vmem:[%s7977_s5 + $0x58] sm:$0xff]  }
 0x60c   :  { %v924_v49 = vpop.f32.mrb[20].mxu1 }
 0x60d   :  { %v931_v50 = vmul.f32 0.25, %v924_v49  ;;  %v6001_v51 = vpop.f32.mrb[21].mxu1 }
 0x60e   :  { %v927_v52 = vpop.f32.mrb[22].mxu1 }
 0x60f   :  { %v6002_v53 = vpop.f32.mrb[23].mxu1  ;;  %v933_v54 = vadd.f32 %v931_v50, %v6933_v17 }
 0x611   :  { %v937_v55 = vsel %vm465_vm5, %v933_v54, -inf }
 0x612   :  { %938 = vmax.xlane.f32.xlu1 %v937_v55 }
 0x697   :  { %v936_v56 = vpop.xlane.xlu0 %935 }
 0x698   :  { %v940_v57 = vsub.f32 %v932_v47, %v936_v56  ;;  %v5233_v56 = vld [vmem:[%s7978_s6 + $0x2] ss:$0 sm:$0xff] }
 0x69a   :  { %v942_v58 = vmul.f32 1.442695, %v940_v57 }
 0x69c   :  { %6602 = vpow2.f32 %v942_v58 }
 0x69f   :  { %v939_v59 = vpop.xlane.xlu1 %938 }
 0x6a0   :  { %v941_v60 = vsub.f32 %v933_v54, %v939_v59 }
 0x6a2   :  { %v944_v61 = vmul.f32 1.442695, %v941_v60 }
 0x6a4   :  { %6604 = vpow2.f32 %v944_v61 }
 0x6a6   :  { %v6603_v63 = vpop.eup %6602 }
 0x6a7   :  { %v946_v0 = vsel %vm465_vm5, %v6603_v63, 0.0 }
 0x6a8   :  { %947 = vadd.xlane.f32.xlu0 %v946_v0 }
 0x6ae   :  { %v6605_v3 = vpop.eup %6604 }
 0x6af   :  { %v949_v4 = vsel %vm465_vm5, %v6605_v3, 0.0 }
 0x6b0   :  { %950 = vadd.xlane.f32.xlu1 %v949_v4 }
 0x735   :  { %v948_v5 = vpop.xlane.xlu0 %947 }
 0x736   :  { %6606 = vrcp.f32 %v948_v5 }
 0x73d   :  { %v951_v6 = vpop.xlane.xlu1 %950 }
 0x73e   :  { %6608 = vrcp.f32 %v951_v6  ;;  %v5263_v6 = vld [vmem:[%s7980_s8 + $0x2] ss:$0 sm:$0xff] }
 0x740   :  { %v6607_v7 = vpop.eup %6606 }
 0x741   :  { %v953_v8 = vmul.f32 %v6607_v7, %v6603_v63 }
 0x743   :  { %v956_v9 = vpack.c.bf16 %v953_v8, %v953_v8 }
 0x745   :  { %6006 = vmatmul.mubr.msk.bf16.vlgmr.msra.gmra.mrb[24].mxu0 %vm465_vm5, %v956_v9 }
 0x746   :  { %6017 = vmatprep.mubr.msk.bf16.mxu0 %vm6717_vm1, %v6716_v15  ;;  %6016 = vmatpush3.bf16.msra.mxu0 %v6459_v1 }
 0x747   :  { %6027 = vmatprep.subr.bf16.mxu0 %v6716_v15 }
 0x748   :  { %v6609_v10 = vpop.eup %6608 }
 0x749   :  { %v955_v11 = vmul.f32 %v6609_v10, %v6605_v3 }
 0x74b   :  { %v957_v14 = vpack.c.bf16 %v955_v11, %v955_v11 }
 0x74d   :  { %6012 = vmatmul.mubr.msk.bf16.vlgmr.msra.gmra.mrb[24].mxu1 %vm465_vm5, %v957_v14 }
 0x74e   :  { %6022 = vmatpush3.bf16.msra.mxu1 %v6454_v13  ;;  %6023 = vmatprep.mubr.msk.bf16.mxu1 %vm6717_vm1, %v6716_v15 }
 0x74f   :  { %6039 = vmatprep.subr.bf16.mxu1 %v6716_v15 }
 0x755   :  { %6024 = vmatmul.mubr.msk.bf16.vlgmr.msra.gmra.mrb[28].mxu1 %vm368_vm2, %v583_v2 }
 0x756   :  { %6040 = vmatpush3.bf16.msra.mxu1 %v6455_v16  ;;  %6047 = vmatprep.mubr.msk.bf16.mxu1 %vm6717_vm1, %v6716_v15 }
 0x757   :  { %6041 = vmatprep.subr.bf16.mxu1 %v6716_v15 }
 0x75a   :  { %6042 = vmatpush3.bf16.msra.mxu1 %v6456_v18 }
 0x75b   :  { %6043 = vmatprep.subr.bf16.mxu1 %v6716_v15 }
 0x75e   :  { %6044 = vmatpush3.bf16.msra.mxu1 %v6457_v19 }
 0x75f   :  { %6045 = vmatprep.subr.bf16.mxu1 %v6716_v15 }
 0x762   :  { %6046 = vmatpush3.bf16.msra.mxu1 %v6458_v62 }
 0x763   :  { %6063 = vmatprep.subr.bf16.mxu1 %v6716_v15 }
 0x765   :  { %6048 = vmatmul.mubr.msk.bf16.vlgmr.msra.gmra.mrb[32].mxu1 %vm74_vm0, %v6880_v40 }
 0x766   :  { %6065 = vmatprep.mubr.msk.bf16.mxu1 %vm6717_vm1, %v6716_v15 }
 0x818   :  { %v998_v2 = vpop.f32.mrb[24].mxu0 }
 0x819   :  { %v6007_v20 = vpop.f32.mrb[25].mxu0 }
 0x81a   :  { %v1001_v21 = vpop.f32.mrb[26].mxu0 }
 0x81b   :  { %v6008_v22 = vpop.f32.mrb[27].mxu0 }
 0x820   :  { %v1044_v23 = vpop.f32.mrb[24].mxu1 }
 0x821   :  { %v1050_v25 = vpack.c.bf16 %v1044_v23, %v998_v2  ;;  %v6013_v26 = vpop.f32.mrb[25].mxu1 }
 0x822   :  { %v1047_v27 = vpop.f32.mrb[26].mxu1 }
 0x823   :  { %v6014_v28 = vpop.f32.mrb[27].mxu1  ;;  %6018 = vmatmul.mubr.msk.bf16.vlgmr.msra.gmra.mrb[28].mxu0 %vm368_vm2, %v1050_v25 }
 0x824   :  { %6028 = vmatpush3.bf16.msra.mxu0 %v6460_v24  ;;  %6035 = vmatprep.mubr.msk.bf16.mxu0 %vm6717_vm1, %v6716_v15 }
 0x825   :  { %6029 = vmatprep.subr.bf16.mxu0 %v6716_v15 }
 0x828   :  { %6030 = vmatpush3.bf16.msra.mxu0 %v6461_v29  ;;  %v1147_v30 = vpop.f32.mrb[28].mxu1 }
 0x829   :  { %v6025_v32 = vpop.f32.mrb[29].mxu1  ;;  %6031 = vmatprep.subr.bf16.mxu0 %v6716_v15 }
 0x82a   :  { %v1150_v33 = vpop.f32.mrb[30].mxu1 }
 0x82b   :  { %v6026_v34 = vpop.f32.mrb[31].mxu1 }
 0x82c   :  { %6032 = vmatpush3.bf16.msra.mxu0 %v6462_v31 }
 0x82d   :  { %6033 = vmatprep.subr.bf16.mxu0 %v6716_v15 }
 0x830   :  { %6034 = vmatpush3.bf16.msra.mxu0 %v6463_v35 }
 0x831   :  { %6051 = vmatprep.subr.bf16.mxu0 %v6716_v15 }
 0x833   :  { %6036 = vmatmul.mubr.msk.bf16.vlgmr.msra.gmra.mrb[32].mxu0 %vm74_vm0, %v6880_v40 }
 0x834   :  { %6052 = vmatpush3.bf16.msra.mxu0 %v6464_v36  ;;  %6059 = vmatprep.mubr.msk.bf16.mxu0 %vm6717_vm1, %v6716_v15 }
 0x835   :  { %6053 = vmatprep.subr.bf16.mxu0 %v6716_v15 }
 0x838   :  { %v1311_v39 = vpop.f32.mrb[32].mxu1  ;;  %6054 = vmatpush3.bf16.msra.mxu0 %v6465_v37 }
 0x839   :  { %v1312_v42 = vadd.f32 %v5248_v38, %v1311_v39  ;;  %v6049_v43 = vpop.f32.mrb[33].mxu1  ;;  %6055 = vmatprep.subr.bf16.mxu0 %v6716_v15 }
 0x83a   :  { %v1314_v44 = vpop.f32.mrb[34].mxu1 }
 0x83b   :  { %v1402_v45 = vpack.c.bf16 %v1312_v42, %v1312_v42  ;;  %v1315_v46 = vadd.f32 %v5248_v38, %v1314_v44  ;;  %v6050_v47 = vpop.f32.mrb[35].mxu1 }
 0x83c   :  { %6056 = vmatpush3.bf16.msra.mxu0 %v6466_v41 }
 0x83d   :  { %v1410_v49 = vsel %vm368_vm2, %v1402_v45, 0  ;;  %6057 = vmatprep.subr.bf16.mxu0 %v6716_v15  ;;  %v1403_v58 = vpack.c.bf16 %v1315_v46, %v1315_v46 }
 0x83e   :  { %6064 = vmatpush3.bf16.xpose.msra.mxu1 %v1410_v49  ;;  %v6468_v49 = vld [vmem:[%s8001_s23 + $0x60] sm:$0xff]  }
 0x83f   :  { %6069 = vmatprep.subr.bf16.mxu1 %v6716_v15  ;;  %v1456_v3 = vsel %vm368_vm2, %v1403_v58, 0  ;;  %v6474_v58 = vld [vmem:[%s7977_s5 + $0x70] sm:$0xff]  }
 0x840   :  { %6058 = vmatpush3.bf16.msra.mxu0 %v6467_v48 }
 0x841   :  { %6075 = vmatprep.subr.bf16.mxu0 %v6716_v15 }
 0x843   :  { %6060 = vmatmul.mubr.msk.bf16.vlgmr.msra.gmra.mrb[36].mxu0 %vm74_vm0, %v6880_v40 }
 0x844   :  { %6077 = vmatprep.mubr.msk.bf16.mxu0 %vm6717_vm1, %v6716_v15 }
 0x8f6   :  { %v1097_v50 = vpop.f32.mrb[28].mxu0 }
 0x8f7   :  { %v7130_v51 = vadd.f32 %v1147_v30, %v1097_v50  ;;  %v6019_v52 = vpop.f32.mrb[29].mxu0 }
 0x8f8   :  { %v1100_v53 = vpop.f32.mrb[30].mxu0  ;;  %v6469_v52 = vld [vmem:[%s8001_s23 + $0x68] sm:$0xff]  }
 0x8f9   :  { %v7132_v54 = vadd.f32 %v1150_v33, %v1100_v53  ;;  %v6020_v55 = vpop.f32.mrb[31].mxu0  ;;  %v6470_v53 = vld [vmem:[%s8001_s23 + $0x70] sm:$0xff]  }
 0x8fa   :  { %v6471_v55 = vld [vmem:[%s8001_s23 + $0x78] sm:$0xff]  }
 0x906   :  { %v1229_v57 = vpop.f32.mrb[32].mxu0 }
 0x907   :  { %v1230_v59 = vadd.f32 %v5233_v56, %v1229_v57  ;;  %v6037_v60 = vpop.f32.mrb[33].mxu0  ;;  %v6473_v57 = vld [vmem:[%s7977_s5 + $0x68] sm:$0xff]  }
 0x908   :  { %v1232_v61 = vpop.f32.mrb[34].mxu0  ;;  %v6476_v60 = vld [vmem:[%s7981_s9 + $0x10] sm:$0xff]  }
 0x909   :  { %v1400_v63 = vpack.c.bf16 %v1230_v59, %v1230_v59  ;;  %v6038_v0 = vpop.f32.mrb[35].mxu0  ;;  %v1233_v4 = vadd.f32 %v5233_v56, %v1232_v61  ;;  %v6472_v56 = vld [vmem:[%s7977_s5 + $0x60] sm:$0xff]   ;;  %v6475_v59 = vld [vmem:[%s7977_s5 + $0x78] sm:$0xff]  }
 0x90b   :  { %6066 = vmatmul.mubr.msk.bf16.vlgmr.msra.gmra.mrb[36].mxu1 %vm368_vm2, %v1400_v63  ;;  %v1401_v5 = vpack.c.bf16 %v1233_v4, %v1233_v4 }
 0x90c   :  { %6070 = vmatpush3.bf16.xpose.msra.mxu1 %v1456_v3  ;;  %6071 = vmatprep.mubr.msk.bf16.mxu1 %vm6717_vm1, %v6716_v15 }
 0x90d   :  { %6081 = vmatprep.subr.bf16.mxu1 %v6716_v15 }
 0x913   :  { %6072 = vmatmul.mubr.msk.bf16.vlgmr.msra.gmra.mrb[40].mxu1 %vm368_vm2, %v1401_v5  ;;  %v6477_v5 = vld [vmem:[%s7976_s4 + $0x60] sm:$0xff]  }
 0x914   :  { %6083 = vmatprep.mubr.msk.bf16.mxu1 %vm6717_vm1, %v6716_v15 }
 0x916   :  { %v1393_v7 = vpop.f32.mrb[36].mxu0 }
 0x917   :  { %v1394_v8 = vadd.f32 %v5263_v6, %v1393_v7  ;;  %v6061_v9 = vpop.f32.mrb[37].mxu0 }
 0x918   :  { %v1396_v10 = vpop.f32.mrb[38].mxu0 }
 0x919   :  { %v1404_v11 = vpack.c.bf16 %v1394_v8, %v1394_v8  ;;  %v1397_v13 = vadd.f32 %v5263_v6, %v1396_v10  ;;  %v6062_v14 = vpop.f32.mrb[39].mxu0  ;;  %v6478_v10 = vld [vmem:[%s7976_s4 + $0x68] sm:$0xff]  }
 0x91b   :  { %v1530_v16 = vsel %vm493_vm3, %v1404_v11, 0  ;;  %v1405_v18 = vpack.c.bf16 %v1397_v13, %v1397_v13  ;;  %v6479_v11 = vld [vmem:[%s7976_s4 + $0x70] sm:$0xff]   ;;  %v6480_v13 = vld [vmem:[%s7976_s4 + $0x78] sm:$0xff]  }
 0x91c   :  { %6076 = vmatpush3.bf16.msra.mxu0 %v1530_v16 }
 0x91d   :  { %v1576_v19 = vsel %vm493_vm3, %v1405_v18, 0  ;;  %6087 = vmatprep.subr.bf16.mxu0 %v6716_v15 }
 0x91e   :  { %6082 = vmatpush3.bf16.msra.mxu1 %v1576_v19 }
 0x91f   :  { %6093 = vmatprep.subr.bf16.mxu1 %v6716_v15 }
 0x9de   :  { %v1446_v62 = vpop.f32.mrb[36].mxu1 }
 0x9df   :  { %v1498_v1 = vmul.f32 0.25, %v1446_v62  ;;  %v6067_v2 = vpop.f32.mrb[37].mxu1  ;;  %v5316_v62 = vld [vmem:[%s7980_s8 + $0x3] ss:$0 sm:$0xff] }
 0x9e0   :  { %v1449_v20 = vpop.f32.mrb[38].mxu1 }
 0x9e1   :  { %v6068_v21 = vpop.f32.mrb[39].mxu1  ;;  %v1500_v22 = vadd.f32 %v1498_v1, %v6933_v17 }
 0x9e3   :  { %v1502_v23 = vsel %vm465_vm5, %v1500_v22, -inf }
 0x9e4   :  { %1503 = vmax.xlane.f32.xlu0 %v1502_v23 }
 0x9e6   :  { %v1492_v24 = vpop.f32.mrb[40].mxu1 }
 0x9e7   :  { %v1499_v25 = vmul.f32 0.25, %v1492_v24  ;;  %v6073_v26 = vpop.f32.mrb[41].mxu1 }
 0x9e8   :  { %v1495_v27 = vpop.f32.mrb[42].mxu1 }
 0x9e9   :  { %v6074_v28 = vpop.f32.mrb[43].mxu1  ;;  %v1501_v29 = vadd.f32 %v1499_v25, %v6933_v17 }
 0x9eb   :  { %v1505_v30 = vsel %vm465_vm5, %v1501_v29, -inf }
 0x9ec   :  { %1506 = vmax.xlane.f32.xlu1 %v1505_v30 }
 0xa71   :  { %v1504_v31 = vpop.xlane.xlu0 %1503 }
 0xa72   :  { %v1508_v32 = vsub.f32 %v1500_v22, %v1504_v31  ;;  %v5301_v31 = vld [vmem:[%s7979_s7 + $0x3] ss:$0 sm:$0xff] }
 0xa74   :  { %v1510_v33 = vmul.f32 1.442695, %v1508_v32 }
 0xa76   :  { %6610 = vpow2.f32 %v1510_v33 }
 0xa79   :  { %v1507_v34 = vpop.xlane.xlu1 %1506 }
 0xa7a   :  { %v1509_v35 = vsub.f32 %v1501_v29, %v1507_v34 }
 0xa7c   :  { %v1512_v36 = vmul.f32 1.442695, %v1509_v35 }
 0xa7e   :  { %6612 = vpow2.f32 %v1512_v36 }
 0xa80   :  { %v6611_v37 = vpop.eup %6610 }
 0xa81   :  { %v1514_v38 = vsel %vm465_vm5, %v6611_v37, 0.0 }
 0xa82   :  { %1515 = vadd.xlane.f32.xlu0 %v1514_v38 }
 0xa88   :  { %v6613_v39 = vpop.eup %6612 }
 0xa89   :  { %v1517_v41 = vsel %vm465_vm5, %v6613_v39, 0.0 }
 0xa8a   :  { %1518 = vadd.xlane.f32.xlu1 %v1517_v41 }
 0xb0f   :  { %v1516_v42 = vpop.xlane.xlu0 %1515 }
 0xb10   :  { %6614 = vrcp.f32 %v1516_v42 }
 0xb17   :  { %v1519_v43 = vpop.xlane.xlu1 %1518 }
 0xb18   :  { %6616 = vrcp.f32 %v1519_v43 }
 0xb1a   :  { %v6615_v44 = vpop.eup %6614 }
 0xb1b   :  { %v1521_v45 = vmul.f32 %v6615_v44, %v6611_v37 }
 0xb1d   :  { %v1524_v46 = vpack.c.bf16 %v1521_v45, %v1521_v45 }
 0xb1f   :  { %6078 = vmatmul.mubr.msk.bf16.vlgmr.msra.gmra.mrb[40].mxu0 %vm465_vm5, %v1524_v46 }
 0xb20   :  { %6089 = vmatprep.mubr.msk.bf16.mxu0 %vm6717_vm1, %v6716_v15  ;;  %6088 = vmatpush3.bf16.msra.mxu0 %v6476_v60 }
 0xb21   :  { %6105 = vmatprep.subr.bf16.mxu0 %v6716_v15 }
 0xb22   :  { %v6617_v47 = vpop.eup %6616 }
 0xb23   :  { %v1523_v48 = vmul.f32 %v6617_v47, %v6613_v39 }
 0xb25   :  { %v1525_v50 = vpack.c.bf16 %v1523_v48, %v1523_v48 }
 0xb27   :  { %6084 = vmatmul.mubr.msk.bf16.vlgmr.msra.gmra.mrb[44].mxu1 %vm465_vm5, %v1525_v50 }
 0xb28   :  { %6094 = vmatpush3.bf16.msra.mxu1 %v6468_v49  ;;  %6101 = vmatprep.mubr.msk.bf16.mxu1 %vm6717_vm1, %v6716_v15 }
 0xb29   :  { %6095 = vmatprep.subr.bf16.mxu1 %v6716_v15 }
 0xb2c   :  { %6096 = vmatpush3.bf16.msra.mxu1 %v6469_v52 }
 0xb2d   :  { %6097 = vmatprep.subr.bf16.mxu1 %v6716_v15 }
 0xb30   :  { %6098 = vmatpush3.bf16.msra.mxu1 %v6470_v53 }
 0xb31   :  { %6099 = vmatprep.subr.bf16.mxu1 %v6716_v15 }
 0xb34   :  { %6100 = vmatpush3.bf16.msra.mxu1 %v6471_v55 }
 0xb35   :  { %6117 = vmatprep.subr.bf16.mxu1 %v6716_v15 }
 0xb37   :  { %6102 = vmatmul.mubr.msk.bf16.vlgmr.msra.gmra.mrb[48].mxu1 %vm74_vm0, %v6880_v40 }
 0xb38   :  { %6118 = vmatpush3.bf16.msra.mxu1 %v6472_v56  ;;  %6125 = vmatprep.mubr.msk.bf16.mxu1 %vm6717_vm1, %v6716_v15 }
 0xb39   :  { %6119 = vmatprep.subr.bf16.mxu1 %v6716_v15 }
 0xb3c   :  { %6120 = vmatpush3.bf16.msra.mxu1 %v6473_v57 }
 0xb3d   :  { %6121 = vmatprep.subr.bf16.mxu1 %v6716_v15 }
 0xb40   :  { %6122 = vmatpush3.bf16.msra.mxu1 %v6474_v58 }
 0xb41   :  { %6123 = vmatprep.subr.bf16.mxu1 %v6716_v15 }
 0xb44   :  { %6124 = vmatpush3.bf16.msra.mxu1 %v6475_v59 }
 0xb45   :  { %6141 = vmatprep.subr.bf16.mxu1 %v6716_v15 }
 0xb47   :  { %6126 = vmatmul.mubr.msk.bf16.vlgmr.msra.gmra.mrb[52].mxu1 %vm74_vm0, %v6880_v40 }
 0xb48   :  { %6143 = vmatprep.mubr.msk.bf16.mxu1 %vm6717_vm1, %v6716_v15 }
 0xbf2   :  { %v1566_v61 = vpop.f32.mrb[40].mxu0 }
 0xbf3   :  { %v6079_v63 = vpop.f32.mrb[41].mxu0 }
 0xbf4   :  { %v1569_v0 = vpop.f32.mrb[42].mxu0 }
 0xbf5   :  { %v6080_v3 = vpop.f32.mrb[43].mxu0 }
 0xbfa   :  { %v1612_v4 = vpop.f32.mrb[44].mxu1 }
 0xbfb   :  { %v1618_v6 = vpack.c.bf16 %v1612_v4, %v1566_v61  ;;  %v6085_v7 = vpop.f32.mrb[45].mxu1 }
 0xbfc   :  { %v1615_v8 = vpop.f32.mrb[46].mxu1 }
 0xbfd   :  { %v6086_v9 = vpop.f32.mrb[47].mxu1  ;;  %6090 = vmatmul.mubr.msk.bf16.vlgmr.msra.gmra.mrb[44].mxu0 %vm368_vm2, %v1618_v6 }
 0xbfe   :  { %6106 = vmatpush3.bf16.msra.mxu0 %v6477_v5  ;;  %6113 = vmatprep.mubr.msk.bf16.mxu0 %vm6717_vm1, %v6716_v15 }
 0xbff   :  { %6107 = vmatprep.subr.bf16.mxu0 %v6716_v15 }
 0xc02   :  { %6108 = vmatpush3.bf16.msra.mxu0 %v6478_v10 }
 0xc03   :  { %6109 = vmatprep.subr.bf16.mxu0 %v6716_v15 }
 0xc06   :  { %6110 = vmatpush3.bf16.msra.mxu0 %v6479_v11 }
 0xc07   :  { %6111 = vmatprep.subr.bf16.mxu0 %v6716_v15 }
 0xc0a   :  { %v1749_v14 = vpop.f32.mrb[48].mxu1  ;;  %6112 = vmatpush3.bf16.msra.mxu0 %v6480_v13 }
 0xc0b   :  { %v6103_v16 = vpop.f32.mrb[49].mxu1  ;;  %6129 = vmatprep.subr.bf16.mxu0 %v6716_v15 }
 0xc0c   :  { %v1752_v18 = vpop.f32.mrb[50].mxu1 }
 0xc0d   :  { %v6104_v19 = vpop.f32.mrb[51].mxu1  ;;  %6114 = vmatmul.mubr.msk.bf16.vlgmr.msra.gmra.mrb[48].mxu0 %vm74_vm0, %v6880_v40 }
 0xc0e   :  { %6131 = vmatprep.mubr.msk.bf16.mxu0 %vm6717_vm1, %v6716_v15 }
 0xc1a   :  { %v1913_v1 = vpop.f32.mrb[52].mxu1 }
 0xc1b   :  { %v1914_v2 = vadd.f32 %v5316_v62, %v1913_v1  ;;  %v6127_v20 = vpop.f32.mrb[53].mxu1 }
 0xc1c   :  { %v1916_v21 = vpop.f32.mrb[54].mxu1 }
 0xc1d   :  { %v1924_v22 = vpack.c.bf16 %v1914_v2, %v1914_v2  ;;  %v1917_v23 = vadd.f32 %v5316_v62, %v1916_v21  ;;  %v6128_v24 = vpop.f32.mrb[55].mxu1  ;;  %v6481_v21 = vld [vmem:[%s7981_s9 + $0x18] sm:$0xff]  }
 0xc1f   :  { %v2050_v25 = vsel %vm493_vm3, %v1924_v22, 0  ;;  %v1925_v45 = vpack.c.bf16 %v1917_v23, %v1917_v23 }
 0xc20   :  { %6142 = vmatpush3.bf16.msra.mxu1 %v2050_v25 }
 0xc21   :  { %6153 = vmatprep.subr.bf16.mxu1 %v6716_v15  ;;  %v2096_v47 = vsel %vm493_vm3, %v1925_v45, 0 }
 0xcd0   :  { %v1665_v40 = vpop.f32.mrb[44].mxu0 }
 0xcd1   :  { %v7237_v26 = vadd.f32 %v1665_v40, %v7130_v51  ;;  %v6091_v27 = vpop.f32.mrb[45].mxu0  ;;  %v5286_v51 = vld [vmem:[%s7978_s6 + $0x3] ss:$0 sm:$0xff] }
 0xcd2   :  { %v1668_v28 = vpop.f32.mrb[46].mxu0  ;;  %v1753_v44 = vadd.f32 %v5286_v51, %v1752_v18 }
 0xcd3   :  { %v7240_v29 = vadd.f32 %v1668_v28, %v7132_v54  ;;  %v6092_v30 = vpop.f32.mrb[47].mxu0  ;;  %v1750_v54 = vadd.f32 %v5286_v51, %v1749_v14 }
 0xcd4   :  { %v1921_v46 = vpack.c.bf16 %v1753_v44, %v1753_v44 }
 0xcd5   :  { %v1920_v42 = vpack.c.bf16 %v1750_v54, %v1750_v54 }
 0xce0   :  { %v1831_v32 = vpop.f32.mrb[48].mxu0 }
 0xce1   :  { %v1832_v33 = vadd.f32 %v5301_v31, %v1831_v32  ;;  %v6115_v34 = vpop.f32.mrb[49].mxu0 }
 0xce2   :  { %v1834_v35 = vpop.f32.mrb[50].mxu0 }
 0xce3   :  { %v1922_v36 = vpack.c.bf16 %v1832_v33, %v1832_v33  ;;  %v6116_v37 = vpop.f32.mrb[51].mxu0  ;;  %v1835_v39 = vadd.f32 %v5301_v31, %v1834_v35  ;;  %v5330_v35 = vld [vmem:[%s7982_s10] ss:$0 sm:$0xff] }
 0xce4   :  { %v6690_v37 = vld [vmem:[%s8000_s20] sm:$0xff] }
 0xce5   :  { %v1930_v38 = vsel %vm368_vm2, %v1922_v36, 0  ;;  %v1923_v41 = vpack.c.bf16 %v1835_v39, %v1835_v39 }
 0xce6   :  { %6130 = vmatpush3.bf16.xpose.msra.mxu0 %v1930_v38 }
 0xce7   :  { %6135 = vmatprep.subr.bf16.mxu0 %v6716_v15  ;;  %v1976_v43 = vsel %vm368_vm2, %v1923_v41, 0 }
 0xced   :  { %6132 = vmatmul.mubr.msk.bf16.vlgmr.msra.gmra.mrb[52].mxu0 %vm368_vm2, %v1920_v42 }
 0xcee   :  { %6136 = vmatpush3.bf16.xpose.msra.mxu0 %v1976_v43  ;;  %6137 = vmatprep.mubr.msk.bf16.mxu0 %vm6717_vm1, %v6716_v15 }
 0xcef   :  { %6147 = vmatprep.subr.bf16.mxu0 %v6716_v15 }
 0xcf5   :  { %6138 = vmatmul.mubr.msk.bf16.vlgmr.msra.gmra.mrb[56].mxu0 %vm368_vm2, %v1921_v46 }
 0xcf6   :  { %6148 = vmatpush3.bf16.msra.mxu0 %v2096_v47  ;;  %6149 = vmatprep.mubr.msk.bf16.mxu0 %vm6717_vm1, %v6716_v15 }
 0xdc0   :  { %v1966_v48 = vpop.f32.mrb[52].mxu0 }
 0xdc1   :  { %v2018_v49 = vmul.f32 0.25, %v1966_v48  ;;  %v6133_v50 = vpop.f32.mrb[53].mxu0 }
 0xdc2   :  { %v1969_v52 = vpop.f32.mrb[54].mxu0 }
 0xdc3   :  { %v6134_v53 = vpop.f32.mrb[55].mxu0  ;;  %v2020_v55 = vadd.f32 %v2018_v49, %v6933_v17 }
 0xdc5   :  { %v2022_v56 = vsel %vm465_vm5, %v2020_v55, -inf }
 0xdc6   :  { %2023 = vmax.xlane.f32.xlu0 %v2022_v56  ;;  %v6484_v56 = vld [vmem:[%s7985_s13 + $0x4] ss:$8 sps:$4 sm:$0xff]  }
 0xdc7   :  { %2313 = vmatprep.subr.bf16.mxu0 %v6484_v56 }
 0xdc8   :  { %v2012_v57 = vpop.f32.mrb[56].mxu0 }
 0xdc9   :  { %v2019_v58 = vmul.f32 0.25, %v2012_v57  ;;  %v6139_v59 = vpop.f32.mrb[57].mxu0  ;;  %v6482_v57 = vld [vmem:[%s7985_s13] ss:$8 sps:$4 sm:$0xff]  }
 0xdca   :  { %v2015_v60 = vpop.f32.mrb[58].mxu0  ;;  %v6485_v59 = vld [vmem:[%s7985_s13 + $0x10] ss:$8 sps:$4 sm:$0xff]  }
 0xdcb   :  { %v6140_v61 = vpop.f32.mrb[59].mxu0  ;;  %v2021_v63 = vadd.f32 %v2019_v58, %v6933_v17  ;;  %v6487_v58 = vld [vmem:[%s7985_s13 + $0x14] ss:$8 sps:$4 sm:$0xff]   ;;  %v6490_v60 = vld [vmem:[%s7985_s13 + $0x24] ss:$8 sps:$4 sm:$0xff]  }
 0xdcc   :  { %v6488_v61 = vld [vmem:[%s7985_s13 + $0x20] ss:$8 sps:$4 sm:$0xff]  }
 0xdcd   :  { %v2025_v0 = vsel %vm465_vm5, %v2021_v63, -inf }
 0xdce   :  { %2026 = vmax.xlane.f32.xlu1 %v2025_v0  ;;  %v6493_v0 = vld [vmem:[%s7985_s13 + $0x34] ss:$8 sps:$4 sm:$0xff]  }
 0xe53   :  { %v2024_v3 = vpop.xlane.xlu0 %2023 }
 0xe54   :  { %v2028_v4 = vsub.f32 %v2020_v55, %v2024_v3  ;;  %v6719_v3 = vmov 0  }
 0xe56   :  { %v2030_v5 = vmul.f32 1.442695, %v2028_v4 }
 0xe58   :  { %6618 = vpow2.f32 %v2030_v5 }
 0xe5b   :  { %v2027_v6 = vpop.xlane.xlu1 %2026 }
 0xe5c   :  { %v2029_v7 = vsub.f32 %v2021_v63, %v2027_v6  ;;  %v6491_v63 = vld [vmem:[%s7985_s13 + $0x30] ss:$8 sps:$4 sm:$0xff]  }
 0xe5e   :  { %v2032_v8 = vmul.f32 1.442695, %v2029_v7 }
 0xe60   :  { %6620 = vpow2.f32 %v2032_v8 }
 0xe62   :  { %v6619_v9 = vpop.eup %6618 }
 0xe63   :  { %v2034_v10 = vsel %vm465_vm5, %v6619_v9, 0.0 }
 0xe64   :  { %2035 = vadd.xlane.f32.xlu0 %v2034_v10 }
 0xe6a   :  { %v6621_v11 = vpop.eup %6620 }
 0xe6b   :  { %v2037_v13 = vsel %vm465_vm5, %v6621_v11, 0.0 }
 0xe6c   :  { %2038 = vadd.xlane.f32.xlu1 %v2037_v13 }
 0xef1   :  { %v2036_v14 = vpop.xlane.xlu0 %2035 }
 0xef2   :  { %6622 = vrcp.f32 %v2036_v14 }
 0xef9   :  { %v2039_v16 = vpop.xlane.xlu1 %2038 }
 0xefa   :  { %6624 = vrcp.f32 %v2039_v16 }
 0xefc   :  { %v6623_v18 = vpop.eup %6622 }
 0xefd   :  { %v2041_v19 = vmul.f32 %v6623_v18, %v6619_v9 }
 0xeff   :  { %v2044_v62 = vpack.c.bf16 %v2041_v19, %v2041_v19  ;;  %v5332_v19 = vld [vmem:[%s7984_s12] ss:$0 sm:$0xff] }
 0xf01   :  { %6144 = vmatmul.mubr.msk.bf16.vlgmr.msra.gmra.mrb[56].mxu1 %vm465_vm5, %v2044_v62 }
 0xf02   :  { %6155 = vmatprep.mubr.msk.bf16.mxu1 %vm6717_vm1, %v6716_v15  ;;  %6154 = vmatpush3.bf16.msra.mxu1 %v6481_v21  ;;  %v6494_v21 = vld [vmem:[%s7987_s15 + $0x40] sm:$0xff]  }
 0xf03   :  { %5751 = vmatprep.subr.bf16.mxu1 %v6494_v21 }
 0xf04   :  { %v6625_v1 = vpop.eup %6624 }
 0xf05   :  { %v2043_v2 = vmul.f32 %v6625_v1, %v6621_v11  ;;  %v5331_v11 = vld [vmem:[%s7983_s11] ss:$0 sm:$0xff] }
 0xf07   :  { %v2045_v20 = vpack.c.bf16 %v2043_v2, %v2043_v2 }
 0xf09   :  { %6150 = vmatmul.mubr.msk.bf16.vlgmr.msra.gmra.mrb[60].mxu0 %vm465_vm5, %v2045_v20 }
 0xf0a   :  { %2314 = vmatpush1.bf16.msra.mxu0 %v6482_v57  ;;  %2345 = vmatprep.mubr.bf16.mxu0 %v6719_v3 }
 0xf0b   :  { %2315 = vmatprep.subr.bf16.mxu0 %v6487_v58 }
 0xf0e   :  { %2316 = vmatpush1.bf16.msra.mxu0 %v6485_v59 }
 0xf0f   :  { %2317 = vmatprep.subr.bf16.mxu0 %v6490_v60 }
 0xf12   :  { %2318 = vmatpush1.bf16.msra.mxu0 %v6488_v61 }
 0xf13   :  { %2319 = vmatprep.subr.bf16.mxu0 %v6493_v0 }
 0xf16   :  { %2320 = vmatpush1.bf16.msra.mxu0 %v6491_v63 }
 0xf17   :  { %6159 = vmatprep.subr.bf16.mxu0 %v6716_v15 }
 0xfd4   :  { %v2086_v22 = vpop.f32.mrb[56].mxu1 }
 0xfd5   :  { %v6145_v23 = vpop.f32.mrb[57].mxu1 }
 0xfd6   :  { %v2089_v24 = vpop.f32.mrb[58].mxu1  ;;  %v6496_v23 = vld [vmem:[%s7987_s15 + $0x48] sm:$0xff]  }
 0xfd7   :  { %v6146_v25 = vpop.f32.mrb[59].mxu1  ;;  %v6497_v24 = vld [vmem:[%s7987_s15 + $0x8] sm:$0xff]  }
 0xfd8   :  { %v6498_v25 = vld [vmem:[%s7987_s15 + $0x50] sm:$0xff]  }
 0xfdc   :  { %v2132_v40 = vpop.f32.mrb[60].mxu0 }
 0xfdd   :  { %v2138_v27 = vpack.c.bf16 %v2132_v40, %v2086_v22  ;;  %v6151_v28 = vpop.f32.mrb[61].mxu0  ;;  %v6495_v22 = vld [vmem:[%s7987_s15] sm:$0xff]   ;;  %v6499_v40 = vld [vmem:[%s7987_s15 + $0x10] sm:$0xff]  }
 0xfde   :  { %v2135_v30 = vpop.f32.mrb[62].mxu0  ;;  %v6501_v28 = vld [vmem:[%s7987_s15 + $0x18] sm:$0xff]  }
 0xfdf   :  { %v6152_v31 = vpop.f32.mrb[63].mxu0  ;;  %6156 = vmatmul.mubr.msk.bf16.vlgmr.msra.gmra.mrb[60].mxu1 %vm368_vm2, %v2138_v27  ;;  %v6500_v27 = vld [vmem:[%s7987_s15 + $0x58] sm:$0xff]   ;;  %v6502_v30 = vld [vmem:[%s7987_s15 + $0x60] sm:$0xff]  }
 0xfe0   :  { %5752 = vmatpush3.bf16.msra.mxu1 %v6495_v22  ;;  %v6503_v31 = vld [vmem:[%s7987_s15 + $0x20] sm:$0xff]  }
 0xfe1   :  { %5753 = vmatprep.subr.bf16.mxu1 %v6496_v23 }
 0xfe4   :  { %5754 = vmatpush3.bf16.msra.mxu1 %v6497_v24 }
 0xfe5   :  { %5755 = vmatprep.subr.bf16.mxu1 %v6498_v25 }
 0xfe8   :  { %5756 = vmatpush3.bf16.msra.mxu1 %v6499_v40 }
 0xfe9   :  { %5757 = vmatprep.subr.bf16.mxu1 %v6500_v27 }
 0xfec   :  { %5758 = vmatpush3.bf16.msra.mxu1 %v6501_v28 }
 0xfed   :  { %5759 = vmatprep.subr.bf16.mxu1 %v6502_v30 }
 0xff0   :  { %5760 = vmatpush3.bf16.msra.mxu1 %v6503_v31 }
0x10b2   :  { %v2185_v32 = vpop.f32.mrb[60].mxu1 }
0x10b3   :  { %v2192_v33 = vadd.f32 %v2185_v32, %v7237_v26  ;;  %v6157_v34 = vpop.f32.mrb[61].mxu1  ;;  %v6691_v26 = vld [vmem:[%s8000_s20 + $0x8] sm:$0xff] }
0x10b4   :  { %v2188_v36 = vpop.f32.mrb[62].mxu1  ;;  %v6504_v32 = vld [vmem:[%s7987_s15 + $0x68] sm:$0xff]   ;;  %v6506_v34 = vld [vmem:[%s7987_s15 + $0x70] sm:$0xff]  }
0x10b5   :  { %v2194_v51 = vadd.f32 %v6690_v37, %v2192_v33  ;;  %v2193_v38 = vadd.f32 %v2188_v36, %v7240_v29  ;;  %v6158_v39 = vpop.f32.mrb[63].mxu1  ;;  %v6505_v33 = vld [vmem:[%s7987_s15 + $0x28] sm:$0xff]   ;;  %5761 = vmatprep.subr.bf16.mxu1 %v6504_v32  ;;  %v6508_v36 = vld [vmem:[%s7987_s15 + $0x78] sm:$0xff]   ;;  %v5342_v32 = vld [vmem:[%s7988_s16] ss:$0 sm:$0xff] }
0x10b6   :  { %5762 = vmatpush3.bf16.msra.mxu1 %v6505_v33  ;;  %v6509_v37 = vld [vmem:[%s7987_s15 + $0x38] sm:$0xff]   ;;  %v2266_v39 = vsub.s32 1, %v6930_v12 }
0x10b7   :  { %v7281_v54 = vadd.f32 %v5330_v35, %v2194_v51  ;;  %v2195_v41 = vadd.f32 %v6691_v26, %v2193_v38  ;;  %5763 = vmatprep.subr.bf16.mxu1 %v6506_v34  ;;  %v2262_v51 = vsub.s32 0, %v6930_v12  ;;  %v2258_v38 = vld [vmem:[%s7986_s14] sm:$0x3] }
0x10b9   :  { %v7286_v42 = vadd.f32 %v5330_v35, %v2195_v41  ;;  %v2207_v43 = vsel %vm74_vm0, %v7281_v54, 0.0  ;;  %v6507_v35 = vld [vmem:[%s7987_s15 + $0x30] sm:$0xff]   ;;  %v2263_v26 = vrot.slane %v2258_v38, %v2262_v51  ;;  %v2267_v41 = vrot.slane %v2258_v38, %v2266_v39 }
0x10ba   :  { %2208 = vadd.xlane.f32.xlu0 %v2207_v43  ;;  %5764 = vmatpush3.bf16.msra.mxu1 %v6507_v35 }
0x10bb   :  { %v2210_v44 = vsel %vm74_vm0, %v7286_v42, 0.0  ;;  %5765 = vmatprep.subr.bf16.mxu1 %v6508_v36 }
0x10bc   :  { %2211 = vadd.xlane.f32.xlu1 %v2210_v44 }
0x10be   :  { %5766 = vmatpush3.bf16.msra.mxu1 %v6509_v37 }
0x10bf   :  { %6183 = vmatprep.subr.bf16.mxu1 %v6716_v15 }
0x1147   :  { %v2209_v45 = vpop.xlane.xlu0 %2208 }
0x1148   :  { %v2213_v29 = vmul.f32 0.015625, %v2209_v45 }
0x1149   :  { %v2212_v46 = vpop.xlane.xlu1 %2211 }
0x114a   :  { %v2215_v47 = vsub.f32 %v7281_v54, %v2213_v29  ;;  %v2214_v48 = vmul.f32 0.015625, %v2212_v46 }
0x114c   :  { %v2216_v49 = vsub.f32 %v7286_v42, %v2214_v48  ;;  %v2217_v50 = vmul.f32 %v2215_v47, %v2215_v47 }
0x114e   :  { %v2219_v52 = vsel %vm74_vm0, %v2217_v50, 0.0  ;;  %v2218_v53 = vmul.f32 %v2216_v49, %v2216_v49 }
0x114f   :  { %2220 = vadd.xlane.f32.xlu0 %v2219_v52 }
0x1150   :  { %v2222_v55 = vsel %vm74_vm0, %v2218_v53, 0.0 }
0x1151   :  { %2223 = vadd.xlane.f32.xlu1 %v2222_v55 }
0x11dc   :  { %v2221_v4 = vpop.xlane.xlu0 %2220 }
0x11dd   :  { %v2225_v5 = vmul.f32 0.015625, %v2221_v4 }
0x11de   :  { %v2224_v6 = vpop.xlane.xlu1 %2223 }
0x11df   :  { %v2227_v7 = vadd.f32 1e-05, %v2225_v5  ;;  %v2226_v8 = vmul.f32 0.015625, %v2224_v6 }
0x11e1   :  { %6626 = vrsqrt.f32 %v2227_v7  ;;  %v2228_v9 = vadd.f32 1e-05, %v2226_v8 }
0x11e3   :  { %6628 = vrsqrt.f32 %v2228_v9 }
0x11eb   :  { %v6627_v10 = vpop.eup %6626 }
0x11ec   :  { %v2231_v13 = vmul.f32 %v6627_v10, %v2215_v47 }
0x11ed   :  { %v6629_v14 = vpop.eup %6628 }
0x11ee   :  { %v2239_v16 = vmul.f32 %v5331_v11, %v2231_v13  ;;  %v2232_v18 = vmul.f32 %v6629_v14, %v2216_v49 }
0x11f0   :  { %v2240_v62 = vmul.f32 %v5331_v11, %v2232_v18  ;;  %v2247_v1 = vadd.f32 %v5332_v19, %v2239_v16 }
0x11f2   :  { %v2248_v2 = vadd.f32 %v5332_v19, %v2240_v62 }
0x11f4   :  { %v2249_v20 = vpack.c.bf16 %v2248_v2, %v2247_v1 }
0x11f6   :  { %5341 = vmatmul.mubr.msk.bf16.vlgmr.msra.gmra.mrb[64].mxu0 %vm74_vm0, %v2249_v20 }
0x11f7   :  { %6167 = vmatprep.mubr.msk.bf16.mxu0 %vm6717_vm1, %v6716_v15 }
0x12c9   :  { %v2347_v43 = vpop.f32.mrb[64].mxu0 }
0x12ca   :  { %v2348_v44 = vadd.f32 %v2347_v43, %v2263_v26  ;;  %v2349_v45 = vpop.f32.mrb[65].mxu0 }
0x12cb   :  { %v2350_v29 = vadd.f32 %v2349_v45, %v2267_v41  ;;  %v2351_v46 = vpop.f32.mrb[66].mxu0 }
0x12cc   :  { %v2360_v47 = vmul.f32 0.044715, %v2348_v44  ;;  %v2352_v48 = vadd.f32 %v2351_v46, %v2263_v26  ;;  %v2353_v49 = vpop.f32.mrb[67].mxu0  ;;  %v2356_v1 = vmul.f32 0.5, %v2348_v44 }
0x12cd   :  { %v2361_v50 = vmul.f32 0.044715, %v2350_v29  ;;  %v2354_v52 = vadd.f32 %v2353_v49, %v2267_v41  ;;  %v2357_v21 = vmul.f32 0.5, %v2350_v29 }
0x12ce   :  { %v2364_v53 = vmul.f32 %v2360_v47, %v2348_v44  ;;  %v2362_v55 = vmul.f32 0.044715, %v2352_v48  ;;  %v2358_v2 = vmul.f32 0.5, %v2352_v48 }
0x12cf   :  { %v2365_v56 = vmul.f32 %v2361_v50, %v2350_v29  ;;  %v2363_v57 = vmul.f32 0.044715, %v2354_v52  ;;  %v2359_v22 = vmul.f32 0.5, %v2354_v52 }
0x12d0   :  { %v2368_v58 = vmul.f32 %v2364_v53, %v2348_v44  ;;  %v2366_v59 = vmul.f32 %v2362_v55, %v2352_v48  ;;  %v6510_v55 = vld [vmem:[%s8001_s23 + $0x80] sm:$0xff]  }
0x12d1   :  { %v2369_v60 = vmul.f32 %v2365_v56, %v2350_v29  ;;  %v2367_v61 = vmul.f32 %v2363_v57, %v2354_v52  ;;  %v6511_v56 = vld [vmem:[%s7977_s5 + $0x80] sm:$0xff]   ;;  %6160 = vmatpush3.bf16.msra.mxu0 %v6510_v55  ;;  %v6512_v57 = vld [vmem:[%s8001_s23 + $0x88] sm:$0xff]  }
0x12d2   :  { %v2372_v63 = vadd.f32 %v2368_v58, %v2348_v44  ;;  %v2370_v0 = vmul.f32 %v2366_v59, %v2352_v48  ;;  %6161 = vmatprep.subr.bf16.mxu0 %v6716_v15  ;;  %v6513_v58 = vld [vmem:[%s7977_s5 + $0x88] sm:$0xff]   ;;  %v6514_v59 = vld [vmem:[%s8001_s23 + $0x90] sm:$0xff]  }
0x12d3   :  { %v2371_v4 = vmul.f32 %v2367_v61, %v2354_v52  ;;  %v2373_v5 = vadd.f32 %v2369_v60, %v2350_v29  ;;  %v6515_v60 = vld [vmem:[%s7977_s5 + $0x90] sm:$0xff]   ;;  %v6516_v61 = vld [vmem:[%s8001_s23 + $0x98] sm:$0xff]  }
0x12d4   :  { %v2376_v6 = vmul.f32 0.7978846, %v2372_v63  ;;  %v2374_v7 = vadd.f32 %v2370_v0, %v2352_v48  ;;  %v6517_v63 = vld [vmem:[%s7977_s5 + $0x98] sm:$0xff]  }
0x12d5   :  { %v2375_v8 = vadd.f32 %v2371_v4, %v2354_v52  ;;  %v2377_v9 = vmul.f32 0.7978846, %v2373_v5  ;;  %6162 = vmatpush3.bf16.msra.mxu0 %v6512_v57 }
0x12d6   :  { %6630 = vtanh.f32 %v2376_v6  ;;  %v2378_v10 = vmul.f32 0.7978846, %v2374_v7  ;;  %6163 = vmatprep.subr.bf16.mxu0 %v6716_v15 }
0x12d7   :  { %v2379_v11 = vmul.f32 0.7978846, %v2375_v8  ;;  %6632 = vtanh.f32 %v2377_v9 }
0x12d8   :  { %6634 = vtanh.f32 %v2378_v10  ;;  %v5361_v10 = vld [vmem:[%s8002_s26 + $0x1] ss:$0 sm:$0xff] }
0x12d9   :  { %6636 = vtanh.f32 %v2379_v11  ;;  %6164 = vmatpush3.bf16.msra.mxu0 %v6514_v59 }
0x12da   :  { %6165 = vmatprep.subr.bf16.mxu0 %v6716_v15 }
0x12dd   :  { %6166 = vmatpush3.bf16.msra.mxu0 %v6516_v61 }
0x12de   :  { %6171 = vmatprep.subr.bf16.mxu0 %v6716_v15 }
0x12e0   :  { %v6631_v13 = vpop.eup %6630 }
0x12e1   :  { %v6633_v14 = vpop.eup %6632  ;;  %v2384_v16 = vadd.f32 1.0, %v6631_v13 }
0x12e2   :  { %v6635_v18 = vpop.eup %6634  ;;  %v2385_v19 = vadd.f32 1.0, %v6633_v14 }
0x12e3   :  { %v6637_v62 = vpop.eup %6636  ;;  %v2386_v20 = vadd.f32 1.0, %v6635_v18  ;;  %v2388_v24 = vmul.f32 %v2384_v16, %v2356_v1  ;;  %v5362_v18 = vld [vmem:[%s8003_s29 + $0x1] ss:$0 sm:$0xff] }
0x12e4   :  { %v2387_v23 = vadd.f32 1.0, %v6637_v62  ;;  %v2389_v40 = vmul.f32 %v2385_v19, %v2357_v21  ;;  %v6519_v21 = vld [vmem:[%s7976_s4 + $0x88] sm:$0xff]  }
0x12e5   :  { %v2390_v25 = vmul.f32 %v2386_v20, %v2358_v2  ;;  %v6518_v2 = vld [vmem:[%s7976_s4 + $0x80] sm:$0xff]  }
0x12e6   :  { %v2391_v27 = vmul.f32 %v2387_v23, %v2359_v22  ;;  %v6520_v22 = vld [vmem:[%s7976_s4 + $0x90] sm:$0xff]   ;;  %v6521_v23 = vld [vmem:[%s7976_s4 + $0x98] sm:$0xff]  }
0x12e7   :  { %v2392_v28 = vpack.c.bf16 %v2390_v25, %v2388_v24 }
0x12e8   :  { %v2393_v30 = vpack.c.bf16 %v2391_v27, %v2389_v40 }
0x12ea   :  { %2561 = vmatprep.mubr.bf16.mxu1 %v2393_v30 }
0x12eb   :  { %2562 = vmatmul.mubr.bf16.vlgmr.msra.gmra.mrb[64].mxu1 %v2392_v28 }
0x12ec   :  { %6191 = vmatprep.mubr.msk.bf16.mxu1 %vm6717_vm1, %v6716_v15  ;;  %6184 = vmatpush3.bf16.msra.mxu1 %v6511_v56 }
0x12ed   :  { %6185 = vmatprep.subr.bf16.mxu1 %v6716_v15 }
0x12f0   :  { %6186 = vmatpush3.bf16.msra.mxu1 %v6513_v58 }
0x12f1   :  { %6187 = vmatprep.subr.bf16.mxu1 %v6716_v15 }
0x12f4   :  { %6188 = vmatpush3.bf16.msra.mxu1 %v6515_v60 }
0x12f5   :  { %6189 = vmatprep.subr.bf16.mxu1 %v6716_v15 }
0x12f8   :  { %6190 = vmatpush3.bf16.msra.mxu1 %v6517_v63 }
0x12f9   :  { %6201 = vmatprep.subr.bf16.mxu1 %v6716_v15 }
0x13be   :  { %v5767_v31 = vpop.f32.mrb[64].mxu1 }
0x13bf   :  { %v5768_v33 = vpop.f32.mrb[65].mxu1 }
0x13c0   :  { %v5769_v34 = vadd.f32 %v5768_v33, %v5767_v31  ;;  %v5770_v35 = vpop.f32.mrb[66].mxu1  ;;  %v5387_v33 = vld [vmem:[%s7979_s7 + $0x4] ss:$0 sm:$0xff] }
0x13c1   :  { %v5771_v36 = vpop.f32.mrb[67].mxu1 }
0x13c2   :  { %v2564_v37 = vadd.f32 %v5769_v34, %v5342_v32  ;;  %v5772_v38 = vadd.f32 %v5771_v36, %v5770_v35 }
0x13c4   :  { %v7395_v26 = vadd.f32 %v2564_v37, %v7281_v54  ;;  %v2567_v41 = vadd.f32 %v5772_v38, %v5342_v32  ;;  %v5402_v37 = vld [vmem:[%s7980_s8 + $0x4] ss:$0 sm:$0xff] }
0x13c6   :  { %v7398_v43 = vadd.f32 %v2567_v41, %v7286_v42  ;;  %v2576_v44 = vsel %vm74_vm0, %v7395_v26, 0.0 }
0x13c7   :  { %2577 = vadd.xlane.f32.xlu0 %v2576_v44 }
0x13c8   :  { %v2579_v45 = vsel %vm74_vm0, %v7398_v43, 0.0 }
0x13c9   :  { %2580 = vadd.xlane.f32.xlu1 %v2579_v45 }
0x1454   :  { %v2578_v29 = vpop.xlane.xlu0 %2577 }
0x1455   :  { %v2582_v46 = vmul.f32 0.015625, %v2578_v29  ;;  %v5372_v29 = vld [vmem:[%s7978_s6 + $0x4] ss:$0 sm:$0xff] }
0x1456   :  { %v2581_v47 = vpop.xlane.xlu1 %2580 }
0x1457   :  { %v2584_v48 = vsub.f32 %v7395_v26, %v2582_v46  ;;  %v2583_v49 = vmul.f32 0.015625, %v2581_v47 }
0x1459   :  { %v2585_v54 = vsub.f32 %v7398_v43, %v2583_v49  ;;  %v2586_v50 = vmul.f32 %v2584_v48, %v2584_v48 }
0x145b   :  { %v2588_v42 = vsel %vm74_vm0, %v2586_v50, 0.0  ;;  %v2587_v52 = vmul.f32 %v2585_v54, %v2585_v54 }
0x145c   :  { %2589 = vadd.xlane.f32.xlu0 %v2588_v42 }
0x145d   :  { %v2591_v53 = vsel %vm74_vm0, %v2587_v52, 0.0 }
0x145e   :  { %2592 = vadd.xlane.f32.xlu1 %v2591_v53 }
0x14e9   :  { %v2590_v0 = vpop.xlane.xlu0 %2589 }
0x14ea   :  { %v2594_v4 = vmul.f32 0.015625, %v2590_v0 }
0x14eb   :  { %v2593_v5 = vpop.xlane.xlu1 %2592 }
0x14ec   :  { %v2596_v6 = vadd.f32 1e-05, %v2594_v4  ;;  %v2595_v7 = vmul.f32 0.015625, %v2593_v5 }
0x14ee   :  { %6638 = vrsqrt.f32 %v2596_v6  ;;  %v2597_v8 = vadd.f32 1e-05, %v2595_v7 }
0x14f0   :  { %6640 = vrsqrt.f32 %v2597_v8 }
0x14f8   :  { %v6639_v9 = vpop.eup %6638 }
0x14f9   :  { %v2600_v11 = vmul.f32 %v6639_v9, %v2584_v48 }
0x14fa   :  { %v6641_v13 = vpop.eup %6640 }
0x14fb   :  { %v2608_v14 = vmul.f32 %v5361_v10, %v2600_v11  ;;  %v2601_v16 = vmul.f32 %v6641_v13, %v2585_v54 }
0x14fd   :  { %v2609_v19 = vmul.f32 %v5361_v10, %v2601_v16  ;;  %v2616_v62 = vadd.f32 %v5362_v18, %v2608_v14 }
0x14ff   :  { %v2617_v1 = vadd.f32 %v5362_v18, %v2609_v19 }
0x1501   :  { %v7449_v20 = vpack.c.bf16 %v2617_v1, %v2616_v62 }
0x1503   :  { %6168 = vmatmul.mubr.msk.bf16.vlgmr.msra.gmra.mrb[68].mxu0 %vm74_vm0, %v7449_v20  ;;  %6192 = vmatmul.mubr.msk.bf16.vlgmr.msra.gmra.mrb[68].mxu1 %vm74_vm0, %v7449_v20 }
0x1504   :  { %6172 = vmatpush3.bf16.msra.mxu0 %v6518_v2  ;;  %6179 = vmatprep.mubr.msk.bf16.mxu0 %vm6717_vm1, %v6716_v15 }
0x1505   :  { %6173 = vmatprep.subr.bf16.mxu0 %v6716_v15  ;;  %6203 = vmatprep.mubr.msk.bf16.mxu1 %vm6717_vm1, %v6716_v15 }
0x1508   :  { %6174 = vmatpush3.bf16.msra.mxu0 %v6519_v21 }
0x1509   :  { %6175 = vmatprep.subr.bf16.mxu0 %v6716_v15 }
0x150c   :  { %6176 = vmatpush3.bf16.msra.mxu0 %v6520_v22 }
0x150d   :  { %6177 = vmatprep.subr.bf16.mxu0 %v6716_v15 }
0x1510   :  { %6178 = vmatpush3.bf16.msra.mxu0 %v6521_v23 }
0x1511   :  { %6195 = vmatprep.subr.bf16.mxu0 %v6716_v15 }
0x1513   :  { %6180 = vmatmul.mubr.msk.bf16.vlgmr.msra.gmra.mrb[72].mxu0 %vm74_vm0, %v7449_v20 }
0x1514   :  { %6197 = vmatprep.mubr.msk.bf16.mxu0 %vm6717_vm1, %v6716_v15 }
0x15d6   :  { %v2697_v24 = vpop.f32.mrb[68].mxu0  ;;  %v2861_v25 = vpop.f32.mrb[68].mxu1 }
0x15d7   :  { %v6169_v40 = vpop.f32.mrb[69].mxu0  ;;  %v6193_v27 = vpop.f32.mrb[69].mxu1  ;;  %v2862_v46 = vadd.f32 %v5402_v37, %v2861_v25  ;;  %v2698_v49 = vadd.f32 %v5372_v29, %v2697_v24 }
0x15d8   :  { %v2700_v28 = vpop.f32.mrb[70].mxu0  ;;  %v2864_v30 = vpop.f32.mrb[70].mxu1 }
0x15d9   :  { %v6170_v31 = vpop.f32.mrb[71].mxu0  ;;  %v6194_v32 = vpop.f32.mrb[71].mxu1  ;;  %v2865_v54 = vadd.f32 %v5402_v37, %v2864_v30  ;;  %v2872_v42 = vpack.c.bf16 %v2862_v46, %v2862_v46  ;;  %v2701_v52 = vadd.f32 %v5372_v29, %v2700_v28  ;;  %v2868_v53 = vpack.c.bf16 %v2698_v49, %v2698_v49  ;;  %v6522_v30 = vld [vmem:[%s8001_s23 + $0xa0] sm:$0xff]   ;;  %v6526_v37 = vld [vmem:[%s8001_s23 + $0xb0] sm:$0xff]   ;;  %v6531_v29 = vld [vmem:[%s7977_s5 + $0xa8] sm:$0xff]  }
0x15da   :  { %v6532_v46 = vld [vmem:[%s7977_s5 + $0xb0] sm:$0xff]  }
0x15db   :  { %v2873_v55 = vpack.c.bf16 %v2865_v54, %v2865_v54  ;;  %v2998_v56 = vsel %vm493_vm3, %v2872_v42, 0  ;;  %v2869_v57 = vpack.c.bf16 %v2701_v52, %v2701_v52 }
0x15dd   :  { %v3044_v58 = vsel %vm493_vm3, %v2873_v55, 0 }
0x15e6   :  { %v2779_v34 = vpop.f32.mrb[72].mxu0 }
0x15e7   :  { %v2780_v35 = vadd.f32 %v5387_v33, %v2779_v34  ;;  %v6181_v36 = vpop.f32.mrb[73].mxu0 }
0x15e8   :  { %v2782_v38 = vpop.f32.mrb[74].mxu0  ;;  %v6525_v36 = vld [vmem:[%s7976_s4 + $0xa8] sm:$0xff]  }
0x15e9   :  { %v2870_v41 = vpack.c.bf16 %v2780_v35, %v2780_v35  ;;  %v2783_v44 = vadd.f32 %v5387_v33, %v2782_v38  ;;  %v6182_v45 = vpop.f32.mrb[75].mxu0  ;;  %v6523_v33 = vld [vmem:[%s7976_s4 + $0xa0] sm:$0xff]   ;;  %v6524_v35 = vld [vmem:[%s8001_s23 + $0xa8] sm:$0xff]   ;;  %v6527_v38 = vld [vmem:[%s7976_s4 + $0xb0] sm:$0xff]  }
0x15ea   :  { %v6530_v45 = vld [vmem:[%s7977_s5 + $0xa0] sm:$0xff]  }
0x15eb   :  { %v2878_v47 = vsel %vm368_vm2, %v2870_v41, 0  ;;  %v2871_v48 = vpack.c.bf16 %v2783_v44, %v2783_v44  ;;  %v6528_v41 = vld [vmem:[%s8001_s23 + $0xb8] sm:$0xff]  }
0x15ec   :  { %6196 = vmatpush3.bf16.xpose.msra.mxu0 %v2878_v47  ;;  %v6529_v44 = vld [vmem:[%s7976_s4 + $0xb8] sm:$0xff]  }
0x15ed   :  { %v2924_v50 = vsel %vm368_vm2, %v2871_v48, 0  ;;  %6207 = vmatprep.subr.bf16.mxu0 %v6716_v15  ;;  %v6533_v47 = vld [vmem:[%s7977_s5 + $0xb8] sm:$0xff]  }
0x15ee   :  { %6202 = vmatpush3.bf16.xpose.msra.mxu1 %v2924_v50 }
0x15ef   :  { %6213 = vmatprep.subr.bf16.mxu1 %v6716_v15 }
0x15f3   :  { %6198 = vmatmul.mubr.msk.bf16.vlgmr.msra.gmra.mrb[76].mxu0 %vm368_vm2, %v2868_v53 }
0x15f4   :  { %6208 = vmatpush3.bf16.msra.mxu0 %v2998_v56  ;;  %6209 = vmatprep.mubr.msk.bf16.mxu0 %vm6717_vm1, %v6716_v15 }
0x15f5   :  { %6204 = vmatmul.mubr.msk.bf16.vlgmr.msra.gmra.mrb[72].mxu1 %vm368_vm2, %v2869_v57  ;;  %6219 = vmatprep.subr.bf16.mxu0 %v6716_v15 }
0x15f6   :  { %6214 = vmatpush3.bf16.msra.mxu1 %v3044_v58  ;;  %6215 = vmatprep.mubr.msk.bf16.mxu1 %vm6717_vm1, %v6716_v15  ;;  %v5438_v58 = vld [vmem:[%s7979_s7 + $0x5] ss:$0 sm:$0xff] }
0x15f7   :  { %6231 = vmatprep.subr.bf16.mxu1 %v6716_v15 }
0x16c6   :  { %v2914_v59 = vpop.f32.mrb[76].mxu0 }
0x16c7   :  { %v2966_v60 = vmul.f32 0.25, %v2914_v59  ;;  %v6199_v61 = vpop.f32.mrb[77].mxu0 }
0x16c8   :  { %v2917_v63 = vpop.f32.mrb[78].mxu0  ;;  %v2960_v0 = vpop.f32.mrb[72].mxu1 }
0x16c9   :  { %v2967_v4 = vmul.f32 0.25, %v2960_v0  ;;  %v6200_v5 = vpop.f32.mrb[79].mxu0  ;;  %v6205_v6 = vpop.f32.mrb[73].mxu1  ;;  %v2968_v7 = vadd.f32 %v2966_v60, %v6933_v17 }
0x16ca   :  { %v2963_v8 = vpop.f32.mrb[74].mxu1 }
0x16cb   :  { %v6206_v9 = vpop.f32.mrb[75].mxu1  ;;  %v2970_v10 = vsel %vm465_vm5, %v2968_v7, -inf  ;;  %v2969_v11 = vadd.f32 %v2967_v4, %v6933_v17  ;;  %v5423_v8 = vld [vmem:[%s7978_s6 + $0x5] ss:$0 sm:$0xff] }
0x16cc   :  { %2971 = vmax.xlane.f32.xlu1 %v2970_v10 }
0x16cd   :  { %v2973_v13 = vsel %vm465_vm5, %v2969_v11, -inf }
0x16ce   :  { %2974 = vmax.xlane.f32.xlu0 %v2973_v13 }
0x1759   :  { %v2972_v14 = vpop.xlane.xlu1 %2971 }
0x175a   :  { %v2976_v16 = vsub.f32 %v2968_v7, %v2972_v14 }
0x175b   :  { %v2975_v18 = vpop.xlane.xlu0 %2974 }
0x175c   :  { %v2978_v19 = vmul.f32 1.442695, %v2976_v16  ;;  %v2977_v62 = vsub.f32 %v2969_v11, %v2975_v18  ;;  %v5453_v16 = vld [vmem:[%s7980_s8 + $0x5] ss:$0 sm:$0xff] }
0x175e   :  { %6642 = vpow2.f32 %v2978_v19  ;;  %v2980_v1 = vmul.f32 1.442695, %v2977_v62 }
0x1760   :  { %6644 = vpow2.f32 %v2980_v1 }
0x1768   :  { %v6643_v2 = vpop.eup %6642 }
0x1769   :  { %v2982_v21 = vsel %vm465_vm5, %v6643_v2, 0.0 }
0x176a   :  { %v6645_v22 = vpop.eup %6644  ;;  %2983 = vadd.xlane.f32.xlu1 %v2982_v21 }
0x176b   :  { %v2985_v23 = vsel %vm465_vm5, %v6645_v22, 0.0 }
0x176c   :  { %2986 = vadd.xlane.f32.xlu0 %v2985_v23 }
0x17f7   :  { %v2984_v24 = vpop.xlane.xlu1 %2983 }
0x17f8   :  { %6646 = vrcp.f32 %v2984_v24 }
0x17f9   :  { %v2987_v25 = vpop.xlane.xlu0 %2986 }
0x17fa   :  { %6648 = vrcp.f32 %v2987_v25 }
0x1802   :  { %v6647_v40 = vpop.eup %6646 }
0x1803   :  { %v2989_v27 = vmul.f32 %v6647_v40, %v6643_v2 }
0x1804   :  { %v6649_v28 = vpop.eup %6648 }
0x1805   :  { %v2991_v31 = vmul.f32 %v6649_v28, %v6645_v22  ;;  %v2992_v32 = vpack.c.bf16 %v2989_v27, %v2989_v27 }
0x1807   :  { %6210 = vmatmul.mubr.msk.bf16.vlgmr.msra.gmra.mrb[80].mxu0 %vm465_vm5, %v2992_v32  ;;  %v2993_v34 = vpack.c.bf16 %v2991_v31, %v2991_v31 }
0x1808   :  { %6220 = vmatpush3.bf16.msra.mxu0 %v6522_v30  ;;  %6227 = vmatprep.mubr.msk.bf16.mxu0 %vm6717_vm1, %v6716_v15 }
0x1809   :  { %6216 = vmatmul.mubr.msk.bf16.vlgmr.msra.gmra.mrb[76].mxu1 %vm465_vm5, %v2993_v34  ;;  %6221 = vmatprep.subr.bf16.mxu0 %v6716_v15 }
0x180a   :  { %6232 = vmatpush3.bf16.msra.mxu1 %v6523_v33  ;;  %6239 = vmatprep.mubr.msk.bf16.mxu1 %vm6717_vm1, %v6716_v15 }
0x180b   :  { %6233 = vmatprep.subr.bf16.mxu1 %v6716_v15 }
0x180c   :  { %6222 = vmatpush3.bf16.msra.mxu0 %v6524_v35 }
0x180d   :  { %6223 = vmatprep.subr.bf16.mxu0 %v6716_v15 }
0x180e   :  { %6234 = vmatpush3.bf16.msra.mxu1 %v6525_v36 }
0x180f   :  { %6235 = vmatprep.subr.bf16.mxu1 %v6716_v15 }
0x1810   :  { %6224 = vmatpush3.bf16.msra.mxu0 %v6526_v37 }
0x1811   :  { %6225 = vmatprep.subr.bf16.mxu0 %v6716_v15 }
0x1812   :  { %6236 = vmatpush3.bf16.msra.mxu1 %v6527_v38 }
0x1813   :  { %6237 = vmatprep.subr.bf16.mxu1 %v6716_v15 }
0x1814   :  { %6226 = vmatpush3.bf16.msra.mxu0 %v6528_v41 }
0x1815   :  { %6243 = vmatprep.subr.bf16.mxu0 %v6716_v15 }
0x1816   :  { %6238 = vmatpush3.bf16.msra.mxu1 %v6529_v44 }
0x1817   :  { %6228 = vmatmul.mubr.msk.bf16.vlgmr.msra.gmra.mrb[84].mxu0 %vm74_vm0, %v7449_v20  ;;  %6255 = vmatprep.subr.bf16.mxu1 %v6716_v15 }
0x1818   :  { %6244 = vmatpush3.bf16.msra.mxu0 %v6530_v45  ;;  %6251 = vmatprep.mubr.msk.bf16.mxu0 %vm6717_vm1, %v6716_v15 }
0x1819   :  { %6240 = vmatmul.mubr.msk.bf16.vlgmr.msra.gmra.mrb[80].mxu1 %vm74_vm0, %v7449_v20  ;;  %6245 = vmatprep.subr.bf16.mxu0 %v6716_v15 }
0x181a   :  { %6257 = vmatprep.mubr.msk.bf16.mxu1 %vm6717_vm1, %v6716_v15 }
0x181c   :  { %6246 = vmatpush3.bf16.msra.mxu0 %v6531_v29 }
0x181d   :  { %6247 = vmatprep.subr.bf16.mxu0 %v6716_v15 }
0x1820   :  { %6248 = vmatpush3.bf16.msra.mxu0 %v6532_v46 }
0x1821   :  { %6249 = vmatprep.subr.bf16.mxu0 %v6716_v15 }
0x1824   :  { %6250 = vmatpush3.bf16.msra.mxu0 %v6533_v47 }
0x1825   :  { %6267 = vmatprep.subr.bf16.mxu0 %v6716_v15 }
0x1827   :  { %6252 = vmatmul.mubr.msk.bf16.vlgmr.msra.gmra.mrb[88].mxu0 %vm74_vm0, %v7449_v20 }
0x1828   :  { %6269 = vmatprep.mubr.msk.bf16.mxu0 %vm6717_vm1, %v6716_v15 }
0x18da   :  { %v7571_v48 = vpop.f32.mrb[80].mxu0 }
0x18db   :  { %v6211_v49 = vpop.f32.mrb[81].mxu0 }
0x18dc   :  { %v3037_v54 = vpop.f32.mrb[82].mxu0  ;;  %v7573_v50 = vpop.f32.mrb[76].mxu1 }
0x18dd   :  { %v3086_v42 = vpack.c.bf16 %v7573_v50, %v7571_v48  ;;  %v6212_v52 = vpop.f32.mrb[83].mxu0  ;;  %v6217_v53 = vpop.f32.mrb[77].mxu1  ;;  %v6538_v48 = vld [vmem:[%s7976_s4 + $0xd8] sm:$0xff]   ;;  %v6539_v50 = vld [vmem:[%s7981_s9 + $0x28] sm:$0xff]  }
0x18de   :  { %v3083_v55 = vpop.f32.mrb[78].mxu1 }
0x18df   :  { %v6218_v56 = vpop.f32.mrb[79].mxu1 }
0x18ea   :  { %v3165_v57 = vpop.f32.mrb[84].mxu0 }
0x18eb   :  { %v6229_v59 = vpop.f32.mrb[85].mxu0  ;;  %v3166_v11 = vadd.f32 %v5423_v8, %v3165_v57 }
0x18ec   :  { %v3168_v60 = vpop.f32.mrb[86].mxu0  ;;  %v3247_v61 = vpop.f32.mrb[80].mxu1 }
0x18ed   :  { %v3248_v63 = vadd.f32 %v5438_v58, %v3247_v61  ;;  %v6230_v0 = vpop.f32.mrb[87].mxu0  ;;  %v6241_v4 = vpop.f32.mrb[81].mxu1  ;;  %v3336_v14 = vpack.c.bf16 %v3166_v11, %v3166_v11  ;;  %v3169_v62 = vadd.f32 %v5423_v8, %v3168_v60  ;;  %v6537_v11 = vld [vmem:[%s7976_s4 + $0xd0] sm:$0xff]  }
0x18ee   :  { %v3250_v5 = vpop.f32.mrb[82].mxu1 }
0x18ef   :  { %v3338_v6 = vpack.c.bf16 %v3248_v63, %v3248_v63  ;;  %v6242_v7 = vpop.f32.mrb[83].mxu1  ;;  %v3251_v10 = vadd.f32 %v5438_v58, %v3250_v5  ;;  %v3337_v25 = vpack.c.bf16 %v3169_v62, %v3169_v62 }
0x18f0   :  { %v6534_v7 = vld [vmem:[%s7981_s9 + $0x20] sm:$0xff]  }
0x18f1   :  { %v3346_v9 = vsel %vm368_vm2, %v3338_v6, 0  ;;  %v3339_v13 = vpack.c.bf16 %v3251_v10, %v3251_v10  ;;  %v6536_v10 = vld [vmem:[%s7976_s4 + $0xc8] sm:$0xff]  }
0x18f2   :  { %6256 = vmatpush3.bf16.xpose.msra.mxu1 %v3346_v9  ;;  %v6535_v9 = vld [vmem:[%s7976_s4 + $0xc0] sm:$0xff]  }
0x18f3   :  { %6261 = vmatprep.subr.bf16.mxu1 %v6716_v15  ;;  %v3392_v18 = vsel %vm368_vm2, %v3339_v13, 0 }
0x18f9   :  { %6258 = vmatmul.mubr.msk.bf16.vlgmr.msra.gmra.mrb[84].mxu1 %vm368_vm2, %v3336_v14 }
0x18fa   :  { %v3329_v19 = vpop.f32.mrb[88].mxu0  ;;  %6262 = vmatpush3.bf16.xpose.msra.mxu1 %v3392_v18  ;;  %6263 = vmatprep.mubr.msk.bf16.mxu1 %vm6717_vm1, %v6716_v15 }
0x18fb   :  { %v3330_v1 = vadd.f32 %v5453_v16, %v3329_v19  ;;  %v6253_v2 = vpop.f32.mrb[89].mxu0  ;;  %6273 = vmatprep.subr.bf16.mxu1 %v6716_v15  ;;  %v6540_v19 = vld [vmem:[%s8001_s23 + $0xc0] sm:$0xff]  }
0x18fc   :  { %v3332_v21 = vpop.f32.mrb[90].mxu0 }
0x18fd   :  { %v3340_v22 = vpack.c.bf16 %v3330_v1, %v3330_v1  ;;  %v3333_v23 = vadd.f32 %v5453_v16, %v3332_v21  ;;  %v6254_v24 = vpop.f32.mrb[91].mxu0 }
0x18fe   :  { %v6542_v24 = vld [vmem:[%s8001_s23 + $0xd0] sm:$0xff]  }
0x18ff   :  { %v3466_v40 = vsel %vm493_vm3, %v3340_v22, 0  ;;  %v3341_v27 = vpack.c.bf16 %v3333_v23, %v3333_v23  ;;  %v6541_v22 = vld [vmem:[%s8001_s23 + $0xc8] sm:$0xff]  }
0x1900   :  { %6268 = vmatpush3.bf16.msra.mxu0 %v3466_v40 }
0x1901   :  { %v3512_v28 = vsel %vm493_vm3, %v3341_v27, 0  ;;  %6264 = vmatmul.mubr.msk.bf16.vlgmr.msra.gmra.mrb[88].mxu1 %vm368_vm2, %v3337_v25  ;;  %6279 = vmatprep.subr.bf16.mxu0 %v6716_v15 }
0x1902   :  { %6274 = vmatpush3.bf16.msra.mxu1 %v3512_v28  ;;  %6275 = vmatprep.mubr.msk.bf16.mxu1 %vm6717_vm1, %v6716_v15  ;;  %v6543_v28 = vld [vmem:[%s8001_s23 + $0xd8] sm:$0xff]  }
0x1903   :  { %6285 = vmatprep.subr.bf16.mxu1 %v6716_v15 }
0x19cc   :  { %v3382_v30 = vpop.f32.mrb[84].mxu1 }
0x19cd   :  { %v3434_v31 = vmul.f32 0.25, %v3382_v30  ;;  %v6259_v32 = vpop.f32.mrb[85].mxu1  ;;  %v6544_v30 = vld [vmem:[%s7977_s5 + $0xc0] sm:$0xff]  }
0x19ce   :  { %v3385_v33 = vpop.f32.mrb[86].mxu1  ;;  %v5493_v32 = vld [vmem:[%s7979_s7 + $0x6] ss:$0 sm:$0xff] }
0x19cf   :  { %v6260_v34 = vpop.f32.mrb[87].mxu1  ;;  %v3436_v35 = vadd.f32 %v3434_v31, %v6933_v17  ;;  %v6545_v31 = vld [vmem:[%s7977_s5 + $0xc8] sm:$0xff]  }
0x19d0   :  { %v6546_v34 = vld [vmem:[%s7977_s5 + $0xd0] sm:$0xff]  }
0x19d1   :  { %v3438_v36 = vsel %vm465_vm5, %v3436_v35, -inf }
0x19d2   :  { %3439 = vmax.xlane.f32.xlu0 %v3438_v36 }
0x19d4   :  { %v3428_v37 = vpop.f32.mrb[88].mxu1 }
0x19d5   :  { %v3435_v38 = vmul.f32 0.25, %v3428_v37  ;;  %v6265_v41 = vpop.f32.mrb[89].mxu1 }
0x19d6   :  { %v3431_v44 = vpop.f32.mrb[90].mxu1 }
0x19d7   :  { %v6266_v45 = vpop.f32.mrb[91].mxu1  ;;  %v3437_v29 = vadd.f32 %v3435_v38, %v6933_v17 }
0x19d8   :  { %v6547_v45 = vld [vmem:[%s7977_s5 + $0xd8] sm:$0xff]  }
0x19d9   :  { %v3441_v46 = vsel %vm465_vm5, %v3437_v29, -inf }
0x19da   :  { %3442 = vmax.xlane.f32.xlu1 %v3441_v46 }
0x1a5f   :  { %v3440_v47 = vpop.xlane.xlu0 %3439 }
0x1a60   :  { %v3444_v49 = vsub.f32 %v3436_v35, %v3440_v47 }
0x1a62   :  { %v3446_v54 = vmul.f32 1.442695, %v3444_v49 }
0x1a64   :  { %6650 = vpow2.f32 %v3446_v54 }
0x1a67   :  { %v3443_v52 = vpop.xlane.xlu1 %3442 }
0x1a68   :  { %v3445_v53 = vsub.f32 %v3437_v29, %v3443_v52 }
0x1a6a   :  { %v3448_v55 = vmul.f32 1.442695, %v3445_v53 }
0x1a6c   :  { %6652 = vpow2.f32 %v3448_v55  ;;  %v5478_v55 = vld [vmem:[%s7978_s6 + $0x6] ss:$0 sm:$0xff] }
0x1a6e   :  { %v6651_v56 = vpop.eup %6650 }
0x1a6f   :  { %v3450_v57 = vsel %vm465_vm5, %v6651_v56, 0.0 }
0x1a70   :  { %3451 = vadd.xlane.f32.xlu0 %v3450_v57 }
0x1a76   :  { %v6653_v58 = vpop.eup %6652 }
0x1a77   :  { %v3453_v59 = vsel %vm465_vm5, %v6653_v58, 0.0 }
0x1a78   :  { %3454 = vadd.xlane.f32.xlu1 %v3453_v59 }
0x1afd   :  { %v3452_v60 = vpop.xlane.xlu0 %3451 }
0x1afe   :  { %6654 = vrcp.f32 %v3452_v60 }
0x1b05   :  { %v3455_v61 = vpop.xlane.xlu1 %3454 }
0x1b06   :  { %6656 = vrcp.f32 %v3455_v61 }
0x1b08   :  { %v6655_v63 = vpop.eup %6654 }
0x1b09   :  { %v3457_v0 = vmul.f32 %v6655_v63, %v6651_v56 }
0x1b0b   :  { %v3460_v4 = vpack.c.bf16 %v3457_v0, %v3457_v0 }
0x1b0d   :  { %6270 = vmatmul.mubr.msk.bf16.vlgmr.msra.gmra.mrb[92].mxu0 %vm465_vm5, %v3460_v4 }
0x1b0e   :  { %6281 = vmatprep.mubr.msk.bf16.mxu0 %vm6717_vm1, %v6716_v15  ;;  %6280 = vmatpush3.bf16.msra.mxu0 %v6539_v50 }
0x1b0f   :  { %6291 = vmatprep.subr.bf16.mxu0 %v6716_v15 }
0x1b10   :  { %v6657_v5 = vpop.eup %6656 }
0x1b11   :  { %v3459_v6 = vmul.f32 %v6657_v5, %v6653_v58 }
0x1b13   :  { %v3461_v8 = vpack.c.bf16 %v3459_v6, %v3459_v6  ;;  %v5508_v6 = vld [vmem:[%s7980_s8 + $0x6] ss:$0 sm:$0xff] }
0x1b15   :  { %6276 = vmatmul.mubr.msk.bf16.vlgmr.msra.gmra.mrb[92].mxu1 %vm465_vm5, %v3461_v8 }
0x1b16   :  { %6286 = vmatpush3.bf16.msra.mxu1 %v6534_v7  ;;  %6287 = vmatprep.mubr.msk.bf16.mxu1 %vm6717_vm1, %v6716_v15 }
0x1b17   :  { %6303 = vmatprep.subr.bf16.mxu1 %v6716_v15 }
0x1b1d   :  { %6288 = vmatmul.mubr.msk.bf16.vlgmr.msra.gmra.mrb[96].mxu1 %vm368_vm2, %v3086_v42 }
0x1b1e   :  { %6304 = vmatpush3.bf16.msra.mxu1 %v6535_v9  ;;  %6311 = vmatprep.mubr.msk.bf16.mxu1 %vm6717_vm1, %v6716_v15 }
0x1b1f   :  { %6305 = vmatprep.subr.bf16.mxu1 %v6716_v15 }
0x1b22   :  { %6306 = vmatpush3.bf16.msra.mxu1 %v6536_v10 }
0x1b23   :  { %6307 = vmatprep.subr.bf16.mxu1 %v6716_v15 }
0x1b26   :  { %6308 = vmatpush3.bf16.msra.mxu1 %v6537_v11 }
0x1b27   :  { %6309 = vmatprep.subr.bf16.mxu1 %v6716_v15 }
0x1b2a   :  { %6310 = vmatpush3.bf16.msra.mxu1 %v6538_v48 }
0x1b2b   :  { %6327 = vmatprep.subr.bf16.mxu1 %v6716_v15 }
0x1b2d   :  { %6312 = vmatmul.mubr.msk.bf16.vlgmr.msra.gmra.mrb[100].mxu1 %vm74_vm0, %v7449_v20 }
0x1b2e   :  { %6329 = vmatprep.mubr.msk.bf16.mxu1 %vm6717_vm1, %v6716_v15 }
0x1be0   :  { %v3502_v42 = vpop.f32.mrb[92].mxu0 }
0x1be1   :  { %v6271_v13 = vpop.f32.mrb[93].mxu0 }
0x1be2   :  { %v3505_v14 = vpop.f32.mrb[94].mxu0 }
0x1be3   :  { %v6272_v16 = vpop.f32.mrb[95].mxu0 }
0x1be8   :  { %v3548_v18 = vpop.f32.mrb[92].mxu1 }
0x1be9   :  { %v3554_v62 = vpack.c.bf16 %v3548_v18, %v3502_v42  ;;  %v6277_v1 = vpop.f32.mrb[93].mxu1 }
0x1bea   :  { %v3551_v2 = vpop.f32.mrb[94].mxu1 }
0x1beb   :  { %v6278_v21 = vpop.f32.mrb[95].mxu1  ;;  %6282 = vmatmul.mubr.msk.bf16.vlgmr.msra.gmra.mrb[96].mxu0 %vm368_vm2, %v3554_v62 }
0x1bec   :  { %6292 = vmatpush3.bf16.msra.mxu0 %v6540_v19  ;;  %6299 = vmatprep.mubr.msk.bf16.mxu0 %vm6717_vm1, %v6716_v15 }
0x1bed   :  { %6293 = vmatprep.subr.bf16.mxu0 %v6716_v15 }
0x1bf0   :  { %6294 = vmatpush3.bf16.msra.mxu0 %v6541_v22  ;;  %v3651_v23 = vpop.f32.mrb[96].mxu1 }
0x1bf1   :  { %v6289_v25 = vpop.f32.mrb[97].mxu1  ;;  %6295 = vmatprep.subr.bf16.mxu0 %v6716_v15 }
0x1bf2   :  { %v3654_v40 = vpop.f32.mrb[98].mxu1 }
0x1bf3   :  { %v6290_v27 = vpop.f32.mrb[99].mxu1 }
0x1bf4   :  { %6296 = vmatpush3.bf16.msra.mxu0 %v6542_v24 }
0x1bf5   :  { %6297 = vmatprep.subr.bf16.mxu0 %v6716_v15 }
0x1bf8   :  { %6298 = vmatpush3.bf16.msra.mxu0 %v6543_v28 }
0x1bf9   :  { %6315 = vmatprep.subr.bf16.mxu0 %v6716_v15 }
0x1bfb   :  { %6300 = vmatmul.mubr.msk.bf16.vlgmr.msra.gmra.mrb[100].mxu0 %vm74_vm0, %v7449_v20 }
0x1bfc   :  { %6316 = vmatpush3.bf16.msra.mxu0 %v6544_v30  ;;  %6323 = vmatprep.mubr.msk.bf16.mxu0 %vm6717_vm1, %v6716_v15 }
0x1bfd   :  { %6317 = vmatprep.subr.bf16.mxu0 %v6716_v15 }
0x1c00   :  { %v3815_v33 = vpop.f32.mrb[100].mxu1  ;;  %6318 = vmatpush3.bf16.msra.mxu0 %v6545_v31 }
0x1c01   :  { %v3816_v35 = vadd.f32 %v5493_v32, %v3815_v33  ;;  %v6313_v36 = vpop.f32.mrb[101].mxu1  ;;  %6319 = vmatprep.subr.bf16.mxu0 %v6716_v15 }
0x1c02   :  { %v3818_v37 = vpop.f32.mrb[102].mxu1 }
0x1c03   :  { %v3906_v38 = vpack.c.bf16 %v3816_v35, %v3816_v35  ;;  %v3819_v41 = vadd.f32 %v5493_v32, %v3818_v37  ;;  %v6314_v44 = vpop.f32.mrb[103].mxu1 }
0x1c04   :  { %6320 = vmatpush3.bf16.msra.mxu0 %v6546_v34 }
0x1c05   :  { %v3914_v29 = vsel %vm368_vm2, %v3906_v38, 0  ;;  %6321 = vmatprep.subr.bf16.mxu0 %v6716_v15  ;;  %v3907_v57 = vpack.c.bf16 %v3819_v41, %v3819_v41 }
0x1c06   :  { %6328 = vmatpush3.bf16.xpose.msra.mxu1 %v3914_v29 }
0x1c07   :  { %6333 = vmatprep.subr.bf16.mxu1 %v6716_v15  ;;  %v3960_v0 = vsel %vm368_vm2, %v3907_v57, 0  ;;  %v6549_v57 = vld [vmem:[%s8001_s23 + $0xe8] sm:$0xff]  }
0x1c08   :  { %6322 = vmatpush3.bf16.msra.mxu0 %v6547_v45 }
0x1c09   :  { %6339 = vmatprep.subr.bf16.mxu0 %v6716_v15 }
0x1c0b   :  { %6324 = vmatmul.mubr.msk.bf16.vlgmr.msra.gmra.mrb[104].mxu0 %vm74_vm0, %v7449_v20 }
0x1c0c   :  { %6341 = vmatprep.mubr.msk.bf16.mxu0 %vm6717_vm1, %v6716_v15 }
0x1cbe   :  { %v3601_v46 = vpop.f32.mrb[96].mxu0 }
0x1cbf   :  { %v7694_v47 = vadd.f32 %v3651_v23, %v3601_v46  ;;  %v6283_v49 = vpop.f32.mrb[97].mxu0 }
0x1cc0   :  { %v3604_v54 = vpop.f32.mrb[98].mxu0 }
0x1cc1   :  { %v7696_v52 = vadd.f32 %v3654_v40, %v3604_v54  ;;  %v6284_v53 = vpop.f32.mrb[99].mxu0 }
0x1cce   :  { %v3733_v56 = vpop.f32.mrb[100].mxu0 }
0x1ccf   :  { %v3734_v58 = vadd.f32 %v5478_v55, %v3733_v56  ;;  %v6301_v59 = vpop.f32.mrb[101].mxu0 }
0x1cd0   :  { %v3736_v60 = vpop.f32.mrb[102].mxu0  ;;  %v6551_v59 = vld [vmem:[%s8001_s23 + $0xf8] sm:$0xff]  }
0x1cd1   :  { %v3904_v61 = vpack.c.bf16 %v3734_v58, %v3734_v58  ;;  %v6302_v63 = vpop.f32.mrb[103].mxu0  ;;  %v3737_v4 = vadd.f32 %v5478_v55, %v3736_v60  ;;  %v6548_v55 = vld [vmem:[%s8001_s23 + $0xe0] sm:$0xff]   ;;  %v6550_v58 = vld [vmem:[%s8001_s23 + $0xf0] sm:$0xff]  }
0x1cd2   :  { %v6552_v60 = vld [vmem:[%s7977_s5 + $0xe0] sm:$0xff]   ;;  %v6554_v63 = vld [vmem:[%s7977_s5 + $0xf0] sm:$0xff]  }
0x1cd3   :  { %6330 = vmatmul.mubr.msk.bf16.vlgmr.msra.gmra.mrb[104].mxu1 %vm368_vm2, %v3904_v61  ;;  %v3905_v5 = vpack.c.bf16 %v3737_v4, %v3737_v4  ;;  %v6553_v61 = vld [vmem:[%s7977_s5 + $0xe8] sm:$0xff]   ;;  %v6556_v4 = vld [vmem:[%s7981_s9 + $0x30] sm:$0xff]  }
0x1cd4   :  { %6334 = vmatpush3.bf16.xpose.msra.mxu1 %v3960_v0  ;;  %6335 = vmatprep.mubr.msk.bf16.mxu1 %vm6717_vm1, %v6716_v15  ;;  %v6555_v0 = vld [vmem:[%s7977_s5 + $0xf8] sm:$0xff]  }
0x1cd5   :  { %6345 = vmatprep.subr.bf16.mxu1 %v6716_v15 }
0x1cdb   :  { %6336 = vmatmul.mubr.msk.bf16.vlgmr.msra.gmra.mrb[108].mxu1 %vm368_vm2, %v3905_v5 }
0x1cdc   :  { %6347 = vmatprep.mubr.msk.bf16.mxu1 %vm6717_vm1, %v6716_v15 }
0x1cde   :  { %v3897_v7 = vpop.f32.mrb[104].mxu0 }
0x1cdf   :  { %v3898_v8 = vadd.f32 %v5508_v6, %v3897_v7  ;;  %v6325_v9 = vpop.f32.mrb[105].mxu0 }
0x1ce0   :  { %v3900_v10 = vpop.f32.mrb[106].mxu0 }
0x1ce1   :  { %v3908_v11 = vpack.c.bf16 %v3898_v8, %v3898_v8  ;;  %v3901_v48 = vadd.f32 %v5508_v6, %v3900_v10  ;;  %v6326_v50 = vpop.f32.mrb[107].mxu0  ;;  %v6557_v10 = vld [vmem:[%s7976_s4 + $0xe0] sm:$0xff]  }
0x1ce3   :  { %v4034_v42 = vsel %vm493_vm3, %v3908_v11, 0  ;;  %v3909_v13 = vpack.c.bf16 %v3901_v48, %v3901_v48 }
0x1ce4   :  { %6340 = vmatpush3.bf16.msra.mxu0 %v4034_v42 }
0x1ce5   :  { %v4080_v14 = vsel %vm493_vm3, %v3909_v13, 0  ;;  %6351 = vmatprep.subr.bf16.mxu0 %v6716_v15  ;;  %v6558_v13 = vld [vmem:[%s7976_s4 + $0xe8] sm:$0xff]  }
0x1ce6   :  { %6346 = vmatpush3.bf16.msra.mxu1 %v4080_v14  ;;  %v6559_v14 = vld [vmem:[%s7976_s4 + $0xf0] sm:$0xff]  }
0x1ce7   :  { %6357 = vmatprep.subr.bf16.mxu1 %v6716_v15 }
0x1da6   :  { %v3950_v16 = vpop.f32.mrb[104].mxu1 }
0x1da7   :  { %v4002_v18 = vmul.f32 0.25, %v3950_v16  ;;  %v6331_v19 = vpop.f32.mrb[105].mxu1  ;;  %v6560_v16 = vld [vmem:[%s7976_s4 + $0xf8] sm:$0xff]  }
0x1da8   :  { %v3953_v62 = vpop.f32.mrb[106].mxu1 }
0x1da9   :  { %v6332_v1 = vpop.f32.mrb[107].mxu1  ;;  %v4004_v2 = vadd.f32 %v4002_v18, %v6933_v17 }
0x1dab   :  { %v4006_v21 = vsel %vm465_vm5, %v4004_v2, -inf }
0x1dac   :  { %4007 = vmax.xlane.f32.xlu0 %v4006_v21 }
0x1dae   :  { %v3996_v22 = vpop.f32.mrb[108].mxu1 }
0x1daf   :  { %v4003_v23 = vmul.f32 0.25, %v3996_v22  ;;  %v6337_v24 = vpop.f32.mrb[109].mxu1 }
0x1db0   :  { %v3999_v25 = vpop.f32.mrb[110].mxu1 }
0x1db1   :  { %v6338_v40 = vpop.f32.mrb[111].mxu1  ;;  %v4005_v27 = vadd.f32 %v4003_v23, %v6933_v17 }
0x1db3   :  { %v4009_v28 = vsel %vm465_vm5, %v4005_v27, -inf }
0x1db4   :  { %4010 = vmax.xlane.f32.xlu1 %v4009_v28 }
0x1e39   :  { %v4008_v30 = vpop.xlane.xlu0 %4007 }
0x1e3a   :  { %v4012_v31 = vsub.f32 %v4004_v2, %v4008_v30  ;;  %v5561_v2 = vld [vmem:[%s7980_s8 + $0x7] ss:$0 sm:$0xff] }
0x1e3c   :  { %v4014_v32 = vmul.f32 1.442695, %v4012_v31 }
0x1e3e   :  { %6658 = vpow2.f32 %v4014_v32 }
0x1e41   :  { %v4011_v33 = vpop.xlane.xlu1 %4010 }
0x1e42   :  { %v4013_v34 = vsub.f32 %v4005_v27, %v4011_v33 }
0x1e44   :  { %v4016_v35 = vmul.f32 1.442695, %v4013_v34 }
0x1e46   :  { %6660 = vpow2.f32 %v4016_v35  ;;  %v5546_v35 = vld [vmem:[%s7979_s7 + $0x7] ss:$0 sm:$0xff] }
0x1e48   :  { %v6659_v36 = vpop.eup %6658 }
0x1e49   :  { %v4018_v37 = vsel %vm465_vm5, %v6659_v36, 0.0 }
0x1e4a   :  { %4019 = vadd.xlane.f32.xlu0 %v4018_v37 }
0x1e50   :  { %v6661_v38 = vpop.eup %6660 }
0x1e51   :  { %v4021_v41 = vsel %vm465_vm5, %v6661_v38, 0.0 }
0x1e52   :  { %4022 = vadd.xlane.f32.xlu1 %v4021_v41 }
0x1ed7   :  { %v4020_v44 = vpop.xlane.xlu0 %4019 }
0x1ed8   :  { %6662 = vrcp.f32 %v4020_v44 }
0x1edf   :  { %v4023_v45 = vpop.xlane.xlu1 %4022 }
0x1ee0   :  { %6664 = vrcp.f32 %v4023_v45 }
0x1ee2   :  { %v6663_v29 = vpop.eup %6662 }
0x1ee3   :  { %v4025_v46 = vmul.f32 %v6663_v29, %v6659_v36 }
0x1ee5   :  { %v4028_v49 = vpack.c.bf16 %v4025_v46, %v4025_v46 }
0x1ee7   :  { %6342 = vmatmul.mubr.msk.bf16.vlgmr.msra.gmra.mrb[108].mxu0 %vm465_vm5, %v4028_v49 }
0x1ee8   :  { %6353 = vmatprep.mubr.msk.bf16.mxu0 %vm6717_vm1, %v6716_v15  ;;  %6352 = vmatpush3.bf16.msra.mxu0 %v6556_v4 }
0x1ee9   :  { %6369 = vmatprep.subr.bf16.mxu0 %v6716_v15 }
0x1eea   :  { %v6665_v54 = vpop.eup %6664 }
0x1eeb   :  { %v4027_v53 = vmul.f32 %v6665_v54, %v6661_v38 }
0x1eed   :  { %v4029_v56 = vpack.c.bf16 %v4027_v53, %v4027_v53 }
0x1eef   :  { %6348 = vmatmul.mubr.msk.bf16.vlgmr.msra.gmra.mrb[112].mxu1 %vm465_vm5, %v4029_v56 }
0x1ef0   :  { %6358 = vmatpush3.bf16.msra.mxu1 %v6548_v55  ;;  %6365 = vmatprep.mubr.msk.bf16.mxu1 %vm6717_vm1, %v6716_v15 }
0x1ef1   :  { %6359 = vmatprep.subr.bf16.mxu1 %v6716_v15 }
0x1ef4   :  { %6360 = vmatpush3.bf16.msra.mxu1 %v6549_v57 }
0x1ef5   :  { %6361 = vmatprep.subr.bf16.mxu1 %v6716_v15 }
0x1ef8   :  { %6362 = vmatpush3.bf16.msra.mxu1 %v6550_v58 }
0x1ef9   :  { %6363 = vmatprep.subr.bf16.mxu1 %v6716_v15 }
0x1efc   :  { %6364 = vmatpush3.bf16.msra.mxu1 %v6551_v59 }
0x1efd   :  { %6381 = vmatprep.subr.bf16.mxu1 %v6716_v15 }
0x1eff   :  { %6366 = vmatmul.mubr.msk.bf16.vlgmr.msra.gmra.mrb[116].mxu1 %vm74_vm0, %v7449_v20 }
0x1f00   :  { %6382 = vmatpush3.bf16.msra.mxu1 %v6552_v60  ;;  %6389 = vmatprep.mubr.msk.bf16.mxu1 %vm6717_vm1, %v6716_v15 }
0x1f01   :  { %6383 = vmatprep.subr.bf16.mxu1 %v6716_v15 }
0x1f04   :  { %6384 = vmatpush3.bf16.msra.mxu1 %v6553_v61 }
0x1f05   :  { %6385 = vmatprep.subr.bf16.mxu1 %v6716_v15 }
0x1f08   :  { %6386 = vmatpush3.bf16.msra.mxu1 %v6554_v63 }
0x1f09   :  { %6387 = vmatprep.subr.bf16.mxu1 %v6716_v15 }
0x1f0c   :  { %6388 = vmatpush3.bf16.msra.mxu1 %v6555_v0 }
0x1f0d   :  { %6405 = vmatprep.subr.bf16.mxu1 %v6716_v15 }
0x1f0f   :  { %6390 = vmatmul.mubr.msk.bf16.vlgmr.msra.gmra.mrb[120].mxu1 %vm74_vm0, %v7449_v20 }
0x1f10   :  { %6407 = vmatprep.mubr.msk.bf16.mxu1 %vm6717_vm1, %v6716_v15 }
0x1fba   :  { %v4070_v5 = vpop.f32.mrb[108].mxu0 }
0x1fbb   :  { %v6343_v6 = vpop.f32.mrb[109].mxu0 }
0x1fbc   :  { %v4073_v7 = vpop.f32.mrb[110].mxu0 }
0x1fbd   :  { %v6344_v8 = vpop.f32.mrb[111].mxu0 }
0x1fc2   :  { %v4116_v9 = vpop.f32.mrb[112].mxu1 }
0x1fc3   :  { %v4122_v11 = vpack.c.bf16 %v4116_v9, %v4070_v5  ;;  %v6349_v48 = vpop.f32.mrb[113].mxu1 }
0x1fc4   :  { %v4119_v50 = vpop.f32.mrb[114].mxu1 }
0x1fc5   :  { %v6350_v42 = vpop.f32.mrb[115].mxu1  ;;  %6354 = vmatmul.mubr.msk.bf16.vlgmr.msra.gmra.mrb[112].mxu0 %vm368_vm2, %v4122_v11 }
0x1fc6   :  { %6370 = vmatpush3.bf16.msra.mxu0 %v6557_v10  ;;  %6377 = vmatprep.mubr.msk.bf16.mxu0 %vm6717_vm1, %v6716_v15 }
0x1fc7   :  { %6371 = vmatprep.subr.bf16.mxu0 %v6716_v15 }
0x1fca   :  { %6372 = vmatpush3.bf16.msra.mxu0 %v6558_v13 }
0x1fcb   :  { %6373 = vmatprep.subr.bf16.mxu0 %v6716_v15 }
0x1fce   :  { %6374 = vmatpush3.bf16.msra.mxu0 %v6559_v14 }
0x1fcf   :  { %6375 = vmatprep.subr.bf16.mxu0 %v6716_v15 }
0x1fd2   :  { %v4253_v18 = vpop.f32.mrb[116].mxu1  ;;  %6376 = vmatpush3.bf16.msra.mxu0 %v6560_v16 }
0x1fd3   :  { %v6367_v19 = vpop.f32.mrb[117].mxu1  ;;  %6393 = vmatprep.subr.bf16.mxu0 %v6716_v15 }
0x1fd4   :  { %v4256_v62 = vpop.f32.mrb[118].mxu1 }
0x1fd5   :  { %v6368_v1 = vpop.f32.mrb[119].mxu1  ;;  %6378 = vmatmul.mubr.msk.bf16.vlgmr.msra.gmra.mrb[116].mxu0 %vm74_vm0, %v7449_v20 }
0x1fd6   :  { %6395 = vmatprep.mubr.msk.bf16.mxu0 %vm6717_vm1, %v6716_v15 }
0x1fe2   :  { %v4417_v21 = vpop.f32.mrb[120].mxu1 }
0x1fe3   :  { %v4418_v22 = vadd.f32 %v5561_v2, %v4417_v21  ;;  %v6391_v23 = vpop.f32.mrb[121].mxu1 }
0x1fe4   :  { %v4420_v24 = vpop.f32.mrb[122].mxu1 }
0x1fe5   :  { %v4428_v25 = vpack.c.bf16 %v4418_v22, %v4418_v22  ;;  %v4421_v40 = vadd.f32 %v5561_v2, %v4420_v24  ;;  %v6392_v27 = vpop.f32.mrb[123].mxu1 }
0x1fe7   :  { %v4554_v28 = vsel %vm493_vm3, %v4428_v25, 0  ;;  %v4429_v56 = vpack.c.bf16 %v4421_v40, %v4421_v40 }
0x1fe8   :  { %6406 = vmatpush3.bf16.msra.mxu1 %v4554_v28  ;;  %v6561_v28 = vld [vmem:[%s7981_s9 + $0x38] sm:$0xff]  }
0x1fe9   :  { %6417 = vmatprep.subr.bf16.mxu1 %v6716_v15  ;;  %v4600_v58 = vsel %vm493_vm3, %v4429_v56, 0 }
0x2098   :  { %v4169_v20 = vpop.f32.mrb[112].mxu0 }
0x2099   :  { %v7801_v30 = vadd.f32 %v4169_v20, %v7694_v47  ;;  %v6355_v31 = vpop.f32.mrb[113].mxu0  ;;  %v5531_v47 = vld [vmem:[%s7978_s6 + $0x7] ss:$0 sm:$0xff] }
0x209a   :  { %v4172_v32 = vpop.f32.mrb[114].mxu0  ;;  %v4257_v55 = vadd.f32 %v5531_v47, %v4256_v62 }
0x209b   :  { %v7804_v33 = vadd.f32 %v4172_v32, %v7696_v52  ;;  %v6356_v34 = vpop.f32.mrb[115].mxu0  ;;  %v4254_v52 = vadd.f32 %v5531_v47, %v4253_v18 }
0x209c   :  { %v4425_v57 = vpack.c.bf16 %v4257_v55, %v4257_v55 }
0x209d   :  { %v4424_v54 = vpack.c.bf16 %v4254_v52, %v4254_v52 }
0x20a8   :  { %v4335_v36 = vpop.f32.mrb[116].mxu0 }
0x20a9   :  { %v4336_v37 = vadd.f32 %v5546_v35, %v4335_v36  ;;  %v6379_v38 = vpop.f32.mrb[117].mxu0 }
0x20aa   :  { %v4338_v41 = vpop.f32.mrb[118].mxu0 }
0x20ab   :  { %v4426_v44 = vpack.c.bf16 %v4336_v37, %v4336_v37  ;;  %v6380_v45 = vpop.f32.mrb[119].mxu0  ;;  %v4339_v46 = vadd.f32 %v5546_v35, %v4338_v41 }
0x20ac   :  { %v5576_v45 = vld [vmem:[%s7982_s10 + $0x1] ss:$0 sm:$0xff] }
0x20ad   :  { %v4434_v29 = vsel %vm368_vm2, %v4426_v44, 0  ;;  %v4427_v49 = vpack.c.bf16 %v4339_v46, %v4339_v46 }
0x20ae   :  { %6394 = vmatpush3.bf16.xpose.msra.mxu0 %v4434_v29 }
0x20af   :  { %6399 = vmatprep.subr.bf16.mxu0 %v6716_v15  ;;  %v4480_v53 = vsel %vm368_vm2, %v4427_v49, 0 }
0x20b5   :  { %6396 = vmatmul.mubr.msk.bf16.vlgmr.msra.gmra.mrb[120].mxu0 %vm368_vm2, %v4424_v54 }
0x20b6   :  { %6400 = vmatpush3.bf16.xpose.msra.mxu0 %v4480_v53  ;;  %6401 = vmatprep.mubr.msk.bf16.mxu0 %vm6717_vm1, %v6716_v15 }
0x20b7   :  { %6411 = vmatprep.subr.bf16.mxu0 %v6716_v15 }
0x20bd   :  { %6402 = vmatmul.mubr.msk.bf16.vlgmr.msra.gmra.mrb[124].mxu0 %vm368_vm2, %v4425_v57 }
0x20be   :  { %6412 = vmatpush3.bf16.msra.mxu0 %v4600_v58  ;;  %6413 = vmatprep.mubr.msk.bf16.mxu0 %vm6717_vm1, %v6716_v15 }
0x2188   :  { %v4470_v59 = vpop.f32.mrb[120].mxu0 }
0x2189   :  { %v4522_v60 = vmul.f32 0.25, %v4470_v59  ;;  %v6397_v61 = vpop.f32.mrb[121].mxu0 }
0x218a   :  { %v4473_v63 = vpop.f32.mrb[122].mxu0 }
0x218b   :  { %v6398_v0 = vpop.f32.mrb[123].mxu0  ;;  %v4524_v4 = vadd.f32 %v4522_v60, %v6933_v17 }
0x218c   :  { %v6564_v0 = vld [vmem:[%s7985_s13 + $0x44] ss:$8 sps:$4 sm:$0xff]  }
0x218d   :  { %v4526_v5 = vsel %vm465_vm5, %v4524_v4, -inf  ;;  %4822 = vmatprep.subr.bf16.mxu0 %v6564_v0 }
0x218e   :  { %4527 = vmax.xlane.f32.xlu0 %v4526_v5  ;;  %v6567_v5 = vld [vmem:[%s7985_s13 + $0x54] ss:$8 sps:$4 sm:$0xff]  }
0x2190   :  { %v4516_v6 = vpop.f32.mrb[124].mxu0 }
0x2191   :  { %v4523_v7 = vmul.f32 0.25, %v4516_v6  ;;  %v6403_v8 = vpop.f32.mrb[125].mxu0  ;;  %v6565_v6 = vld [vmem:[%s7985_s13 + $0x50] ss:$8 sps:$4 sm:$0xff]  }
0x2192   :  { %v4519_v9 = vpop.f32.mrb[126].mxu0  ;;  %v6568_v8 = vld [vmem:[%s7985_s13 + $0x60] ss:$8 sps:$4 sm:$0xff]  }
0x2193   :  { %v6404_v10 = vpop.f32.mrb[127].mxu0  ;;  %v4525_v11 = vadd.f32 %v4523_v7, %v6933_v17  ;;  %v6570_v7 = vld [vmem:[%s7985_s13 + $0x64] ss:$8 sps:$4 sm:$0xff]   ;;  %v6571_v9 = vld [vmem:[%s7985_s13 + $0x70] ss:$8 sps:$4 sm:$0xff]  }
0x2194   :  { %v6573_v10 = vld [vmem:[%s7985_s13 + $0x74] ss:$8 sps:$4 sm:$0xff]  }
0x2195   :  { %v4529_v48 = vsel %vm465_vm5, %v4525_v11, -inf }
0x2196   :  { %4530 = vmax.xlane.f32.xlu1 %v4529_v48 }
0x221b   :  { %v4528_v50 = vpop.xlane.xlu0 %4527 }
0x221c   :  { %v4532_v42 = vsub.f32 %v4524_v4, %v4528_v50  ;;  %v6562_v4 = vld [vmem:[%s7985_s13 + $0x40] ss:$8 sps:$4 sm:$0xff]  }
0x221e   :  { %v4534_v13 = vmul.f32 1.442695, %v4532_v42 }
0x2220   :  { %6666 = vpow2.f32 %v4534_v13 }
0x2223   :  { %v4531_v14 = vpop.xlane.xlu1 %4530 }
0x2224   :  { %v4533_v16 = vsub.f32 %v4525_v11, %v4531_v14 }
0x2226   :  { %v4536_v18 = vmul.f32 1.442695, %v4533_v16 }
0x2228   :  { %6668 = vpow2.f32 %v4536_v18  ;;  %v5579_v18 = vld [vmem:[%s7983_s11 + $0x1] ss:$0 sm:$0xff] }
0x222a   :  { %v6667_v19 = vpop.eup %6666 }
0x222b   :  { %v4538_v62 = vsel %vm465_vm5, %v6667_v19, 0.0 }
0x222c   :  { %4539 = vadd.xlane.f32.xlu0 %v4538_v62 }
0x2232   :  { %v6669_v1 = vpop.eup %6668 }
0x2233   :  { %v4541_v2 = vsel %vm465_vm5, %v6669_v1, 0.0 }
0x2234   :  { %4542 = vadd.xlane.f32.xlu1 %v4541_v2 }
0x22b9   :  { %v4540_v17 = vpop.xlane.xlu0 %4539 }
0x22ba   :  { %6670 = vrcp.f32 %v4540_v17  ;;  %v5580_v17 = vld [vmem:[%s7984_s12 + $0x1] ss:$0 sm:$0xff] }
0x22c1   :  { %v4543_v21 = vpop.xlane.xlu1 %4542 }
0x22c2   :  { %6672 = vrcp.f32 %v4543_v21 }
0x22c4   :  { %v6671_v22 = vpop.eup %6670 }
0x22c5   :  { %v4545_v23 = vmul.f32 %v6671_v22, %v6667_v19 }
0x22c7   :  { %v4548_v24 = vpack.c.bf16 %v4545_v23, %v4545_v23 }
0x22c9   :  { %6408 = vmatmul.mubr.msk.bf16.vlgmr.msra.gmra.mrb[124].mxu1 %vm465_vm5, %v4548_v24 }
0x22ca   :  { %6419 = vmatprep.mubr.msk.bf16.mxu1 %vm6717_vm1, %v6716_v15  ;;  %6418 = vmatpush3.bf16.msra.mxu1 %v6561_v28  ;;  %v6577_v28 = vld [vmem:[%s7987_s15 + $0x88] sm:$0xff]  }
0x22cc   :  { %v6673_v25 = vpop.eup %6672 }
0x22cd   :  { %v4547_v40 = vmul.f32 %v6673_v25, %v6669_v1  ;;  %v6574_v25 = vld [vmem:[%s7987_s15 + $0xc0] sm:$0xff]  }
0x22ce   :  { %5873 = vmatprep.subr.bf16.mxu1 %v6574_v25 }
0x22cf   :  { %v4549_v27 = vpack.c.bf16 %v4547_v40, %v4547_v40  ;;  %v6575_v40 = vld [vmem:[%s7987_s15 + $0x80] sm:$0xff]  }
0x22d1   :  { %6414 = vmatmul.mubr.msk.bf16.vlgmr.msra.gmra.mrb[128].mxu0 %vm465_vm5, %v4549_v27  ;;  %v6576_v27 = vld [vmem:[%s7987_s15 + $0xc8] sm:$0xff]  }
0x22d2   :  { %4854 = vmatprep.mubr.bf16.mxu0 %v6719_v3  ;;  %4823 = vmatpush1.bf16.msra.mxu0 %v6562_v4 }
0x22d3   :  { %4824 = vmatprep.subr.bf16.mxu0 %v6567_v5 }
0x22d6   :  { %4825 = vmatpush1.bf16.msra.mxu0 %v6565_v6 }
0x22d7   :  { %4826 = vmatprep.subr.bf16.mxu0 %v6570_v7 }
0x22da   :  { %4827 = vmatpush1.bf16.msra.mxu0 %v6568_v8 }
0x22db   :  { %4828 = vmatprep.subr.bf16.mxu0 %v6573_v10 }
0x22de   :  { %4829 = vmatpush1.bf16.msra.mxu0 %v6571_v9 }
0x239c   :  { %v4590_v20 = vpop.f32.mrb[124].mxu1 }
0x239d   :  { %v6409_v31 = vpop.f32.mrb[125].mxu1 }
0x239e   :  { %v4593_v32 = vpop.f32.mrb[126].mxu1  ;;  %v6579_v31 = vld [vmem:[%s7987_s15 + $0x90] sm:$0xff]  }
0x239f   :  { %v6410_v34 = vpop.f32.mrb[127].mxu1  ;;  %v6580_v32 = vld [vmem:[%s7987_s15 + $0xd8] sm:$0xff]  }
0x23a0   :  { %v6581_v34 = vld [vmem:[%s7987_s15 + $0x98] sm:$0xff]  }
0x23a4   :  { %v4636_v35 = vpop.f32.mrb[128].mxu0 }
0x23a5   :  { %v4642_v36 = vpack.c.bf16 %v4636_v35, %v4590_v20  ;;  %v6415_v37 = vpop.f32.mrb[129].mxu0  ;;  %v6578_v20 = vld [vmem:[%s7987_s15 + $0xd0] sm:$0xff]   ;;  %v6582_v35 = vld [vmem:[%s7987_s15 + $0xe0] sm:$0xff]  }
0x23a6   :  { %v4639_v15 = vpop.f32.mrb[130].mxu0  ;;  %v6584_v37 = vld [vmem:[%s7987_s15 + $0xe8] sm:$0xff]  }
0x23a7   :  { %v6416_v38 = vpop.f32.mrb[131].mxu0  ;;  %6420 = vmatmul.mubr.msk.bf16.vlgmr.msra.gmra.mrb[128].mxu1 %vm368_vm2, %v4642_v36  ;;  %v6583_v36 = vld [vmem:[%s7987_s15 + $0xa0] sm:$0xff]   ;;  %v6585_v15 = vld [vmem:[%s7987_s15 + $0xa8] sm:$0xff]  }
0x23a8   :  { %5874 = vmatpush3.bf16.msra.mxu1 %v6575_v40  ;;  %v6586_v38 = vld [vmem:[%s7987_s15 + $0xf0] sm:$0xff]  }
0x23a9   :  { %5875 = vmatprep.subr.bf16.mxu1 %v6576_v27 }
0x23ac   :  { %5876 = vmatpush3.bf16.msra.mxu1 %v6577_v28 }
0x23ad   :  { %5877 = vmatprep.subr.bf16.mxu1 %v6578_v20  ;;  %v5632_v20 = vld [vmem:[%s7988_s16 + $0x1] ss:$0 sm:$0xff] }
0x23b0   :  { %5878 = vmatpush3.bf16.msra.mxu1 %v6579_v31 }
0x23b1   :  { %5879 = vmatprep.subr.bf16.mxu1 %v6580_v32 }
0x23b4   :  { %5880 = vmatpush3.bf16.msra.mxu1 %v6581_v34 }
0x23b5   :  { %5881 = vmatprep.subr.bf16.mxu1 %v6582_v35 }
0x23b8   :  { %5882 = vmatpush3.bf16.msra.mxu1 %v6583_v36 }
0x23b9   :  { %5883 = vmatprep.subr.bf16.mxu1 %v6584_v37 }
0x23bc   :  { %5884 = vmatpush3.bf16.msra.mxu1 %v6585_v15 }
0x23bd   :  { %5885 = vmatprep.subr.bf16.mxu1 %v6586_v38 }
0x247a   :  { %v4689_v41 = vpop.f32.mrb[128].mxu1 }
0x247b   :  { %v4696_v44 = vadd.f32 %v4689_v41, %v7801_v30  ;;  %v6421_v3 = vpop.f32.mrb[129].mxu1  ;;  %v6587_v41 = vld [vmem:[%s7987_s15 + $0xb0] sm:$0xff]  }
0x247c   :  { %v4692_v47 = vpop.f32.mrb[130].mxu1  ;;  %5886 = vmatpush3.bf16.msra.mxu1 %v6587_v41  ;;  %v6589_v3 = vld [vmem:[%s7987_s15 + $0xb8] sm:$0xff]  }
0x247d   :  { %v4698_v29 = vadd.f32 %v4696_v44, %v7395_v26  ;;  %v4697_v46 = vadd.f32 %v4692_v47, %v7804_v33  ;;  %v6422_v52 = vpop.f32.mrb[131].mxu1  ;;  %v6588_v44 = vld [vmem:[%s7987_s15 + $0xf8] sm:$0xff]  }
0x247e   :  { %5887 = vmatprep.subr.bf16.mxu1 %v6588_v44 }
0x247f   :  { %v7844_v49 = vadd.f32 %v5576_v45, %v4698_v29  ;;  %v4699_v54 = vadd.f32 %v4697_v46, %v7398_v43 }
0x2480   :  { %5888 = vmatpush3.bf16.msra.mxu1 %v6589_v3 }
0x2481   :  { %v7847_v53 = vadd.f32 %v5576_v45, %v4699_v54  ;;  %v4714_v30 = vsel %vm74_vm0, %v7844_v49, 0.0  ;;  %v5589_v45 = vld [vmem:[%s7986_s14 + $0x2] sm:$0x3] }
0x2482   :  { %4715 = vadd.xlane.f32.xlu0 %v4714_v30  ;;  %v4772_v47 = vrot.slane %v5589_v45, %v2262_v51  ;;  %v4776_v29 = vrot.slane %v5589_v45, %v2266_v39 }
0x2483   :  { %v4717_v55 = vsel %vm74_vm0, %v7847_v53, 0.0 }
0x2484   :  { %4718 = vadd.xlane.f32.xlu1 %v4717_v55 }
0x250f   :  { %v4716_v56 = vpop.xlane.xlu0 %4715 }
0x2510   :  { %v4720_v57 = vmul.f32 0.015625, %v4716_v56 }
0x2511   :  { %v4719_v26 = vpop.xlane.xlu1 %4718 }
0x2512   :  { %v4722_v33 = vsub.f32 %v7844_v49, %v4720_v57  ;;  %v4721_v58 = vmul.f32 0.015625, %v4719_v26 }
0x2514   :  { %v4723_v59 = vsub.f32 %v7847_v53, %v4721_v58  ;;  %v4724_v60 = vmul.f32 %v4722_v33, %v4722_v33 }
0x2516   :  { %v4726_v43 = vsel %vm74_vm0, %v4724_v60, 0.0  ;;  %v4725_v61 = vmul.f32 %v4723_v59, %v4723_v59 }
0x2517   :  { %4727 = vadd.xlane.f32.xlu0 %v4726_v43 }
0x2518   :  { %v4729_v63 = vsel %vm74_vm0, %v4725_v61, 0.0 }
0x2519   :  { %4730 = vadd.xlane.f32.xlu1 %v4729_v63 }
0x25a4   :  { %v4728_v11 = vpop.xlane.xlu0 %4727 }
0x25a5   :  { %v4732_v48 = vmul.f32 0.015625, %v4728_v11 }
0x25a6   :  { %v4731_v50 = vpop.xlane.xlu1 %4730 }
0x25a7   :  { %v4734_v42 = vadd.f32 1e-05, %v4732_v48  ;;  %v4733_v13 = vmul.f32 0.015625, %v4731_v50 }
0x25a9   :  { %6674 = vrsqrt.f32 %v4734_v42  ;;  %v4735_v14 = vadd.f32 1e-05, %v4733_v13 }
0x25ab   :  { %6676 = vrsqrt.f32 %v4735_v14 }
0x25b3   :  { %v6675_v16 = vpop.eup %6674 }
0x25b4   :  { %v4738_v19 = vmul.f32 %v6675_v16, %v4722_v33 }
0x25b5   :  { %v6677_v62 = vpop.eup %6676 }
0x25b6   :  { %v4746_v1 = vmul.f32 %v5579_v18, %v4738_v19  ;;  %v4739_v2 = vmul.f32 %v6677_v62, %v4723_v59 }
0x25b8   :  { %v4747_v21 = vmul.f32 %v5579_v18, %v4739_v2  ;;  %v4754_v22 = vadd.f32 %v5580_v17, %v4746_v1 }
0x25ba   :  { %v4755_v23 = vadd.f32 %v5580_v17, %v4747_v21 }
0x25bc   :  { %v4756_v24 = vpack.c.bf16 %v4755_v23, %v4754_v22 }
0x25be   :  { %5598 = vmatmul.mubr.msk.bf16.vlgmr.msra.gmra.mrb[132].mxu0 %vm74_vm0, %v4756_v24 }
0x2691   :  { %v4856_v46 = vpop.f32.mrb[132].mxu0 }
0x2692   :  { %v4857_v52 = vadd.f32 %v4856_v46, %v4772_v47  ;;  %v4858_v54 = vpop.f32.mrb[133].mxu0 }
0x2693   :  { %v4859_v30 = vadd.f32 %v4858_v54, %v4776_v29  ;;  %v4860_v55 = vpop.f32.mrb[134].mxu0 }
0x2694   :  { %v4869_v56 = vmul.f32 0.044715, %v4857_v52  ;;  %v4861_v57 = vadd.f32 %v4860_v55, %v4772_v47  ;;  %v4862_v26 = vpop.f32.mrb[135].mxu0  ;;  %v4865_v19 = vmul.f32 0.5, %v4857_v52 }
0x2695   :  { %v4870_v33 = vmul.f32 0.044715, %v4859_v30  ;;  %v4863_v58 = vadd.f32 %v4862_v26, %v4776_v29  ;;  %v4866_v2 = vmul.f32 0.5, %v4859_v30 }
0x2696   :  { %v4873_v59 = vmul.f32 %v4869_v56, %v4857_v52  ;;  %v4871_v60 = vmul.f32 0.044715, %v4861_v57  ;;  %v4867_v62 = vmul.f32 0.5, %v4861_v57 }
0x2697   :  { %v4874_v43 = vmul.f32 %v4870_v33, %v4859_v30  ;;  %v4872_v61 = vmul.f32 0.044715, %v4863_v58  ;;  %v4868_v17 = vmul.f32 0.5, %v4863_v58 }
0x2698   :  { %v4877_v63 = vmul.f32 %v4873_v59, %v4857_v52  ;;  %v4875_v0 = vmul.f32 %v4871_v60, %v4861_v57 }
0x2699   :  { %v4878_v51 = vmul.f32 %v4874_v43, %v4859_v30  ;;  %v4876_v4 = vmul.f32 %v4872_v61, %v4863_v58  ;;  %v5649_v43 = vld [vmem:[%s7989_s17] ss:$0 sm:$0xff] }
0x269a   :  { %v4881_v12 = vadd.f32 %v4877_v63, %v4857_v52  ;;  %v4879_v39 = vmul.f32 %v4875_v0, %v4861_v57  ;;  %v5650_v0 = vld [vmem:[%s7990_s18] ss:$0 sm:$0xff] }
0x269b   :  { %v4880_v5 = vmul.f32 %v4876_v4, %v4863_v58  ;;  %v4882_v6 = vadd.f32 %v4878_v51, %v4859_v30 }
0x269c   :  { %v4885_v7 = vmul.f32 0.7978846, %v4881_v12  ;;  %v4883_v8 = vadd.f32 %v4879_v39, %v4861_v57 }
0x269d   :  { %v4884_v9 = vadd.f32 %v4880_v5, %v4863_v58  ;;  %v4886_v10 = vmul.f32 0.7978846, %v4882_v6 }
0x269e   :  { %6678 = vtanh.f32 %v4885_v7  ;;  %v4887_v11 = vmul.f32 0.7978846, %v4883_v8 }
0x269f   :  { %v4888_v48 = vmul.f32 0.7978846, %v4884_v9  ;;  %6680 = vtanh.f32 %v4886_v10 }
0x26a0   :  { %6682 = vtanh.f32 %v4887_v11 }
0x26a1   :  { %6684 = vtanh.f32 %v4888_v48 }
0x26a8   :  { %v6679_v50 = vpop.eup %6678 }
0x26a9   :  { %v6681_v42 = vpop.eup %6680  ;;  %v4893_v13 = vadd.f32 1.0, %v6679_v50 }
0x26aa   :  { %v6683_v14 = vpop.eup %6682  ;;  %v4894_v16 = vadd.f32 1.0, %v6681_v42 }
0x26ab   :  { %v6685_v18 = vpop.eup %6684  ;;  %v4895_v1 = vadd.f32 1.0, %v6683_v14  ;;  %v4897_v22 = vmul.f32 %v4893_v13, %v4865_v19 }
0x26ac   :  { %v4896_v21 = vadd.f32 1.0, %v6685_v18  ;;  %v4898_v24 = vmul.f32 %v4894_v16, %v4866_v2 }
0x26ad   :  { %v4899_v23 = vmul.f32 %v4895_v1, %v4867_v62 }
0x26ae   :  { %v4900_v25 = vmul.f32 %v4896_v21, %v4868_v17 }
0x26af   :  { %v4901_v40 = vpack.c.bf16 %v4899_v23, %v4897_v22 }
0x26b0   :  { %v4902_v27 = vpack.c.bf16 %v4900_v25, %v4898_v24 }
0x26b2   :  { %5072 = vmatprep.mubr.bf16.mxu1 %v4902_v27 }
0x26b3   :  { %5073 = vmatmul.mubr.bf16.vlgmr.msra.gmra.mrb[132].mxu1 %v4901_v40 }
0x2786   :  { %v5889_v28 = vpop.f32.mrb[132].mxu1 }
0x2787   :  { %v5890_v31 = vpop.f32.mrb[133].mxu1 }
0x2788   :  { %v5891_v32 = vadd.f32 %v5890_v31, %v5889_v28  ;;  %v5892_v34 = vpop.f32.mrb[134].mxu1 }
0x2789   :  { %v5893_v35 = vpop.f32.mrb[135].mxu1 }
0x278a   :  { %v5075_v36 = vadd.f32 %v5891_v32, %v5632_v20  ;;  %v5894_v37 = vadd.f32 %v5893_v35, %v5892_v34 }
0x278c   :  { %v5078_v15 = vadd.f32 %v5894_v37, %v5632_v20  ;;  %v5081_v38 = vadd.f32 %v5075_v36, %v7844_v49 }
0x278e   :  { %v5085_v41 = vsel %vm74_vm0, %v5081_v38, 0.0  ;;  %v5082_v44 = vadd.f32 %v5078_v15, %v7847_v53 }
0x278f   :  { %5086 = vadd.xlane.f32.xlu0 %v5085_v41 }
0x2790   :  { %v5088_v3 = vsel %vm74_vm0, %v5082_v44, 0.0 }
0x2791   :  { %5089 = vadd.xlane.f32.xlu1 %v5088_v3 }
0x281c   :  { %v5087_v45 = vpop.xlane.xlu0 %5086 }
0x281d   :  { %v5091_v47 = vmul.f32 0.015625, %v5087_v45 }
0x281e   :  { %v5090_v29 = vpop.xlane.xlu1 %5089 }
0x281f   :  { %v5093_v46 = vsub.f32 %v5081_v38, %v5091_v47  ;;  %v5092_v52 = vmul.f32 0.015625, %v5090_v29 }
0x2821   :  { %v5094_v54 = vsub.f32 %v5082_v44, %v5092_v52  ;;  %v5095_v30 = vmul.f32 %v5093_v46, %v5093_v46 }
0x2823   :  { %v5097_v55 = vsel %vm74_vm0, %v5095_v30, 0.0  ;;  %v5096_v56 = vmul.f32 %v5094_v54, %v5094_v54 }
0x2824   :  { %5098 = vadd.xlane.f32.xlu0 %v5097_v55 }
0x2825   :  { %v5100_v49 = vsel %vm74_vm0, %v5096_v56, 0.0 }
0x2826   :  { %5101 = vadd.xlane.f32.xlu1 %v5100_v49 }
0x28b1   :  { %v5099_v57 = vpop.xlane.xlu0 %5098 }
0x28b2   :  { %v5103_v53 = vmul.f32 0.015625, %v5099_v57 }
0x28b3   :  { %v5102_v26 = vpop.xlane.xlu1 %5101 }
0x28b4   :  { %v5105_v33 = vadd.f32 1e-05, %v5103_v53  ;;  %v5104_v58 = vmul.f32 0.015625, %v5102_v26 }
0x28b6   :  { %6686 = vrsqrt.f32 %v5105_v33  ;;  %v5106_v59 = vadd.f32 1e-05, %v5104_v58 }
0x28b8   :  { %6688 = vrsqrt.f32 %v5106_v59 }
0x28c0   :  { %v6687_v60 = vpop.eup %6686 }
0x28c1   :  { %v5109_v61 = vmul.f32 %v6687_v60, %v5093_v46 }
0x28c2   :  { %v6689_v63 = vpop.eup %6688 }
0x28c3   :  { %v5110_v51 = vmul.f32 %v6689_v63, %v5094_v54  ;;  %v5117_v4 = vmul.f32 %v5649_v43, %v5109_v61 }
0x28c5   :  { %v5118_v12 = vmul.f32 %v5649_v43, %v5110_v51  ;;  %v5125_v39 = vadd.f32 %v5650_v0, %v5117_v4 }
0x28c7   :  { %v5126_v5 = vadd.f32 %v5650_v0, %v5118_v12  ;;  %5127 = vst.msk [vmem:[#allocation2] sm:$0xff] %vm74_vm0, %v5125_v39 }
0x28c9   :  { %5128 = vst.msk [vmem:[#allocation2 + $0x8] sm:$0xff] %vm74_vm0, %v5126_v5 }
0x28ca   :  { %6703 = shalt.err (!%p6700_p4)
}
0x28cb   :  { %s6704_s26 = scalar_lea.hbm %s7991_s19, 256 }
0x28cc   :  { %p6705_p5 = scmp.ne.s32.totalorder %s7991_s19, %s6704_s26  ;;  %p6708_p6 = scmp.lt.u32.totalorder %s6704_s26, %s7991_s19 }
0x28ce   :  { %p6710_p7 = pnand %p6708_p6, %p6705_p5 }
0x28d0   :  { %6713 = shalt.err (!%p6710_p7)
}
0x28d1   :  { %s6721_s8 = smov 128   ;;  %s6722_s23 = smov 8  }
0x28d2   :  { %5140 = dma.vmem_to_hbm [thread:$0]  %s5135_s0, 256, %s7991_s19, [#allocation3], %s6721_s8, %s6721_s8, %s6722_s23  }
0x28d3   :  { %6714 = dma.done.wait [#allocation3], 256  }
0x28d4   :  { %6715 = vsyncadd [#allocation3], 4294967040 }
0x28d5   :  { %5144 = vsyncpa [#allocation3], 1 }

</bundles_post_ra>
